<compile_context>
chip_gen: v7x
topology: tpu7x:2x2x1
jax: 0.10.0
libtpu: 0.0.40
codegen_flags: <defaults>
</compile_context>

<pallas_src>
import jax
import jax.numpy as jnp
import numpy as np
from jax import lax
from jax.experimental import pallas as pl
from jax.experimental.pallas import tpu as pltpu

HEADS = 2
OUT_FEATS = 16                  # GATConv per-head out_channels
HC = HEADS * OUT_FEATS          # concat width = 32
MLP_HIDDEN = 32
OUT_PAD = 128                   # lane-dense padded width of the final output
NEG_SLOPE = 0.2                 # GATConv default LeakyReLU slope
NEG_BIG = -1e30                 # finite "-inf" for masked scores (f32-safe)
TILE = 128                      # target / source / node tile ((8,128)-aligned)


def _round_up(v, m):
    return (v + m - 1) // m * m


# --------------------------------------------------------------------------
# Kernel 1: GATConv + edge-linear scatter, tiled with online softmax
# --------------------------------------------------------------------------
def gat_node_kernel(xt_ref, xs_ref, adj_ref, ea_ref, ssrc_ref,
                    wg_ref, atts_ref, attd_ref, bg_ref, we_ref, be_ref,
                    out_ref, m_sc, l_sc, acc_sc):
    k = pl.program_id(1)
    nk = pl.num_programs(1)

    @pl.when(k == 0)
    def _init():
        m_sc[...] = jnp.full(m_sc.shape, NEG_BIG, jnp.float32)
        l_sc[...] = jnp.zeros_like(l_sc)
        acc_sc[...] = jnp.zeros_like(acc_sc)

    # ---- GATConv linear transform for this tile's target & source rows ----
    wg = wg_ref[...]                                                  # [F_in, HC]
    xp_t = jnp.dot(xt_ref[...], wg, preferred_element_type=jnp.float32)   # [T, HC]
    xp_s = jnp.dot(xs_ref[...], wg, preferred_element_type=jnp.float32)   # [S, HC]
    xp_s_bf = xp_s.astype(jnp.bfloat16)

    # Both heads' attention projections with a single dot each
    # (block-structured [H, HC] attention matrices built in the wrapper).
    a_dst = lax.dot_general(xp_t, attd_ref[...], (((1,), (1,)), ((), ())),
                            preferred_element_type=jnp.float32)       # [T, H]
    a_src = lax.dot_general(atts_ref[...], xp_s, (((1,), (1,)), ((), ())),
                            preferred_element_type=jnp.float32)       # [H, S]

    adj = adj_ref[...].astype(jnp.float32)                            # 0/1 [T, S]
    adj_mask = adj > 0.0

    for h in range(HEADS):                                            # static, unrolled
        lo = h * OUT_FEATS
        e = a_dst[:, h:h + 1] + a_src[h:h + 1, :]                     # [T, S]
        e = jnp.maximum(e, NEG_SLOPE * e)                             # LeakyReLU
        e_m = jnp.where(adj_mask, e, NEG_BIG)                         # masked for rowmax
        m_prev = m_sc[h]                                              # [T, 1]
        m_new = jnp.maximum(m_prev, jnp.max(e_m, axis=-1, keepdims=True))
        corr = jnp.exp(m_prev - m_new)                                # [T, 1]
        p = adj * jnp.exp(e_m - m_new)                                # exact 0 off-edge
        l_sc[h] = corr * l_sc[h] + jnp.sum(p, axis=-1, keepdims=True)
        acc_sc[h] = corr * acc_sc[h] + jnp.dot(
            p.astype(jnp.bfloat16), xp_s_bf[:, lo:lo + OUT_FEATS],
            preferred_element_type=jnp.float32)                       # [T, C]
        m_sc[h] = m_new

    @pl.when(k == nk - 1)
    def _finalize():
        # edge_lin + scatter-add onto source nodes (masked matmul, heads fused).
        ef = jnp.dot(ea_ref[...], we_ref[...],
                     preferred_element_type=jnp.float32) + be_ref[...]      # [E, HC]
        agg = jnp.dot(ssrc_ref[...], ef.astype(jnp.bfloat16),
                      preferred_element_type=jnp.float32)                   # [T, HC]
        for h in range(HEADS):
            lo = h * OUT_FEATS
            inv_l = pl.reciprocal(l_sc[h], approx=True)                     # [T, 1]
            out_ref[:, lo:lo + OUT_FEATS] = (acc_sc[h] * inv_l
                                             + bg_ref[:, lo:lo + OUT_FEATS]
                                             + agg[:, lo:lo + OUT_FEATS])


# --------------------------------------------------------------------------
# Kernel 2: global_add_pool (reduction over node tiles) + MLP, lane-dense out
# --------------------------------------------------------------------------
def pool_mlp_kernel(pool_ref, comb_ref, w1_ref, b1_ref, w2_ref, b2_ref,
                    out_ref, pooled_sc):
    k = pl.program_id(0)

    @pl.when(k == 0)
    def _init():
        pooled_sc[...] = jnp.zeros_like(pooled_sc)

    pooled_sc[...] += jnp.dot(pool_ref[...], comb_ref[...].astype(jnp.bfloat16),
                              preferred_element_type=jnp.float32)      # [G, HC]

    @pl.when(k == pl.num_programs(0) - 1)
    def _finalize():
        h1 = jnp.dot(pooled_sc[...], w1_ref[...],
                     preferred_element_type=jnp.float32) + b1_ref[...]      # [G, 32]
        out_ref[...] = jnp.dot(h1, w2_ref[...],
                               preferred_element_type=jnp.float32) + b2_ref[...]


# --------------------------------------------------------------------------
# Wrapper
# --------------------------------------------------------------------------
def gat_forward(x, edge_index, edge_attr, batch, params, tile=TILE):
    N, f_in = x.shape
    E = edge_index.shape[1]
    f_e = edge_attr.shape[1]
    G = int(batch.max()) + 1

    n_pad = _round_up(N, tile)
    e_pad = _round_up(E, 128)
    g_pad = _round_up(G, 8)

    src, dst = edge_index[0], edge_index[1]

    # Structural 0/1 matrices in bf16 (exact, half the HBM/DMA of f32).
    # Padded rows get a self loop (keeps their softmax finite); padded columns of
    # adj / ssrc / pool are all-zero so padding never leaks into real outputs.
    # TODO(synk): duplicate (parallel) edges collapse in the dense adjacency,
    # unlike PyG's per-edge softmax; inputs here are assumed duplicate-free.
    # TODO(synk): for very large graphs, build adj/ssrc tiles in-kernel from
    # edge lists via scalar prefetch instead of O(N^2) wrapper densification.
    adj = jnp.zeros((n_pad, n_pad), jnp.float32).at[dst, src].set(1.0)
    adj = adj.at[jnp.arange(n_pad), jnp.arange(n_pad)].set(1.0)   # add_self_loops
    adj = adj.astype(jnp.bfloat16)
    ssrc = (jnp.zeros((n_pad, e_pad), jnp.float32)
            .at[src, jnp.arange(E)].set(1.0).astype(jnp.bfloat16))
    pool = (jnp.zeros((g_pad, n_pad), jnp.float32)
            .at[batch, jnp.arange(N)].set(1.0).astype(jnp.bfloat16))

    x_pad = jnp.zeros((n_pad, f_in), jnp.float32).at[:N].set(x.astype(jnp.float32))
    ea_pad = (jnp.zeros((e_pad, f_e), jnp.float32)
              .at[:E].set(edge_attr.astype(jnp.float32)).astype(jnp.bfloat16))

    # Block-structured attention matrices: one dot per tile covers both heads.
    att_src = params['att_src'].reshape(HEADS, OUT_FEATS)
    att_dst = params['att_dst'].reshape(HEADS, OUT_FEATS)
    atts_mat = jnp.zeros((HEADS, HC), jnp.float32)
    attd_mat = jnp.zeros((HEADS, HC), jnp.float32)
    for h in range(HEADS):
        lo = h * OUT_FEATS
        atts_mat = atts_mat.at[h, lo:lo + OUT_FEATS].set(att_src[h])
        attd_mat = attd_mat.at[h, lo:lo + OUT_FEATS].set(att_dst[h])

    we_bf = params['wet'].astype(jnp.bfloat16)

    n_t = n_pad // tile
    n_s = n_pad // tile

    def tgt_map(i, k):
        return (i, 0)

    def src_map(i, k):
        return (k, 0)

    def adj_map(i, k):
        return (i, k)

    def fix_map(i, k):
        return (0, 0)

    cost1 = pl.CostEstimate(
        flops=int(2 * n_pad * n_pad * HC + 2 * n_pad * e_pad * HC
                  + 4 * n_pad * f_in * HC * n_s + 8 * HEADS * n_pad * n_pad),
        transcendentals=int(HEADS * n_pad * n_pad),
        bytes_accessed=int(adj.size * 2 + ssrc.size * 2 + ea_pad.size * 2
                           + 2 * x_pad.size * 4 * n_s + n_pad * HC * 4))

    combined = pl.pallas_call(
        gat_node_kernel,
        grid=(n_t, n_s),
        in_specs=[
            pl.BlockSpec((tile, f_in), tgt_map),       # x rows for targets
            pl.BlockSpec((tile, f_in), src_map),       # x rows for sources
            pl.BlockSpec((tile, tile), adj_map),       # adjacency tile (bf16)
            pl.BlockSpec((e_pad, f_e), fix_map),       # edge attrs (resident)
            pl.BlockSpec((tile, e_pad), tgt_map),      # edge-source incidence
            pl.BlockSpec((f_in, HC), fix_map),         # W_gat
            pl.BlockSpec((HEADS, HC), fix_map),        # att_src (block structured)
            pl.BlockSpec((HEADS, HC), fix_map),        # att_dst (block structured)
            pl.BlockSpec((1, HC), fix_map),            # GAT bias
            pl.BlockSpec((f_e, HC), fix_map),          # W_edge
            pl.BlockSpec((1, HC), fix_map),            # edge bias
        ],
        out_specs=pl.BlockSpec((tile, HC), tgt_map),
        out_shape=jax.ShapeDtypeStruct((n_pad, HC), jnp.float32),
        scratch_shapes=[
            pltpu.VMEM((HEADS, tile, 1), jnp.float32),          # running max
            pltpu.VMEM((HEADS, tile, 1), jnp.float32),          # running denom
            pltpu.VMEM((HEADS, tile, OUT_FEATS), jnp.float32),  # running numerator
        ],
        compiler_params=pltpu.CompilerParams(
            dimension_semantics=("parallel", "arbitrary")),
        cost_estimate=cost1,
    )(x_pad, x_pad, adj, ea_pad, ssrc, params['wgt'], atts_mat, attd_mat,
      params['b_gat'], we_bf, params['b_edge'])

    # ---- global_add_pool + MLP (lane-dense 128-wide padded output) ---------
    w2_pad = jnp.zeros((MLP_HIDDEN, OUT_PAD), jnp.float32).at[:, :1].set(params['w2t'])
    b2_pad = jnp.zeros((1, OUT_PAD), jnp.float32).at[:, :1].set(params['b2'])

    cost2 = pl.CostEstimate(
        flops=int(2 * g_pad * n_pad * HC + 2 * g_pad * HC * MLP_HIDDEN
                  + 2 * g_pad * MLP_HIDDEN * OUT_PAD),
        transcendentals=0,
        bytes_accessed=int(pool.size * 2 + n_pad * HC * 4 + g_pad * OUT_PAD * 4))

    out_pad = pl.pallas_call(
        pool_mlp_kernel,
        grid=(n_pad // tile,),
        in_specs=[
            pl.BlockSpec((g_pad, tile), lambda k: (0, k)),
            pl.BlockSpec((tile, HC), lambda k: (k, 0)),
            pl.BlockSpec((HC, MLP_HIDDEN), lambda k: (0, 0)),
            pl.BlockSpec((1, MLP_HIDDEN), lambda k: (0, 0)),
            pl.BlockSpec((MLP_HIDDEN, OUT_PAD), lambda k: (0, 0)),
            pl.BlockSpec((1, OUT_PAD), lambda k: (0, 0)),
        ],
        out_specs=pl.BlockSpec((g_pad, OUT_PAD), lambda k: (0, 0)),
        out_shape=jax.ShapeDtypeStruct((g_pad, OUT_PAD), jnp.float32),
        scratch_shapes=[pltpu.VMEM((g_pad, HC), jnp.float32)],
        compiler_params=pltpu.CompilerParams(
            dimension_semantics=("arbitrary",)),
        cost_estimate=cost2,
    )(pool, combined, params['w1t'], params['b1'], w2_pad, b2_pad)

    return out_pad[:G, :1]


# --------------------------------------------------------------------------
# Pure-JAX reference (f32, mirrors the PyTorch/PyG forward)
# --------------------------------------------------------------------------
def ref_forward(x, edge_index, edge_attr, batch, params):
    x = x.astype(jnp.float32)
    edge_attr = edge_attr.astype(jnp.float32)
    N = x.shape[0]
    xp = x @ params['wgt']
    src, dst = edge_index[0], edge_index[1]
    loop = jnp.arange(N)
    src_l = jnp.concatenate([src, loop])
    dst_l = jnp.concatenate([dst, loop])
    outs = []
    for h in range(HEADS):
        sl = slice(h * OUT_FEATS, (h + 1) * OUT_FEATS)
        xph = xp[:, sl]
        a_s = (xph * params['att_src'][:, sl]).sum(-1)
        a_d = (xph * params['att_dst'][:, sl]).sum(-1)
        e = a_d[dst_l] + a_s[src_l]
        e = jnp.where(e > 0, e, NEG_SLOPE * e)
        emax = jnp.full((N,), -jnp.inf).at[dst_l].max(e)
        ee = jnp.exp(e - emax[dst_l])
        denom = jnp.zeros((N,)).at[dst_l].add(ee)
        alpha = ee / denom[dst_l]
        outs.append(jnp.zeros((N, OUT_FEATS)).at[dst_l].add(alpha[:, None] * xph[src_l]))
    node_out = jnp.concatenate(outs, -1) + params['b_gat']
    ef = edge_attr @ params['wet'] + params['b_edge']
    agg = jnp.zeros_like(node_out).at[src].add(ef)
    combined = node_out + agg
    G = int(batch.max()) + 1
    pooled = jnp.zeros((G, combined.shape[1])).at[batch].add(combined)
    h1 = pooled @ params['w1t'] + params['b1']
    return h1 @ params['w2t'] + params['b2']


if __name__ == "__main__":
    F_IN, F_E = 8, 4
    key = jax.random.PRNGKey(0)
    ks = jax.random.split(key, 16)

    params = {
        'wgt':     jax.random.normal(ks[0], (F_IN, HC), jnp.float32) * 0.2,
        'att_src': jax.random.normal(ks[1], (1, HC), jnp.float32) * 0.2,
        'att_dst': jax.random.normal(ks[2], (1, HC), jnp.float32) * 0.2,
        'b_gat':   jax.random.normal(ks[3], (1, HC), jnp.float32) * 0.05,
        'wet':     jax.random.normal(ks[4], (F_E, HC), jnp.float32) * 0.2,
        'b_edge':  jax.random.normal(ks[5], (1, HC), jnp.float32) * 0.1,
        'w1t':     jax.random.normal(ks[6], (HC, MLP_HIDDEN), jnp.float32) * 0.2,
        'b1':      jax.random.normal(ks[7], (1, MLP_HIDDEN), jnp.float32) * 0.1,
        'w2t':     jax.random.normal(ks[8], (MLP_HIDDEN, 1), jnp.float32) * 0.2,
        'b2':      jnp.zeros((1, 1), jnp.float32),
    }

    def check(out, ref, tag):
        out = np.asarray(out)
        ref = np.asarray(ref)
        scale = max(1.0, float(np.max(np.abs(ref))))
        if not np.allclose(out, ref, rtol=2e-2, atol=2e-2 * scale):
            raise AssertionError(
                f"{tag}: max |diff|={np.max(np.abs(out - ref)):.4f} scale={scale:.3f}")

    # --- test 1: tiny 2-graph example (grid collapses to a single tile) -----
    x1 = jax.random.normal(ks[9], (8, F_IN), jnp.float32)
    ea1 = jax.random.normal(ks[10], (16, F_E), jnp.float32)
    src1 = jnp.array([0, 1, 1, 2, 2, 3, 0, 3, 4, 5, 5, 6, 6, 7, 4, 7], jnp.int32)
    dst1 = jnp.array([1, 0, 2, 1, 3, 2, 3, 0, 5, 4, 6, 5, 7, 6, 7, 4], jnp.int32)
    ei1 = jnp.stack([src1, dst1])
    batch1 = jnp.array([0, 0, 0, 0, 1, 1, 1, 1], jnp.int32)

    out1 = jax.block_until_ready(gat_forward(x1, ei1, ea1, batch1, params))
    ref1 = ref_forward(x1, ei1, ea1, batch1, params)
    assert out1.shape == (2, 1)
    check(out1, ref1, "small graph")

    # --- test 2: larger random graph (exercises the 2x2 tiled grid, the
    #     online-softmax carry across source tiles, and the pooled reduction) --
    N2 = 200
    batch2 = jnp.concatenate([jnp.zeros(N2 // 2, jnp.int32),
                              jnp.ones(N2 - N2 // 2, jnp.int32)])
    same_graph = batch2[:, None] == batch2[None, :]
    mask = jax.random.bernoulli(ks[11], 0.05, (N2, N2))
    mask = jnp.logical_and(jnp.logical_and(mask, same_graph),
                           ~jnp.eye(N2, dtype=bool))
    rows, cols = jnp.nonzero(mask)
    ei2 = jnp.stack([cols.astype(jnp.int32), rows.astype(jnp.int32)])  # src, dst
    E2 = ei2.shape[1]
    x2 = jax.random.normal(ks[12], (N2, F_IN), jnp.float32)
    ea2 = jax.random.normal(ks[13], (E2, F_E), jnp.float32)

    out2 = jax.block_until_ready(gat_forward(x2, ei2, ea2, batch2, params))
    ref2 = ref_forward(x2, ei2, ea2, batch2, params)
    assert out2.shape == (2, 1)
    check(out2, ref2, "tiled graph")

    print("KERNEL_OK")
</pallas_src>

<mosaic_0001>
module attributes {stable_mosaic.version = 11 : i64} {
  func.func @gat_node_kernel(%arg0: i32, %arg1: i32, %arg2: memref<128x8xf32, #tpu.memory_space<vmem>>, %arg3: memref<128x8xf32, #tpu.memory_space<vmem>>, %arg4: memref<128x128xbf16, #tpu.memory_space<vmem>>, %arg5: memref<128x4xbf16, #tpu.memory_space<vmem>>, %arg6: memref<128x128xbf16, #tpu.memory_space<vmem>>, %arg7: memref<8x32xf32, #tpu.memory_space<vmem>>, %arg8: memref<2x32xf32, #tpu.memory_space<vmem>>, %arg9: memref<2x32xf32, #tpu.memory_space<vmem>>, %arg10: memref<1x32xf32, #tpu.memory_space<vmem>>, %arg11: memref<4x32xbf16, #tpu.memory_space<vmem>>, %arg12: memref<1x32xf32, #tpu.memory_space<vmem>>, %arg13: memref<128x32xf32, #tpu.memory_space<vmem>>, %arg14: memref<2x128x1xf32, #tpu.memory_space<vmem>>, %arg15: memref<2x128x1xf32, #tpu.memory_space<vmem>>, %arg16: memref<2x128x16xf32, #tpu.memory_space<vmem>>) attributes {dimension_semantics = [#tpu.dimension_semantics<parallel>, #tpu.dimension_semantics<arbitrary>], iteration_bounds = array<i64: 1, 1>, scalar_prefetch = 0 : i64, scratch_operands = 3 : i64, tpu.core_type = #tpu.core_type<tc>, window_params = [{transform_indices = @transform_0, window_bounds = array<i64: 128, 8>}, {transform_indices = @transform_1, window_bounds = array<i64: 128, 8>}, {transform_indices = @transform_2, window_bounds = array<i64: 128, 128>}, {pipeline_mode = #tpu.pipeline_mode<synchronous>, transform_indices = @transform_3, window_bounds = array<i64: 128, 4>}, {transform_indices = @transform_4, window_bounds = array<i64: 128, 128>}, {pipeline_mode = #tpu.pipeline_mode<synchronous>, transform_indices = @transform_5, window_bounds = array<i64: 8, 32>}, {pipeline_mode = #tpu.pipeline_mode<synchronous>, transform_indices = @transform_6, window_bounds = array<i64: 2, 32>}, {pipeline_mode = #tpu.pipeline_mode<synchronous>, transform_indices = @transform_7, window_bounds = array<i64: 2, 32>}, {pipeline_mode = #tpu.pipeline_mode<synchronous>, transform_indices = @transform_8, window_bounds = array<i64: 1, 32>}, {pipeline_mode = #tpu.pipeline_mode<synchronous>, transform_indices = @transform_9, window_bounds = array<i64: 4, 32>}, {pipeline_mode = #tpu.pipeline_mode<synchronous>, transform_indices = @transform_10, window_bounds = array<i64: 1, 32>}, {transform_indices = @transform_11, window_bounds = array<i64: 128, 32>}]} {
    %c0_i32 = arith.constant 0 : i32
    %0 = arith.cmpi eq, %arg1, %c0_i32 : i32
    %1 = arith.extui %0 : i1 to i32
    %c0_i32_0 = arith.constant 0 : i32
    %2 = arith.cmpi ne, %1, %c0_i32_0 : i32
    scf.if %2 {
      %cst_63 = arith.constant -1.000000e+30 : f32
      %108 = vector.broadcast %cst_63 : f32 to vector<2x128x1xf32>
      %c0_64 = arith.constant 0 : index
      %c0_65 = arith.constant 0 : index
      %c0_66 = arith.constant 0 : index
      %109 = vector.load %arg14[%c0_64, %c0_65, %c0_66] : memref<2x128x1xf32, #tpu.memory_space<vmem>>, vector<2x128x1xf32>
      tpu.vector_store %arg14[%c0_64, %c0_65, %c0_66], %108 {strides = array<i32>} : memref<2x128x1xf32, #tpu.memory_space<vmem>>, vector<2x128x1xf32>,
      %cst_67 = arith.constant 0.000000e+00 : f32
      %110 = vector.broadcast %cst_67 : f32 to vector<2x128x1xf32>
      %c0_68 = arith.constant 0 : index
      %c0_69 = arith.constant 0 : index
      %c0_70 = arith.constant 0 : index
      %111 = vector.load %arg15[%c0_68, %c0_69, %c0_70] : memref<2x128x1xf32, #tpu.memory_space<vmem>>, vector<2x128x1xf32>
      tpu.vector_store %arg15[%c0_68, %c0_69, %c0_70], %110 {strides = array<i32>} : memref<2x128x1xf32, #tpu.memory_space<vmem>>, vector<2x128x1xf32>,
      %cst_71 = arith.constant 0.000000e+00 : f32
      %112 = vector.broadcast %cst_71 : f32 to vector<2x128x16xf32>
      %c0_72 = arith.constant 0 : index
      %c0_73 = arith.constant 0 : index
      %c0_74 = arith.constant 0 : index
      %113 = vector.load %arg16[%c0_72, %c0_73, %c0_74] : memref<2x128x16xf32, #tpu.memory_space<vmem>>, vector<2x128x16xf32>
      tpu.vector_store %arg16[%c0_72, %c0_73, %c0_74], %112 {strides = array<i32>} : memref<2x128x16xf32, #tpu.memory_space<vmem>>, vector<2x128x16xf32>,
    } else {
    }
    %c0 = arith.constant 0 : index
    %c0_1 = arith.constant 0 : index
    %3 = vector.load %arg7[%c0, %c0_1] : memref<8x32xf32, #tpu.memory_space<vmem>>, vector<8x32xf32>
    %c0_2 = arith.constant 0 : index
    %c0_3 = arith.constant 0 : index
    %4 = vector.load %arg2[%c0_2, %c0_3] : memref<128x8xf32, #tpu.memory_space<vmem>>, vector<128x8xf32>
    %cst = arith.constant dense<0.000000e+00> : vector<128x32xf32>
    %5 = tpu.matmul %4, %3, %cst {dimension_numbers = #tpu.dot_dimension_numbers<[1], [0], [0], [1], [0, 0, 1, 1], [], []>} : vector<128x8xf32>, vector<8x32xf32>, vector<128x32xf32> -> vector<128x32xf32>
    %c0_4 = arith.constant 0 : index
    %c0_5 = arith.constant 0 : index
    %6 = vector.load %arg3[%c0_4, %c0_5] : memref<128x8xf32, #tpu.memory_space<vmem>>, vector<128x8xf32>
    %cst_6 = arith.constant dense<0.000000e+00> : vector<128x32xf32>
    %7 = tpu.matmul %6, %3, %cst_6 {dimension_numbers = #tpu.dot_dimension_numbers<[1], [0], [0], [1], [0, 0, 1, 1], [], []>} : vector<128x8xf32>, vector<8x32xf32>, vector<128x32xf32> -> vector<128x32xf32>
    %8 = arith.truncf %7 : vector<128x32xf32> to vector<128x32xbf16>
    %c0_7 = arith.constant 0 : index
    %c0_8 = arith.constant 0 : index
    %9 = vector.load %arg9[%c0_7, %c0_8] : memref<2x32xf32, #tpu.memory_space<vmem>>, vector<2x32xf32>
    %cst_9 = arith.constant dense<0.000000e+00> : vector<128x2xf32>
    %10 = tpu.matmul %5, %9, %cst_9 {dimension_numbers = #tpu.dot_dimension_numbers<[1], [1], [0], [0], [0, 0, 1, 0], [], []>} : vector<128x32xf32>, vector<2x32xf32>, vector<128x2xf32> -> vector<128x2xf32>
    %c0_10 = arith.constant 0 : index
    %c0_11 = arith.constant 0 : index
    %11 = vector.load %arg8[%c0_10, %c0_11] : memref<2x32xf32, #tpu.memory_space<vmem>>, vector<2x32xf32>
    %cst_12 = arith.constant dense<0.000000e+00> : vector<2x128xf32>
    %12 = tpu.matmul %11, %7, %cst_12 {dimension_numbers = #tpu.dot_dimension_numbers<[1], [1], [0], [0], [0, 0, 1, 0], [], []>} : vector<2x32xf32>, vector<128x32xf32>, vector<2x128xf32> -> vector<2x128xf32>
    %c0_13 = arith.constant 0 : index
    %c0_14 = arith.constant 0 : index
    %13 = vector.load %arg4[%c0_13, %c0_14] : memref<128x128xbf16, #tpu.memory_space<vmem>>, vector<128x128xbf16>
    %14 = arith.extf %13 : vector<128x128xbf16> to vector<128x128xf32>
    %cst_15 = arith.constant 0.000000e+00 : f32
    %15 = vector.broadcast %cst_15 : f32 to vector<128x128xf32>
    %16 = arith.cmpf ogt, %14, %15 : vector<128x128xf32>
    %17 = vector.extract_strided_slice %10 {offsets = [0, 0], sizes = [128, 1], strides = [1, 1]} : vector<128x2xf32> to vector<128x1xf32>
    %18 = vector.extract_strided_slice %12 {offsets = [0, 0], sizes = [1, 128], strides = [1, 1]} : vector<2x128xf32> to vector<1x128xf32>
    %19 = vector.broadcast %17 : vector<128x1xf32> to vector<128x128xf32>
    %20 = vector.broadcast %18 : vector<1x128xf32> to vector<128x128xf32>
    %21 = arith.addf %19, %20 : vector<128x128xf32>
    %cst_16 = arith.constant 2.000000e-01 : f32
    %22 = vector.broadcast %cst_16 : f32 to vector<128x128xf32>
    %23 = arith.mulf %22, %21 : vector<128x128xf32>
    %24 = arith.maximumf %21, %23 : vector<128x128xf32>
    %cst_17 = arith.constant -1.000000e+30 : f32
    %25 = vector.broadcast %cst_17 : f32 to vector<128x128xf32>
    %26 = arith.select %16, %24, %25 : vector<128x128xi1>, vector<128x128xf32>
    %c0_18 = arith.constant 0 : index
    %c0_19 = arith.constant 0 : index
    %c0_20 = arith.constant 0 : index
    %27 = vector.load %arg14[%c0_18, %c0_19, %c0_20] : memref<2x128x1xf32, #tpu.memory_space<vmem>>, vector<1x128x1xf32>
    %28 = vector.shape_cast %27 : vector<1x128x1xf32> to vector<128x1xf32>
    %cst_21 = arith.constant dense<0xFF800000> : vector<128xf32>
    %29 = vector.multi_reduction <maximumf>, %26, %cst_21 [1] : vector<128x128xf32> to vector<128xf32>
    %30 = vector.shape_cast %29 : vector<128xf32> to vector<128x1xf32>
    %31 = arith.maximumf %28, %30 : vector<128x1xf32>
    %32 = arith.subf %28, %31 : vector<128x1xf32>
    %33 = math.exp %32 : vector<128x1xf32>
    %34 = vector.broadcast %31 : vector<128x1xf32> to vector<128x128xf32>
    %35 = arith.subf %26, %34 : vector<128x128xf32>
    %36 = math.exp %35 : vector<128x128xf32>
    %37 = arith.mulf %14, %36 : vector<128x128xf32>
    %c0_22 = arith.constant 0 : index
    %c0_23 = arith.constant 0 : index
    %c0_24 = arith.constant 0 : index
    %38 = vector.load %arg15[%c0_22, %c0_23, %c0_24] : memref<2x128x1xf32, #tpu.memory_space<vmem>>, vector<1x128x1xf32>
    %39 = vector.shape_cast %38 : vector<1x128x1xf32> to vector<128x1xf32>
    %40 = arith.mulf %33, %39 : vector<128x1xf32>
    %cst_25 = arith.constant dense<0.000000e+00> : vector<128xf32>
    %41 = vector.multi_reduction <add>, %37, %cst_25 [1] : vector<128x128xf32> to vector<128xf32>
    %42 = vector.shape_cast %41 : vector<128xf32> to vector<128x1xf32>
    %43 = arith.addf %40, %42 : vector<128x1xf32>
    %c0_26 = arith.constant 0 : index
    %c0_27 = arith.constant 0 : index
    %c0_28 = arith.constant 0 : index
    %44 = vector.load %arg15[%c0_26, %c0_27, %c0_28] : memref<2x128x1xf32, #tpu.memory_space<vmem>>, vector<1x128x1xf32>
    %45 = vector.shape_cast %44 : vector<1x128x1xf32> to vector<128x1xf32>
    %46 = vector.shape_cast %43 : vector<128x1xf32> to vector<1x128x1xf32>
    tpu.vector_store %arg15[%c0_26, %c0_27, %c0_28], %46 {strides = array<i32>} : memref<2x128x1xf32, #tpu.memory_space<vmem>>, vector<1x128x1xf32>,
    %c0_29 = arith.constant 0 : index
    %c0_30 = arith.constant 0 : index
    %c0_31 = arith.constant 0 : index
    %47 = vector.load %arg16[%c0_29, %c0_30, %c0_31] : memref<2x128x16xf32, #tpu.memory_space<vmem>>, vector<1x128x16xf32>
    %48 = vector.shape_cast %47 : vector<1x128x16xf32> to vector<128x16xf32>
    %49 = vector.broadcast %33 : vector<128x1xf32> to vector<128x16xf32>
    %50 = arith.mulf %49, %48 : vector<128x16xf32>
    %51 = arith.truncf %37 : vector<128x128xf32> to vector<128x128xbf16>
    %52 = vector.extract_strided_slice %8 {offsets = [0, 0], sizes = [128, 16], strides = [1, 1]} : vector<128x32xbf16> to vector<128x16xbf16>
    %cst_32 = arith.constant dense<0.000000e+00> : vector<128x16xf32>
    %53 = tpu.matmul %51, %52, %cst_32 {dimension_numbers = #tpu.dot_dimension_numbers<[1], [0], [0], [1], [0, 0, 1, 1], [], []>} : vector<128x128xbf16>, vector<128x16xbf16>, vector<128x16xf32> -> vector<128x16xf32>
    %54 = arith.addf %50, %53 : vector<128x16xf32>
    %c0_33 = arith.constant 0 : index
    %c0_34 = arith.constant 0 : index
    %c0_35 = arith.constant 0 : index
    %55 = vector.load %arg16[%c0_33, %c0_34, %c0_35] : memref<2x128x16xf32, #tpu.memory_space<vmem>>, vector<1x128x16xf32>
    %56 = vector.shape_cast %55 : vector<1x128x16xf32> to vector<128x16xf32>
    %57 = vector.shape_cast %54 : vector<128x16xf32> to vector<1x128x16xf32>
    tpu.vector_store %arg16[%c0_33, %c0_34, %c0_35], %57 {strides = array<i32>} : memref<2x128x16xf32, #tpu.memory_space<vmem>>, vector<1x128x16xf32>,
    %c0_36 = arith.constant 0 : index
    %c0_37 = arith.constant 0 : index
    %c0_38 = arith.constant 0 : index
    %58 = vector.load %arg14[%c0_36, %c0_37, %c0_38] : memref<2x128x1xf32, #tpu.memory_space<vmem>>, vector<1x128x1xf32>
    %59 = vector.shape_cast %58 : vector<1x128x1xf32> to vector<128x1xf32>
    %60 = vector.shape_cast %31 : vector<128x1xf32> to vector<1x128x1xf32>
    tpu.vector_store %arg14[%c0_36, %c0_37, %c0_38], %60 {strides = array<i32>} : memref<2x128x1xf32, #tpu.memory_space<vmem>>, vector<1x128x1xf32>,
    %61 = vector.extract_strided_slice %10 {offsets = [0, 1], sizes = [128, 1], strides = [1, 1]} : vector<128x2xf32> to vector<128x1xf32>
    %62 = vector.extract_strided_slice %12 {offsets = [1, 0], sizes = [1, 128], strides = [1, 1]} : vector<2x128xf32> to vector<1x128xf32>
    %63 = vector.broadcast %61 : vector<128x1xf32> to vector<128x128xf32>
    %64 = vector.broadcast %62 : vector<1x128xf32> to vector<128x128xf32>
    %65 = arith.addf %63, %64 : vector<128x128xf32>
    %cst_39 = arith.constant 2.000000e-01 : f32
    %66 = vector.broadcast %cst_39 : f32 to vector<128x128xf32>
    %67 = arith.mulf %66, %65 : vector<128x128xf32>
    %68 = arith.maximumf %65, %67 : vector<128x128xf32>
    %cst_40 = arith.constant -1.000000e+30 : f32
    %69 = vector.broadcast %cst_40 : f32 to vector<128x128xf32>
    %70 = arith.select %16, %68, %69 : vector<128x128xi1>, vector<128x128xf32>
    %c1 = arith.constant 1 : index
    %c0_41 = arith.constant 0 : index
    %c0_42 = arith.constant 0 : index
    %71 = vector.load %arg14[%c1, %c0_41, %c0_42] : memref<2x128x1xf32, #tpu.memory_space<vmem>>, vector<1x128x1xf32>
    %72 = vector.shape_cast %71 : vector<1x128x1xf32> to vector<128x1xf32>
    %cst_43 = arith.constant dense<0xFF800000> : vector<128xf32>
    %73 = vector.multi_reduction <maximumf>, %70, %cst_43 [1] : vector<128x128xf32> to vector<128xf32>
    %74 = vector.shape_cast %73 : vector<128xf32> to vector<128x1xf32>
    %75 = arith.maximumf %72, %74 : vector<128x1xf32>
    %76 = arith.subf %72, %75 : vector<128x1xf32>
    %77 = math.exp %76 : vector<128x1xf32>
    %78 = vector.broadcast %75 : vector<128x1xf32> to vector<128x128xf32>
    %79 = arith.subf %70, %78 : vector<128x128xf32>
    %80 = math.exp %79 : vector<128x128xf32>
    %81 = arith.mulf %14, %80 : vector<128x128xf32>
    %c1_44 = arith.constant 1 : index
    %c0_45 = arith.constant 0 : index
    %c0_46 = arith.constant 0 : index
    %82 = vector.load %arg15[%c1_44, %c0_45, %c0_46] : memref<2x128x1xf32, #tpu.memory_space<vmem>>, vector<1x128x1xf32>
    %83 = vector.shape_cast %82 : vector<1x128x1xf32> to vector<128x1xf32>
    %84 = arith.mulf %77, %83 : vector<128x1xf32>
    %cst_47 = arith.constant dense<0.000000e+00> : vector<128xf32>
    %85 = vector.multi_reduction <add>, %81, %cst_47 [1] : vector<128x128xf32> to vector<128xf32>
    %86 = vector.shape_cast %85 : vector<128xf32> to vector<128x1xf32>
    %87 = arith.addf %84, %86 : vector<128x1xf32>
    %c1_48 = arith.constant 1 : index
    %c0_49 = arith.constant 0 : index
    %c0_50 = arith.constant 0 : index
    %88 = vector.load %arg15[%c1_48, %c0_49, %c0_50] : memref<2x128x1xf32, #tpu.memory_space<vmem>>, vector<1x128x1xf32>
    %89 = vector.shape_cast %88 : vector<1x128x1xf32> to vector<128x1xf32>
    %90 = vector.shape_cast %87 : vector<128x1xf32> to vector<1x128x1xf32>
    tpu.vector_store %arg15[%c1_48, %c0_49, %c0_50], %90 {strides = array<i32>} : memref<2x128x1xf32, #tpu.memory_space<vmem>>, vector<1x128x1xf32>,
    %c1_51 = arith.constant 1 : index
    %c0_52 = arith.constant 0 : index
    %c0_53 = arith.constant 0 : index
    %91 = vector.load %arg16[%c1_51, %c0_52, %c0_53] : memref<2x128x16xf32, #tpu.memory_space<vmem>>, vector<1x128x16xf32>
    %92 = vector.shape_cast %91 : vector<1x128x16xf32> to vector<128x16xf32>
    %93 = vector.broadcast %77 : vector<128x1xf32> to vector<128x16xf32>
    %94 = arith.mulf %93, %92 : vector<128x16xf32>
    %95 = arith.truncf %81 : vector<128x128xf32> to vector<128x128xbf16>
    %96 = vector.extract_strided_slice %8 {offsets = [0, 16], sizes = [128, 16], strides = [1, 1]} : vector<128x32xbf16> to vector<128x16xbf16>
    %cst_54 = arith.constant dense<0.000000e+00> : vector<128x16xf32>
    %97 = tpu.matmul %95, %96, %cst_54 {dimension_numbers = #tpu.dot_dimension_numbers<[1], [0], [0], [1], [0, 0, 1, 1], [], []>} : vector<128x128xbf16>, vector<128x16xbf16>, vector<128x16xf32> -> vector<128x16xf32>
    %98 = arith.addf %94, %97 : vector<128x16xf32>
    %c1_55 = arith.constant 1 : index
    %c0_56 = arith.constant 0 : index
    %c0_57 = arith.constant 0 : index
    %99 = vector.load %arg16[%c1_55, %c0_56, %c0_57] : memref<2x128x16xf32, #tpu.memory_space<vmem>>, vector<1x128x16xf32>
    %100 = vector.shape_cast %99 : vector<1x128x16xf32> to vector<128x16xf32>
    %101 = vector.shape_cast %98 : vector<128x16xf32> to vector<1x128x16xf32>
    tpu.vector_store %arg16[%c1_55, %c0_56, %c0_57], %101 {strides = array<i32>} : memref<2x128x16xf32, #tpu.memory_space<vmem>>, vector<1x128x16xf32>,
    %c1_58 = arith.constant 1 : index
    %c0_59 = arith.constant 0 : index
    %c0_60 = arith.constant 0 : index
    %102 = vector.load %arg14[%c1_58, %c0_59, %c0_60] : memref<2x128x1xf32, #tpu.memory_space<vmem>>, vector<1x128x1xf32>
    %103 = vector.shape_cast %102 : vector<1x128x1xf32> to vector<128x1xf32>
    %104 = vector.shape_cast %75 : vector<128x1xf32> to vector<1x128x1xf32>
    tpu.vector_store %arg14[%c1_58, %c0_59, %c0_60], %104 {strides = array<i32>} : memref<2x128x1xf32, #tpu.memory_space<vmem>>, vector<1x128x1xf32>,
    %c0_i32_61 = arith.constant 0 : i32
    %105 = arith.cmpi eq, %arg1, %c0_i32_61 : i32
    %106 = arith.extui %105 : i1 to i32
    %c0_i32_62 = arith.constant 0 : i32
    %107 = arith.cmpi ne, %106, %c0_i32_62 : i32
    scf.if %107 {
      %c0_63 = arith.constant 0 : index
      %c0_64 = arith.constant 0 : index
      %108 = vector.load %arg5[%c0_63, %c0_64] : memref<128x4xbf16, #tpu.memory_space<vmem>>, vector<128x4xbf16>
      %c0_65 = arith.constant 0 : index
      %c0_66 = arith.constant 0 : index
      %109 = vector.load %arg11[%c0_65, %c0_66] : memref<4x32xbf16, #tpu.memory_space<vmem>>, vector<4x32xbf16>
      %cst_67 = arith.constant dense<0.000000e+00> : vector<128x32xf32>
      %110 = tpu.matmul %108, %109, %cst_67 {dimension_numbers = #tpu.dot_dimension_numbers<[1], [0], [0], [1], [0, 0, 1, 1], [], []>} : vector<128x4xbf16>, vector<4x32xbf16>, vector<128x32xf32> -> vector<128x32xf32>
      %c0_68 = arith.constant 0 : index
      %c0_69 = arith.constant 0 : index
      %111 = vector.load %arg12[%c0_68, %c0_69] : memref<1x32xf32, #tpu.memory_space<vmem>>, vector<1x32xf32>
      %112 = vector.broadcast %111 : vector<1x32xf32> to vector<128x32xf32>
      %113 = arith.addf %110, %112 : vector<128x32xf32>
      %c0_70 = arith.constant 0 : index
      %c0_71 = arith.constant 0 : index
      %114 = vector.load %arg6[%c0_70, %c0_71] : memref<128x128xbf16, #tpu.memory_space<vmem>>, vector<128x128xbf16>
      %115 = arith.truncf %113 : vector<128x32xf32> to vector<128x32xbf16>
      %cst_72 = arith.constant dense<0.000000e+00> : vector<128x32xf32>
      %116 = tpu.matmul %114, %115, %cst_72 {dimension_numbers = #tpu.dot_dimension_numbers<[1], [0], [0], [1], [0, 0, 1, 1], [], []>} : vector<128x128xbf16>, vector<128x32xbf16>, vector<128x32xf32> -> vector<128x32xf32>
      %c0_73 = arith.constant 0 : index
      %c0_74 = arith.constant 0 : index
      %c0_75 = arith.constant 0 : index
      %117 = vector.load %arg15[%c0_73, %c0_74, %c0_75] : memref<2x128x1xf32, #tpu.memory_space<vmem>>, vector<1x128x1xf32>
      %118 = vector.shape_cast %117 : vector<1x128x1xf32> to vector<128x1xf32>
      %119 = tpu.reciprocal %118 {approx = true} : vector<128x1xf32> -> vector<128x1xf32>
      %c0_76 = arith.constant 0 : index
      %c0_77 = arith.constant 0 : index
      %c0_78 = arith.constant 0 : index
      %120 = vector.load %arg16[%c0_76, %c0_77, %c0_78] : memref<2x128x16xf32, #tpu.memory_space<vmem>>, vector<1x128x16xf32>
      %121 = vector.shape_cast %120 : vector<1x128x16xf32> to vector<128x16xf32>
      %122 = vector.broadcast %119 : vector<128x1xf32> to vector<128x16xf32>
      %123 = arith.mulf %121, %122 : vector<128x16xf32>
      %c0_79 = arith.constant 0 : index
      %c0_80 = arith.constant 0 : index
      %124 = vector.load %arg10[%c0_79, %c0_80] : memref<1x32xf32, #tpu.memory_space<vmem>>, vector<1x16xf32>
      %125 = vector.broadcast %124 : vector<1x16xf32> to vector<128x16xf32>
      %126 = arith.addf %123, %125 : vector<128x16xf32>
      %127 = vector.extract_strided_slice %116 {offsets = [0, 0], sizes = [128, 16], strides = [1, 1]} : vector<128x32xf32> to vector<128x16xf32>
      %128 = arith.addf %126, %127 : vector<128x16xf32>
      %c0_81 = arith.constant 0 : index
      %c0_82 = arith.constant 0 : index
      %129 = vector.load %arg13[%c0_81, %c0_82] : memref<128x32xf32, #tpu.memory_space<vmem>>, vector<128x16xf32>
      tpu.vector_store %arg13[%c0_81, %c0_82], %128 {strides = array<i32>} : memref<128x32xf32, #tpu.memory_space<vmem>>, vector<128x16xf32>,
      %c1_83 = arith.constant 1 : index
      %c0_84 = arith.constant 0 : index
      %c0_85 = arith.constant 0 : index
      %130 = vector.load %arg15[%c1_83, %c0_84, %c0_85] : memref<2x128x1xf32, #tpu.memory_space<vmem>>, vector<1x128x1xf32>
      %131 = vector.shape_cast %130 : vector<1x128x1xf32> to vector<128x1xf32>
      %132 = tpu.reciprocal %131 {approx = true} : vector<128x1xf32> -> vector<128x1xf32>
      %c1_86 = arith.constant 1 : index
      %c0_87 = arith.constant 0 : index
      %c0_88 = arith.constant 0 : index
      %133 = vector.load %arg16[%c1_86, %c0_87, %c0_88] : memref<2x128x16xf32, #tpu.memory_space<vmem>>, vector<1x128x16xf32>
      %134 = vector.shape_cast %133 : vector<1x128x16xf32> to vector<128x16xf32>
      %135 = vector.broadcast %132 : vector<128x1xf32> to vector<128x16xf32>
      %136 = arith.mulf %134, %135 : vector<128x16xf32>
      %c0_89 = arith.constant 0 : index
      %c16 = arith.constant 16 : index
      %137 = vector.load %arg10[%c0_89, %c16] : memref<1x32xf32, #tpu.memory_space<vmem>>, vector<1x16xf32>
      %138 = vector.broadcast %137 : vector<1x16xf32> to vector<128x16xf32>
      %139 = arith.addf %136, %138 : vector<128x16xf32>
      %140 = vector.extract_strided_slice %116 {offsets = [0, 16], sizes = [128, 16], strides = [1, 1]} : vector<128x32xf32> to vector<128x16xf32>
      %141 = arith.addf %139, %140 : vector<128x16xf32>
      %c0_90 = arith.constant 0 : index
      %c16_91 = arith.constant 16 : index
      %142 = vector.load %arg13[%c0_90, %c16_91] : memref<128x32xf32, #tpu.memory_space<vmem>>, vector<128x16xf32>
      tpu.vector_store %arg13[%c0_90, %c16_91], %141 {strides = array<i32>} : memref<128x32xf32, #tpu.memory_space<vmem>>, vector<128x16xf32>,
    } else {
    }
    return
  }
  func.func @transform_0(%arg0: i32, %arg1: i32) -> (i32, i32) {
    %c0_i32 = arith.constant 0 : i32
    %c0_i32_0 = arith.constant 0 : i32
    return %arg0, %c0_i32 : i32, i32
  }
  func.func @transform_1(%arg0: i32, %arg1: i32) -> (i32, i32) {
    %c0_i32 = arith.constant 0 : i32
    %c0_i32_0 = arith.constant 0 : i32
    return %arg1, %c0_i32 : i32, i32
  }
  func.func @transform_2(%arg0: i32, %arg1: i32) -> (i32, i32) {
    %c0_i32 = arith.constant 0 : i32
    return %arg0, %arg1 : i32, i32
  }
  func.func @transform_3(%arg0: i32, %arg1: i32) -> (i32, i32) {
    %c0_i32 = arith.constant 0 : i32
    %c0_i32_0 = arith.constant 0 : i32
    %c0_i32_1 = arith.constant 0 : i32
    return %c0_i32, %c0_i32_0 : i32, i32
  }
  func.func @transform_4(%arg0: i32, %arg1: i32) -> (i32, i32) {
    %c0_i32 = arith.constant 0 : i32
    %c0_i32_0 = arith.constant 0 : i32
    return %arg0, %c0_i32 : i32, i32
  }
  func.func @transform_5(%arg0: i32, %arg1: i32) -> (i32, i32) {
    %c0_i32 = arith.constant 0 : i32
    %c0_i32_0 = arith.constant 0 : i32
    %c0_i32_1 = arith.constant 0 : i32
    return %c0_i32, %c0_i32_0 : i32, i32
  }
  func.func @transform_6(%arg0: i32, %arg1: i32) -> (i32, i32) {
    %c0_i32 = arith.constant 0 : i32
    %c0_i32_0 = arith.constant 0 : i32
    %c0_i32_1 = arith.constant 0 : i32
    return %c0_i32, %c0_i32_0 : i32, i32
  }
  func.func @transform_7(%arg0: i32, %arg1: i32) -> (i32, i32) {
    %c0_i32 = arith.constant 0 : i32
    %c0_i32_0 = arith.constant 0 : i32
    %c0_i32_1 = arith.constant 0 : i32
    return %c0_i32, %c0_i32_0 : i32, i32
  }
  func.func @transform_8(%arg0: i32, %arg1: i32) -> (i32, i32) {
    %c0_i32 = arith.constant 0 : i32
    %c0_i32_0 = arith.constant 0 : i32
    %c0_i32_1 = arith.constant 0 : i32
    return %c0_i32, %c0_i32_0 : i32, i32
  }
  func.func @transform_9(%arg0: i32, %arg1: i32) -> (i32, i32) {
    %c0_i32 = arith.constant 0 : i32
    %c0_i32_0 = arith.constant 0 : i32
    %c0_i32_1 = arith.constant 0 : i32
    return %c0_i32, %c0_i32_0 : i32, i32
  }
  func.func @transform_10(%arg0: i32, %arg1: i32) -> (i32, i32) {
    %c0_i32 = arith.constant 0 : i32
    %c0_i32_0 = arith.constant 0 : i32
    %c0_i32_1 = arith.constant 0 : i32
    return %c0_i32, %c0_i32_0 : i32, i32
  }
  func.func @transform_11(%arg0: i32, %arg1: i32) -> (i32, i32) {
    %c0_i32 = arith.constant 0 : i32
    %c0_i32_0 = arith.constant 0 : i32
    return %arg0, %c0_i32 : i32, i32
  }
}

</mosaic_0001>

<bundles_post_ra>
// kernel: tpu_custom_call.1
= control target key start
LH: loop header
LB: loop body
LE: loop exit
PB: predicated region body
PF: predicated region fallthrough
CT: control target
= control target key end

     0   :  { %vm158_vm0 = vcmask 64512   ;;  %vm570_vm1 = vcmask 261120   ;;  %v4150_v34 = vmov 0.0|0.0   ;;  %vm4151_vm2 = vmmov 0   ;;  %s4157_s27 = smov 16   ;;  %s6103_s5 = inlined_call_operand.vmem [shape: f32[8,32], index: 5, kind: input, shape index: {}]   ;;  %s6104_s0 = inlined_call_operand.vmem [shape: f32[128,8], index: 0, kind: input, shape index: {}]   ;;  %s6105_s1 = inlined_call_operand.vmem [shape: f32[128,8], index: 1, kind: input, shape index: {}]   ;;  %s6106_s7 = inlined_call_operand.vmem [shape: f32[2,32], index: 7, kind: input, shape index: {}]   ;;  %s6107_s3 = inlined_call_operand.vmem [shape: bf16[128,4], index: 3, kind: input, shape index: {}]   ;;  %s6108_s9 = inlined_call_operand.vmem [shape: bf16[4,32], index: 9, kind: input, shape index: {}]   ;;  %s6109_s6 = inlined_call_operand.vmem [shape: f32[2,32], index: 6, kind: input, shape index: {}]   ;;  %s6110_s10 = inlined_call_operand.vmem [shape: f32[1,32], index: 10, kind: input, shape index: {}]   ;;  %s6111_s4 = inlined_call_operand.vmem [shape: bf16[128,128], index: 4, kind: input, shape index: {}]   ;;  %s6112_s2 = inlined_call_operand.vmem [shape: bf16[128,128], index: 2, kind: input, shape index: {}]   ;;  %s6113_s8 = inlined_call_operand.vmem [shape: f32[1,32], index: 8, kind: input, shape index: {}]   ;;  %s6114_s11 = inlined_call_operand.vmem [shape: f32[128,32], index: 11, kind: output, shape index: {}]  }
   0x1   :  { %v141_v0 = vld [vmem:[%s6103_s5] sm:$0xff]  ;;  %v143_v2 = vld [vmem:[%s6104_s0 + $0x8] sm:$0xff]  ;;  %v144_v3 = vld [vmem:[%s6104_s0 + $0x10] sm:$0xff]  ;;  %v6115_v35 = vmov 0.0   ;;  %v4153_v40 = vmov 0   ;;  %vm2580_vm4 = vcmask 1041408  }
   0x2   :  { %v142_v1 = vld [vmem:[%s6104_s0] sm:$0xff]  ;;  %3640 = vmatprep.subr.mxu0 %v141_v0  ;;  %3666 = vmatprep.subr.mxu1 %v141_v0  ;;  %v145_v4 = vld [vmem:[%s6104_s0 + $0x18] sm:$0xff]  ;;  %v353_v7 = vld [vmem:[%s6105_s1 + $0x8] sm:$0xff]  ;;  %vm2555_vm5 = vcmask 31744   ;;  %vm43_vm6 = vcmask 7168  }
   0x3   :  { %3642 = vmatprep.mubr.msk.f32.mxu0 %vm158_vm0, %v142_v1  ;;  %3641 = vmatpush3.msra.mxu0 %v141_v0  ;;  %v146_v5 = vld [vmem:[%s6104_s0 + $0x20] sm:$0xff]  ;;  %v354_v8 = vld [vmem:[%s6105_s1 + $0x10] sm:$0xff]  ;;  %v147_v9 = vld [vmem:[%s6104_s0 + $0x28] sm:$0xff]  ;;  %76 = vst.msk [vmem:[#allocation3] sm:$0xff] %vm43_vm6, %v6115_v35 }
   0x4   :  { %3643 = vmatmul.mubr.msk.f32.vlgmr.msra.gmra.mrb[0].mxu0 %vm158_vm0, %v143_v2  ;;  %3667 = vmatpush3.msra.mxu1 %v141_v0  ;;  %v352_v6 = vld [vmem:[%s6105_s1] sm:$0xff]  ;;  %v355_v10 = vld [vmem:[%s6105_s1 + $0x18] sm:$0xff]  ;;  %v148_v11 = vld [vmem:[%s6104_s0 + $0x30] sm:$0xff]  ;;  %77 = vst.msk [vmem:[#allocation3 + $0x8] sm:$0xff] %vm43_vm6, %v6115_v35 }
   0x5   :  { %3645 = vmatprep.mubr.msk.f32.mxu0 %vm158_vm0, %v144_v3  ;;  %3668 = vmatprep.mubr.msk.f32.mxu1 %vm158_vm0, %v352_v6  ;;  %v356_v12 = vld [vmem:[%s6105_s1 + $0x20] sm:$0xff]  ;;  %v149_v14 = vld [vmem:[%s6104_s0 + $0x38] sm:$0xff]  ;;  %v357_v15 = vld [vmem:[%s6105_s1 + $0x28] sm:$0xff]  ;;  %78 = vst.msk [vmem:[#allocation3 + $0x10] sm:$0xff] %vm43_vm6, %v6115_v35 }
   0x6   :  { %3669 = vmatmul.mubr.msk.f32.vlgmr.msra.gmra.mrb[0].mxu1 %vm158_vm0, %v353_v7  ;;  %v569_v13 = vld [vmem:[%s6106_s7] sm:$0x3]  ;;  %v358_v17 = vld [vmem:[%s6105_s1 + $0x30] sm:$0xff]  ;;  %v151_v18 = vld [vmem:[%s6104_s0 + $0x48] sm:$0xff]  ;;  %3867 = vmatprep.subr.bf16.mxu1 %v4150_v34  ;;  %79 = vst.msk [vmem:[#allocation3 + $0x18] sm:$0xff] %vm43_vm6, %v6115_v35 }
   0x7   :  { %3671 = vmatprep.mubr.msk.f32.mxu1 %vm158_vm0, %v354_v8  ;;  %v150_v16 = vld [vmem:[%s6104_s0 + $0x40] sm:$0xff]  ;;  %3692 = vmatprep.subr.msk.mxu0 %vm570_vm1, %v569_v13  ;;  %v359_v19 = vld [vmem:[%s6105_s1 + $0x38] sm:$0xff]  ;;  %v152_v20 = vld [vmem:[%s6104_s0 + $0x50] sm:$0xff]  ;;  %80 = vst.msk [vmem:[#allocation3 + $0x20] sm:$0xff] %vm43_vm6, %v6115_v35 }
   0x8   :  { %3646 = vmatmul.mubr.msk.f32.gmra.mrb[2].mxu0 %vm158_vm0, %v145_v4  ;;  %v360_v21 = vld [vmem:[%s6105_s1 + $0x40] sm:$0xff]  ;;  %v153_v22 = vld [vmem:[%s6104_s0 + $0x58] sm:$0xff]  ;;  %v361_v23 = vld [vmem:[%s6105_s1 + $0x48] sm:$0xff]  ;;  %3908 = vset.pattern.permute.xlu0 %v4153_v40  ;;  %81 = vst.msk [vmem:[#allocation3 + $0x28] sm:$0xff] %vm43_vm6, %v6115_v35 }
   0x9   :  { %3648 = vmatprep.mubr.msk.f32.mxu0 %vm158_vm0, %v146_v5  ;;  %v154_v24 = vld [vmem:[%s6104_s0 + $0x60] sm:$0xff]  ;;  %v362_v25 = vld [vmem:[%s6105_s1 + $0x50] sm:$0xff]  ;;  %v155_v26 = vld [vmem:[%s6104_s0 + $0x68] sm:$0xff]  ;;  %82 = vst.msk [vmem:[#allocation3 + $0x30] sm:$0xff] %vm43_vm6, %v6115_v35 }
   0xa   :  { %3672 = vmatmul.mubr.msk.f32.gmra.mrb[2].mxu1 %vm158_vm0, %v355_v10  ;;  %3693 = vmatpush3.xpose.msk.msra.mxu0 %vm570_vm1, %v569_v13  ;;  %v363_v27 = vld [vmem:[%s6105_s1 + $0x58] sm:$0xff]  ;;  %v156_v28 = vld [vmem:[%s6104_s0 + $0x70] sm:$0xff]  ;;  %v364_v29 = vld [vmem:[%s6105_s1 + $0x60] sm:$0xff]  ;;  %83 = vst.msk [vmem:[#allocation3 + $0x38] sm:$0xff] %vm43_vm6, %v6115_v35 }
   0xb   :  { %3674 = vmatprep.mubr.msk.f32.mxu1 %vm158_vm0, %v356_v12  ;;  %v157_v30 = vld [vmem:[%s6104_s0 + $0x78] sm:$0xff]  ;;  %v365_v31 = vld [vmem:[%s6105_s1 + $0x68] sm:$0xff]  ;;  %v366_v32 = vld [vmem:[%s6105_s1 + $0x70] sm:$0xff]  ;;  %s4154_s0 = smov 112   ;;  %84 = vst.msk [vmem:[#allocation3 + $0x40] sm:$0xff] %vm43_vm6, %v6115_v35 }
   0xc   :  { %3649 = vmatmul.mubr.msk.f32.gmra.mrb[4].mxu0 %vm158_vm0, %v147_v9  ;;  %v367_v33 = vld [vmem:[%s6105_s1 + $0x78] sm:$0xff]  ;;  %vm4361_vm3 = vmpackc.low %vm570_vm1, %vm570_vm1  ;;  %85 = vst.msk [vmem:[#allocation3 + $0x48] sm:$0xff] %vm43_vm6, %v6115_v35 }
   0xd   :  { %3651 = vmatprep.mubr.msk.f32.mxu0 %vm158_vm0, %v148_v11  ;;  %86 = vst.msk [vmem:[#allocation3 + $0x50] sm:$0xff] %vm43_vm6, %v6115_v35  ;;  %87 = vst.msk [vmem:[#allocation3 + $0x58] sm:$0xff] %vm43_vm6, %v6115_v35 }
   0xe   :  { %3675 = vmatmul.mubr.msk.f32.gmra.mrb[4].mxu1 %vm158_vm0, %v357_v15  ;;  %v767_v15 = vld [vmem:[%s6109_s6] sm:$0x3]  ;;  %88 = vst.msk [vmem:[#allocation3 + $0x60] sm:$0xff] %vm43_vm6, %v6115_v35  ;;  %89 = vst.msk [vmem:[#allocation3 + $0x68] sm:$0xff] %vm43_vm6, %v6115_v35 }
   0xf   :  { %3677 = vmatprep.mubr.msk.f32.mxu1 %vm158_vm0, %v358_v17  ;;  %90 = vst.msk [vmem:[#allocation3 + $0x70] sm:$0xff] %vm43_vm6, %v6115_v35  ;;  %91 = vst.msk [vmem:[#allocation3 + $0x78] sm:$0xff] %vm43_vm6, %v6115_v35 }
  0x10   :  { %3652 = vmatmul.mubr.msk.f32.gmra.mrb[6].mxu0 %vm158_vm0, %v149_v14  ;;  %v2507_v14 = vld [vmem:[%s6108_s9] sm:$0x3]  ;;  %92 = vst.msk [vmem:[#allocation3 + $0x80] sm:$0xff] %vm43_vm6, %v6115_v35  ;;  %93 = vst.msk [vmem:[#allocation3 + $0x88] sm:$0xff] %vm43_vm6, %v6115_v35 }
  0x11   :  { %3654 = vmatprep.mubr.msk.f32.mxu0 %vm158_vm0, %v150_v16  ;;  %v3941_v16 = vld [vmem:[%s6107_s3] sm:$0xff]   ;;  %v2582_v17 = vsel %vm2580_vm4, %v2507_v14, 0  ;;  %94 = vst.msk [vmem:[#allocation3 + $0x90] sm:$0xff] %vm43_vm6, %v6115_v35  ;;  %95 = vst.msk [vmem:[#allocation3 + $0x98] sm:$0xff] %vm43_vm6, %v6115_v35 }
  0x12   :  { %3678 = vmatmul.mubr.msk.f32.gmra.mrb[6].mxu1 %vm158_vm0, %v359_v19  ;;  %v3943_v19 = vld [vmem:[%s6107_s3 + $0x10] sm:$0xff]   ;;  %96 = vst.msk [vmem:[#allocation3 + $0xa0] sm:$0xff] %vm43_vm6, %v6115_v35  ;;  %97 = vst.msk [vmem:[#allocation3 + $0xa8] sm:$0xff] %vm43_vm6, %v6115_v35 }
  0x13   :  { %3680 = vmatprep.mubr.msk.f32.mxu1 %vm158_vm0, %v360_v21  ;;  %v3945_v21 = vld [vmem:[%s6107_s3 + $0x20] sm:$0xff]   ;;  %98 = vst.msk [vmem:[#allocation3 + $0xb0] sm:$0xff] %vm43_vm6, %v6115_v35  ;;  %99 = vst.msk [vmem:[#allocation3 + $0xb8] sm:$0xff] %vm43_vm6, %v6115_v35 }
  0x14   :  { %3655 = vmatmul.mubr.msk.f32.gmra.mrb[8].mxu0 %vm158_vm0, %v151_v18  ;;  %v3942_v18 = vld [vmem:[%s6107_s3 + $0x8] sm:$0xff]   ;;  %100 = vst.msk [vmem:[#allocation3 + $0xc0] sm:$0xff] %vm43_vm6, %v6115_v35  ;;  %101 = vst.msk [vmem:[#allocation3 + $0xc8] sm:$0xff] %vm43_vm6, %v6115_v35 }
  0x15   :  { %3657 = vmatprep.mubr.msk.f32.mxu0 %vm158_vm0, %v152_v20  ;;  %v3944_v20 = vld [vmem:[%s6107_s3 + $0x18] sm:$0xff]   ;;  %102 = vst.msk [vmem:[#allocation3 + $0xd0] sm:$0xff] %vm43_vm6, %v6115_v35  ;;  %103 = vst.msk [vmem:[#allocation3 + $0xd8] sm:$0xff] %vm43_vm6, %v6115_v35 }
  0x16   :  { %3681 = vmatmul.mubr.msk.f32.gmra.mrb[8].mxu1 %vm158_vm0, %v361_v23  ;;  %v4155_v23 = vmov 1   ;;  %104 = vst.msk [vmem:[#allocation3 + $0xe0] sm:$0xff] %vm43_vm6, %v6115_v35  ;;  %105 = vst.msk [vmem:[#allocation3 + $0xe8] sm:$0xff] %vm43_vm6, %v6115_v35 }
  0x17   :  { %3683 = vmatprep.mubr.msk.f32.mxu1 %vm158_vm0, %v362_v25  ;;  %3911 = vset.pattern.permute.xlu1 %v4155_v23  ;;  %v3948_v25 = vld [vmem:[%s6107_s3 + $0x38] sm:$0xff]   ;;  %106 = vst.msk [vmem:[#allocation3 + $0xf0] sm:$0xff] %vm43_vm6, %v6115_v35  ;;  %107 = vst.msk [vmem:[#allocation3 + $0xf8] sm:$0xff] %vm43_vm6, %v6115_v35 }
  0x18   :  { %3658 = vmatmul.mubr.msk.f32.gmra.mrb[10].mxu0 %vm158_vm0, %v153_v22  ;;  %v3946_v22 = vld [vmem:[%s6107_s3 + $0x28] sm:$0xff]  }
  0x19   :  { %3660 = vmatprep.mubr.msk.f32.mxu0 %vm158_vm0, %v154_v24  ;;  %v3947_v24 = vld [vmem:[%s6107_s3 + $0x30] sm:$0xff]  }
  0x1a   :  { %3684 = vmatmul.mubr.msk.f32.gmra.mrb[10].mxu1 %vm158_vm0, %v363_v27 }
  0x1b   :  { %3686 = vmatprep.mubr.msk.f32.mxu1 %vm158_vm0, %v364_v29 }
  0x1c   :  { %3661 = vmatmul.mubr.msk.f32.gmra.mrb[12].mxu0 %vm158_vm0, %v155_v26 }
  0x1d   :  { %3663 = vmatprep.mubr.msk.f32.mxu0 %vm158_vm0, %v156_v28 }
  0x1e   :  { %3687 = vmatmul.mubr.msk.f32.gmra.mrb[12].mxu1 %vm158_vm0, %v365_v31 }
  0x1f   :  { %3689 = vmatprep.mubr.msk.f32.mxu1 %vm158_vm0, %v366_v32 }
  0x20   :  { %3664 = vmatmul.mubr.msk.f32.gmra.mrb[14].mxu0 %vm158_vm0, %v157_v30 }
  0x22   :  { %3690 = vmatmul.mubr.msk.f32.gmra.mrb[14].mxu1 %vm158_vm0, %v367_v33 }
  0x23   :  { %3750 = vmatprep.mubr.msk.f32.mxu1 %vm4151_vm2, %v6115_v35 }
  0xd7   :  { %v3644_v36 = vpop.f32.mrb[0].mxu0 }
  0xd8   :  { %v273_v37 = vpop.f32.mrb[1].mxu0 }
  0xd9   :  { %3694 = vmatprep.mubr.msk.f32.mxu0 %vm570_vm1, %v273_v37  ;;  %v3670_v39 = vpop.f32.mrb[0].mxu1 }
  0xda   :  { %3695 = vmatmul.mubr.msk.f32.vlgmr.msra.gmra.mrb[16].mxu0 %vm570_vm1, %v3644_v36  ;;  %v482_v42 = vpop.f32.mrb[1].mxu1 }
  0xdb   :  { %v3647_v38 = vpop.f32.mrb[2].mxu0  ;;  %v561_v44 = vpack.c.bf16 %v3670_v39, %v482_v42 }
  0xdc   :  { %v283_v41 = vpop.f32.mrb[3].mxu0 }
  0xdd   :  { %3697 = vmatprep.mubr.msk.f32.mxu0 %vm570_vm1, %v283_v41  ;;  %3870 = vmatpush3.bf16.xpose.msk.msra.mxu1 %vm4361_vm3, %v561_v44  ;;  %v3673_v46 = vpop.f32.mrb[2].mxu1 }
  0xde   :  { %3698 = vmatmul.mubr.msk.f32.gmra.mrb[18].mxu0 %vm570_vm1, %v3647_v38  ;;  %3753 = vmatprep.subr.bf16.mxu0 %v561_v44  ;;  %v492_v48 = vpop.f32.mrb[3].mxu1 }
  0xdf   :  { %v3650_v45 = vpop.f32.mrb[4].mxu0  ;;  %3871 = vmatprep.subr.bf16.mxu1 %v4150_v34  ;;  %2319 = vrot.lane.b32.xlu1 %v561_v44, %s4154_s0  ;;  %v562_v49 = vpack.c.bf16 %v3673_v46, %v492_v48 }
  0xe0   :  { %v293_v47 = vpop.f32.mrb[5].mxu0  ;;  %3754 = vmatpush3.bf16.msra.mxu0 %v561_v44 }
  0xe1   :  { %3700 = vmatprep.mubr.msk.f32.mxu0 %vm570_vm1, %v293_v47  ;;  %v3676_v51 = vpop.f32.mrb[4].mxu1  ;;  %3755 = vmatprep.subr.bf16.mxu0 %v562_v49  ;;  %v4501_v47 = vld [vmem:[%s6110_s10] ss:$0 sm:$0xff] }
  0xe2   :  { %3701 = vmatmul.mubr.msk.f32.gmra.mrb[20].mxu0 %vm570_vm1, %v3650_v45  ;;  %2321 = vrot.lane.b32.xlu0 %v562_v49, %s4154_s0  ;;  %v502_v53 = vpop.f32.mrb[5].mxu1 }
  0xe3   :  { %v3653_v50 = vpop.f32.mrb[6].mxu0  ;;  %v563_v54 = vpack.c.bf16 %v3676_v51, %v502_v53 }
  0xe4   :  { %v303_v52 = vpop.f32.mrb[7].mxu0  ;;  %3756 = vmatpush3.bf16.msra.mxu0 %v562_v49 }
  0xe5   :  { %3703 = vmatprep.mubr.msk.f32.mxu0 %vm570_vm1, %v303_v52  ;;  %3874 = vmatpush3.bf16.xpose.msk.msra.mxu1 %vm4361_vm3, %v562_v49  ;;  %v3679_v56 = vpop.f32.mrb[6].mxu1 }
  0xe6   :  { %3704 = vmatmul.mubr.msk.f32.gmra.mrb[22].mxu0 %vm570_vm1, %v3653_v50  ;;  %3757 = vmatprep.subr.bf16.mxu0 %v563_v54  ;;  %v512_v58 = vpop.f32.mrb[7].mxu1 }
  0xe7   :  { %v3656_v55 = vpop.f32.mrb[8].mxu0  ;;  %3875 = vmatprep.subr.bf16.mxu1 %v4150_v34  ;;  %2323 = vrot.lane.b32.xlu0 %v563_v54, %s4154_s0  ;;  %v564_v59 = vpack.c.bf16 %v3679_v56, %v512_v58 }
  0xe8   :  { %v313_v57 = vpop.f32.mrb[9].mxu0  ;;  %3758 = vmatpush3.bf16.msra.mxu0 %v563_v54 }
  0xe9   :  { %3706 = vmatprep.mubr.msk.f32.mxu0 %vm570_vm1, %v313_v57  ;;  %v3682_v61 = vpop.f32.mrb[8].mxu1  ;;  %3759 = vmatprep.subr.bf16.mxu0 %v564_v59 }
  0xea   :  { %3707 = vmatmul.mubr.msk.f32.gmra.mrb[24].mxu0 %vm570_vm1, %v3656_v55  ;;  %2325 = vrot.lane.b32.xlu1 %v564_v59, %s4154_s0  ;;  %v522_v63 = vpop.f32.mrb[9].mxu1 }
  0xeb   :  { %v3659_v60 = vpop.f32.mrb[10].mxu0  ;;  %v4384_v0 = vpack.c.bf16 %v3682_v61, %v522_v63 }
  0xec   :  { %v323_v62 = vpop.f32.mrb[11].mxu0  ;;  %3760 = vmatpush3.bf16.msra.mxu0 %v564_v59 }
  0xed   :  { %3709 = vmatprep.mubr.msk.f32.mxu0 %vm570_vm1, %v323_v62  ;;  %3878 = vmatpush3.bf16.xpose.msk.msra.mxu1 %vm4361_vm3, %v563_v54  ;;  %v3685_v2 = vpop.f32.mrb[10].mxu1 }
  0xee   :  { %3710 = vmatmul.mubr.msk.f32.gmra.mrb[26].mxu0 %vm570_vm1, %v3659_v60  ;;  %3761 = vmatprep.subr.bf16.mxu0 %v4384_v0  ;;  %v532_v4 = vpop.f32.mrb[11].mxu1 }
  0xef   :  { %v3662_v1 = vpop.f32.mrb[12].mxu0  ;;  %3879 = vmatprep.subr.bf16.mxu1 %v4150_v34  ;;  %v4392_v5 = vpack.c.bf16 %v3685_v2, %v532_v4 }
  0xf0   :  { %v333_v3 = vpop.f32.mrb[13].mxu0  ;;  %3762 = vmatpush3.bf16.msra.mxu0 %v4384_v0 }
  0xf1   :  { %3712 = vmatprep.mubr.msk.f32.mxu0 %vm570_vm1, %v333_v3  ;;  %v3688_v7 = vpop.f32.mrb[12].mxu1  ;;  %3763 = vmatprep.subr.bf16.mxu0 %v4392_v5 }
  0xf2   :  { %3713 = vmatmul.mubr.msk.f32.gmra.mrb[28].mxu0 %vm570_vm1, %v3662_v1  ;;  %v542_v9 = vpop.f32.mrb[13].mxu1 }
  0xf3   :  { %v3665_v6 = vpop.f32.mrb[14].mxu0  ;;  %v4398_v10 = vpack.c.bf16 %v3688_v7, %v542_v9 }
  0xf4   :  { %v343_v8 = vpop.f32.mrb[15].mxu0  ;;  %3764 = vmatpush3.bf16.msra.mxu0 %v4392_v5 }
  0xf5   :  { %3715 = vmatprep.mubr.msk.f32.mxu0 %vm570_vm1, %v343_v8  ;;  %3882 = vmatpush3.bf16.xpose.msk.msra.mxu1 %vm4361_vm3, %v564_v59  ;;  %v3691_v11 = vpop.f32.mrb[14].mxu1 }
  0xf6   :  { %3716 = vmatmul.mubr.msk.f32.gmra.mrb[30].mxu0 %vm570_vm1, %v3665_v6  ;;  %3765 = vmatprep.subr.bf16.mxu0 %v4398_v10  ;;  %v552_v12 = vpop.f32.mrb[15].mxu1 }
  0xf7   :  { %3883 = vmatprep.subr.bf16.mxu1 %v4150_v34  ;;  %v4406_v13 = vpack.c.bf16 %v3691_v11, %v552_v12  ;;  %v3949_v12 = vld [vmem:[%s6111_s4] sm:$0xff]  }
  0xf8   :  { %3766 = vmatpush3.bf16.msra.mxu0 %v4398_v10 }
  0xf9   :  { %3767 = vmatprep.subr.bf16.mxu0 %v4406_v13 }
  0xfc   :  { %3768 = vmatpush3.bf16.msra.mxu0 %v4406_v13 }
  0xfd   :  { %3886 = vmatpush3.bf16.xpose.msk.msra.mxu1 %vm4361_vm3, %v4384_v0 }
  0xfe   :  { %3887 = vmatprep.subr.bf16.mxu1 %v4150_v34 }
 0x105   :  { %3890 = vmatpush3.bf16.xpose.msk.msra.mxu1 %vm4361_vm3, %v4392_v5 }
 0x106   :  { %3891 = vmatprep.subr.bf16.mxu1 %v4150_v34 }
 0x10d   :  { %3894 = vmatpush3.bf16.xpose.msk.msra.mxu1 %vm4361_vm3, %v4398_v10 }
 0x10e   :  { %3895 = vmatprep.subr.bf16.mxu1 %v4150_v34 }
 0x115   :  { %3898 = vmatpush3.bf16.xpose.msk.msra.mxu1 %vm4361_vm3, %v4406_v13 }
 0x116   :  { %3899 = vmatprep.subr.msk.bf16.mxu1 %vm2580_vm4, %v2507_v14 }
 0x11c   :  { %3751 = vmatmul.mubr.msk.f32.vlgmr.msra.gmra.mrb[16].mxu1 %vm570_vm1, %v767_v15 }
 0x11d   :  { %3818 = vmatpush3.bf16.msra.mxu1 %v2582_v17  ;;  %3819 = vmatprep.mubr.msk.bf16.mxu1 %vm2555_vm5, %v3941_v16 }
 0x120   :  { %3820 = vmatmul.mubr.msk.bf16.vlgmr.msra.gmra.mrb[20].mxu1 %vm2555_vm5, %v3942_v18 }
 0x121   :  { %3823 = vmatprep.mubr.msk.bf16.mxu1 %vm2555_vm5, %v3943_v19 }
 0x128   :  { %3824 = vmatmul.mubr.msk.bf16.gmra.mrb[24].mxu1 %vm2555_vm5, %v3944_v20 }
 0x129   :  { %3827 = vmatprep.mubr.msk.bf16.mxu1 %vm2555_vm5, %v3945_v21  ;;  %v4156_v21 = vmov -1e+30  }
 0x12a   :  { %45 = vst.msk [vmem:[#allocation2 + $0x8] sm:$0xff] %vm43_vm6, %v4156_v21  ;;  %44 = vst.msk [vmem:[#allocation2] sm:$0xff] %vm43_vm6, %v4156_v21 }
 0x12b   :  { %46 = vst.msk [vmem:[#allocation2 + $0x10] sm:$0xff] %vm43_vm6, %v4156_v21  ;;  %47 = vst.msk [vmem:[#allocation2 + $0x18] sm:$0xff] %vm43_vm6, %v4156_v21 }
 0x12c   :  { %48 = vst.msk [vmem:[#allocation2 + $0x20] sm:$0xff] %vm43_vm6, %v4156_v21  ;;  %49 = vst.msk [vmem:[#allocation2 + $0x28] sm:$0xff] %vm43_vm6, %v4156_v21 }
 0x12d   :  { %50 = vst.msk [vmem:[#allocation2 + $0x30] sm:$0xff] %vm43_vm6, %v4156_v21  ;;  %51 = vst.msk [vmem:[#allocation2 + $0x38] sm:$0xff] %vm43_vm6, %v4156_v21 }
 0x12e   :  { %52 = vst.msk [vmem:[#allocation2 + $0x40] sm:$0xff] %vm43_vm6, %v4156_v21  ;;  %53 = vst.msk [vmem:[#allocation2 + $0x48] sm:$0xff] %vm43_vm6, %v4156_v21 }
 0x12f   :  { %54 = vst.msk [vmem:[#allocation2 + $0x50] sm:$0xff] %vm43_vm6, %v4156_v21  ;;  %55 = vst.msk [vmem:[#allocation2 + $0x58] sm:$0xff] %vm43_vm6, %v4156_v21 }
 0x130   :  { %3828 = vmatmul.mubr.msk.bf16.gmra.mrb[28].mxu1 %vm2555_vm5, %v3946_v22  ;;  %56 = vst.msk [vmem:[#allocation2 + $0x60] sm:$0xff] %vm43_vm6, %v4156_v21  ;;  %57 = vst.msk [vmem:[#allocation2 + $0x68] sm:$0xff] %vm43_vm6, %v4156_v21 }
 0x131   :  { %3831 = vmatprep.mubr.msk.bf16.mxu1 %vm2555_vm5, %v3947_v24  ;;  %58 = vst.msk [vmem:[#allocation2 + $0x70] sm:$0xff] %vm43_vm6, %v4156_v21  ;;  %59 = vst.msk [vmem:[#allocation2 + $0x78] sm:$0xff] %vm43_vm6, %v4156_v21 }
 0x132   :  { %60 = vst.msk [vmem:[#allocation2 + $0x80] sm:$0xff] %vm43_vm6, %v4156_v21  ;;  %61 = vst.msk [vmem:[#allocation2 + $0x88] sm:$0xff] %vm43_vm6, %v4156_v21 }
 0x133   :  { %62 = vst.msk [vmem:[#allocation2 + $0x90] sm:$0xff] %vm43_vm6, %v4156_v21  ;;  %63 = vst.msk [vmem:[#allocation2 + $0x98] sm:$0xff] %vm43_vm6, %v4156_v21 }
 0x134   :  { %64 = vst.msk [vmem:[#allocation2 + $0xa0] sm:$0xff] %vm43_vm6, %v4156_v21  ;;  %65 = vst.msk [vmem:[#allocation2 + $0xa8] sm:$0xff] %vm43_vm6, %v4156_v21 }
 0x135   :  { %66 = vst.msk [vmem:[#allocation2 + $0xb0] sm:$0xff] %vm43_vm6, %v4156_v21  ;;  %67 = vst.msk [vmem:[#allocation2 + $0xb8] sm:$0xff] %vm43_vm6, %v4156_v21 }
 0x136   :  { %68 = vst.msk [vmem:[#allocation2 + $0xc0] sm:$0xff] %vm43_vm6, %v4156_v21  ;;  %69 = vst.msk [vmem:[#allocation2 + $0xc8] sm:$0xff] %vm43_vm6, %v4156_v21 }
 0x137   :  { %70 = vst.msk [vmem:[#allocation2 + $0xd0] sm:$0xff] %vm43_vm6, %v4156_v21  ;;  %71 = vst.msk [vmem:[#allocation2 + $0xd8] sm:$0xff] %vm43_vm6, %v4156_v21 }
 0x138   :  { %3832 = vmatmul.mubr.msk.bf16.gmra.mrb[32].mxu1 %vm2555_vm5, %v3948_v25  ;;  %72 = vst.msk [vmem:[#allocation2 + $0xe0] sm:$0xff] %vm43_vm6, %v4156_v21  ;;  %73 = vst.msk [vmem:[#allocation2 + $0xe8] sm:$0xff] %vm43_vm6, %v4156_v21 }
 0x139   :  { %3851 = vmatprep.mubr.bf16.mxu1 %v3949_v12  ;;  %74 = vst.msk [vmem:[#allocation2 + $0xf0] sm:$0xff] %vm43_vm6, %v4156_v21  ;;  %75 = vst.msk [vmem:[#allocation2 + $0xf8] sm:$0xff] %vm43_vm6, %v4156_v21 }
 0x151   :  { %v4466_v26 = vpop.permute.xlu1 %2319 }
 0x152   :  { %6207 = vst [vmem:[#allocation5_spill] sm:$0xff] %v4466_v26  ;;  %3785 = vmatprep.subr.bf16.mxu0 %v4466_v26 }
 0x1ad   :  { %v3696_v27 = vpop.f32.mrb[16].mxu0 }
 0x1ae   :  { %944 = vperm.xlu0 %3908, %v3696_v27   ;;  %v688_v28 = vpop.f32.mrb[17].mxu0 }
 0x1af   :  { %1705 = vperm.xlu1 %3911, %v688_v28  }
 0x1b1   :  { %v3699_v29 = vpop.f32.mrb[18].mxu0 }
 0x1b2   :  { %3909 = vset.pattern.permute.xlu0 %v4155_v23  ;;  %v698_v30 = vpop.f32.mrb[19].mxu0 }
 0x1b3   :  { %1709 = vperm.xlu0 %3909, %v3696_v27   ;;  %3912 = vset.pattern.permute.xlu1 %v4153_v40 }
 0x1b4   :  { %954 = vperm.xlu1 %3912, %v3699_v29  }
 0x1b5   :  { %v3702_v31 = vpop.f32.mrb[20].mxu0 }
 0x1b6   :  { %v708_v32 = vpop.f32.mrb[21].mxu0 }
 0x1b7   :  { %3910 = vset.pattern.permute.xlu0 %v4153_v40 }
 0x1b8   :  { %939 = vperm.xlu0 %3910, %v688_v28   ;;  %3913 = vset.pattern.permute.xlu1 %v4155_v23 }
 0x1b9   :  { %1717 = vperm.xlu1 %3913, %v3699_v29   ;;  %v3705_v33 = vpop.f32.mrb[22].mxu0 }
 0x1ba   :  { %v718_v34 = vpop.f32.mrb[23].mxu0 }
 0x1bc   :  { %959 = vperm.xlu0 %3910, %v708_v32  }
 0x1bd   :  { %3914 = vset.pattern.permute.xlu1 %v4153_v40  ;;  %v3708_v36 = vpop.f32.mrb[24].mxu0 }
 0x1be   :  { %949 = vperm.xlu1 %3914, %v698_v30   ;;  %v728_v37 = vpop.f32.mrb[25].mxu0 }
 0x1c0   :  { %3918 = vset.pattern.permute.xlu0 %v4155_v23 }
 0x1c1   :  { %1721 = vperm.xlu0 %3918, %v708_v32   ;;  %v3711_v38 = vpop.f32.mrb[26].mxu0  ;;  %v1017_v32 = vlaneseq }
 0x1c2   :  { %3915 = vset.pattern.permute.xlu1 %v4155_v23  ;;  %v738_v39 = vpop.f32.mrb[27].mxu0 }
 0x1c3   :  { %1713 = vperm.xlu1 %3915, %v698_v30   ;;  %v3950_v30 = vld [vmem:[%s6111_s4 + $0x8] sm:$0xff]  }
 0x1c5   :  { %3921 = vset.pattern.permute.xlu0 %v4153_v40  ;;  %v3714_v41 = vpop.f32.mrb[28].mxu0 }
 0x1c6   :  { %969 = vperm.xlu0 %3921, %v718_v34   ;;  %v748_v42 = vpop.f32.mrb[29].mxu0 }
 0x1c7   :  { %3916 = vset.pattern.permute.xlu1 %v4153_v40 }
 0x1c8   :  { %964 = vperm.xlu1 %3916, %v3702_v31  }
 0x1c9   :  { %v3717_v43 = vpop.f32.mrb[30].mxu0 }
 0x1ca   :  { %3922 = vset.pattern.permute.xlu0 %v4155_v23  ;;  %v758_v44 = vpop.f32.mrb[31].mxu0 }
 0x1cb   :  { %1729 = vperm.xlu0 %3922, %v718_v34   ;;  %v1018_v34 = vshrl.u32 %v1017_v32, 7 }
 0x1cc   :  { %3917 = vset.pattern.permute.xlu1 %v4155_v23 }
 0x1cd   :  { %1725 = vperm.xlu1 %3917, %v3702_v31   ;;  %v3951_v31 = vld [vmem:[%s6111_s4 + $0x10] sm:$0xff]  }
 0x1cf   :  { %3925 = vset.pattern.permute.xlu0 %v4153_v40 }
 0x1d0   :  { %979 = vperm.xlu0 %3925, %v728_v37  }
 0x1d1   :  { %3919 = vset.pattern.permute.xlu1 %v4153_v40 }
 0x1d2   :  { %974 = vperm.xlu1 %3919, %v3705_v33  }
 0x1d4   :  { %3926 = vset.pattern.permute.xlu0 %v4155_v23 }
 0x1d5   :  { %1737 = vperm.xlu0 %3926, %v728_v37   ;;  %v4638_v37 = vpop.permute.xlu0 %2321 }
 0x1d6   :  { %3920 = vset.pattern.permute.xlu1 %v4155_v23  ;;  %6208 = vst [vmem:[#allocation6_spill] sm:$0xff] %v4638_v37 }
 0x1d7   :  { %1733 = vperm.xlu1 %3920, %v3705_v33   ;;  %v3952_v33 = vld [vmem:[%s6111_s4 + $0x18] sm:$0xff]  }
 0x1d9   :  { %3929 = vset.pattern.permute.xlu0 %v4153_v40 }
 0x1da   :  { %989 = vperm.xlu0 %3929, %v738_v39  }
 0x1db   :  { %3923 = vset.pattern.permute.xlu1 %v4153_v40 }
 0x1dc   :  { %984 = vperm.xlu1 %3923, %v3708_v36  }
 0x1de   :  { %3930 = vset.pattern.permute.xlu0 %v4155_v23 }
 0x1df   :  { %1745 = vperm.xlu0 %3930, %v738_v39   ;;  %v1770_v39 = vsub.s32 1, %v1018_v34 }
 0x1e0   :  { %3924 = vset.pattern.permute.xlu1 %v4155_v23 }
 0x1e1   :  { %1741 = vperm.xlu1 %3924, %v3708_v36   ;;  %v3953_v36 = vld [vmem:[%s6111_s4 + $0x20] sm:$0xff]  }
 0x1e3   :  { %3933 = vset.pattern.permute.xlu0 %v4153_v40 }
 0x1e4   :  { %999 = vperm.xlu0 %3933, %v748_v42  }
 0x1e5   :  { %3927 = vset.pattern.permute.xlu1 %v4153_v40 }
 0x1e6   :  { %994 = vperm.xlu1 %3927, %v3711_v38  }
 0x1e8   :  { %3934 = vset.pattern.permute.xlu0 %v4155_v23 }
 0x1e9   :  { %1753 = vperm.xlu0 %3934, %v748_v42   ;;  %v3954_v42 = vld [vmem:[%s6111_s4 + $0x28] sm:$0xff]  }
 0x1ea   :  { %3928 = vset.pattern.permute.xlu1 %v4155_v23 }
 0x1eb   :  { %1749 = vperm.xlu1 %3928, %v3711_v38   ;;  %v1019_v38 = vsub.s32 0, %v1018_v34  ;;  %v3509_v34 = vld [vmem:[%s6112_s2 + $0x10] sm:$0xff]  }
 0x1ed   :  { %3937 = vset.pattern.permute.xlu0 %v4153_v40 }
 0x1ee   :  { %1009 = vperm.xlu0 %3937, %v758_v44  }
 0x1ef   :  { %3931 = vset.pattern.permute.xlu1 %v4153_v40  ;;  %v4494_v45 = vpop.f32.mrb[16].mxu1 }
 0x1f0   :  { %1004 = vperm.xlu1 %3931, %v3714_v41   ;;  %v3752_v46 = vpop.f32.mrb[17].mxu1 }
 0x1f1   :  { %v3477_v46 = vld [vmem:[%s6112_s2] sm:$0xff]  }
 0x1f2   :  { %3938 = vset.pattern.permute.xlu0 %v4155_v23 }
 0x1f3   :  { %1761 = vperm.xlu0 %3938, %v758_v44   ;;  %v3821_v48 = vpop.f32.mrb[20].mxu1  ;;  %v4648_v44 = vrot.slane %v4494_v45, %v1019_v38 }
 0x1f4   :  { %3932 = vset.pattern.permute.xlu1 %v4155_v23  ;;  %v2627_v49 = vadd.f32 %v3821_v48, %v4501_v47  ;;  %v2618_v50 = vpop.f32.mrb[21].mxu1 }
 0x1f5   :  { %1757 = vperm.xlu1 %3932, %v3714_v41   ;;  %v2619_v51 = vadd.f32 %v4501_v47, %v2618_v50  ;;  %v3822_v52 = vpop.f32.mrb[22].mxu1  ;;  %v4640_v41 = vpop.permute.xlu0 %2323 }
 0x1f6   :  { %v2630_v53 = vadd.f32 %v3822_v52, %v4501_v47  ;;  %v2621_v54 = vpop.f32.mrb[23].mxu1  ;;  %6209 = vst [vmem:[#allocation7_spill] sm:$0xff] %v4640_v41 }
 0x1f7   :  { %3939 = vset.pattern.permute.xlu0 %v4153_v40  ;;  %v2622_v55 = vadd.f32 %v4501_v47, %v2621_v54 }
 0x1f8   :  { %v2698_v56 = vpack.c.bf16 %v2630_v53, %v2627_v49  ;;  %v4656_v49 = vunpack.c.h.bf16 %v3477_v46 }
 0x1f9   :  { %3935 = vset.pattern.permute.xlu1 %v4153_v40  ;;  %v2697_v57 = vpack.c.bf16 %v2622_v55, %v2619_v51  ;;  %v4661_v55 = vunpack.c.l.bf16 %v3477_v46 }
 0x1fa   :  { %1014 = vperm.xlu1 %3935, %v3717_v43   ;;  %vm922_vm7 = vcmp.gt.f32.partialorder %v4656_v49, 0.0 }
 0x1fb   :  { %v3825_v58 = vpop.f32.mrb[24].mxu1  ;;  %3835 = vmatprep.subr.bf16.mxu1 %v2697_v57  ;;  %vm921_vm8 = vcmp.gt.f32.partialorder %v4661_v55, 0.0 }
 0x1fc   :  { %v2643_v59 = vadd.f32 %v3825_v58, %v4501_v47  ;;  %v2634_v60 = vpop.f32.mrb[25].mxu1  ;;  %3836 = vmatpush3.bf16.msra.mxu1 %v2697_v57 }
 0x1fd   :  { %v2635_v61 = vadd.f32 %v4501_v47, %v2634_v60  ;;  %v3826_v62 = vpop.f32.mrb[26].mxu1  ;;  %3837 = vmatprep.subr.bf16.mxu1 %v2698_v56 }
 0x1fe   :  { %3936 = vset.pattern.permute.xlu1 %v4155_v23  ;;  %v2646_v63 = vadd.f32 %v3826_v62, %v4501_v47  ;;  %v2637_v1 = vpop.f32.mrb[27].mxu1 }
 0x1ff   :  { %1765 = vperm.xlu1 %3936, %v3717_v43   ;;  %v2638_v2 = vadd.f32 %v4501_v47, %v2637_v1  ;;  %v4645_v43 = vpop.permute.xlu1 %2325 }
 0x200   :  { %v2700_v3 = vpack.c.bf16 %v2646_v63, %v2643_v59  ;;  %3838 = vmatpush3.bf16.msra.mxu1 %v2698_v56  ;;  %6210 = vst [vmem:[#allocation8_spill] sm:$0xff] %v4645_v43 }
 0x201   :  { %v2699_v4 = vpack.c.bf16 %v2638_v2, %v2635_v61  ;;  %v3508_v2 = vld [vmem:[%s6112_s2 + $0x8] sm:$0xff]  }
 0x202   :  { %v4686_v12 = vunpack.c.h.bf16 %v3508_v2 }
 0x203   :  { %3940 = vset.pattern.permute.xlu1 %v4153_v40  ;;  %v3829_v6 = vpop.f32.mrb[28].mxu1  ;;  %3839 = vmatprep.subr.bf16.mxu1 %v2699_v4 }
 0x204   :  { %v2659_v7 = vadd.f32 %v3829_v6, %v4501_v47  ;;  %v2650_v8 = vpop.f32.mrb[29].mxu1  ;;  %3840 = vmatpush3.bf16.msra.mxu1 %v2699_v4  ;;  %6213 = vst [vmem:[#allocation11_spill] sm:$0xff] %v4686_v12  ;;  %vm924_vm9 = vcmp.gt.f32.partialorder %v4686_v12, 0.0 }
 0x205   :  { %v2651_v9 = vadd.f32 %v4501_v47, %v2650_v8  ;;  %v3830_v11 = vpop.f32.mrb[30].mxu1  ;;  %3841 = vmatprep.subr.bf16.mxu1 %v2700_v3 }
 0x206   :  { %v2662_v14 = vadd.f32 %v3830_v11, %v4501_v47  ;;  %v2653_v15 = vpop.f32.mrb[31].mxu1 }
 0x207   :  { %v2654_v16 = vadd.f32 %v4501_v47, %v2653_v15 }
 0x208   :  { %v4522_v40 = vpack.c.bf16 %v2662_v14, %v2659_v7  ;;  %3842 = vmatpush3.bf16.msra.mxu1 %v2700_v3 }
 0x209   :  { %v2701_v17 = vpack.c.bf16 %v2654_v16, %v2651_v9 }
 0x20b   :  { %v3833_v18 = vpop.f32.mrb[32].mxu1  ;;  %3843 = vmatprep.subr.bf16.mxu1 %v2701_v17 }
 0x20c   :  { %v2675_v19 = vadd.f32 %v3833_v18, %v4501_v47  ;;  %v2666_v20 = vpop.f32.mrb[33].mxu1  ;;  %3844 = vmatpush3.bf16.msra.mxu1 %v2701_v17 }
 0x20d   :  { %v2667_v22 = vadd.f32 %v4501_v47, %v2666_v20  ;;  %v3834_v23 = vpop.f32.mrb[34].mxu1  ;;  %3845 = vmatprep.subr.bf16.mxu1 %v4522_v40 }
 0x20e   :  { %v2678_v24 = vadd.f32 %v3834_v23, %v4501_v47  ;;  %v2669_v25 = vpop.f32.mrb[35].mxu1 }
 0x20f   :  { %v2670_v27 = vadd.f32 %v4501_v47, %v2669_v25  ;;  %v4654_v47 = vrot.slane %v4494_v45, %v1770_v39  ;;  %v4712_v39 = vunpack.c.h.bf16 %v3509_v34 }
 0x210   :  { %v2704_v28 = vpack.c.bf16 %v2678_v24, %v2675_v19  ;;  %3846 = vmatpush3.bf16.msra.mxu1 %v4522_v40 }
 0x211   :  { %v2703_v29 = vpack.c.bf16 %v2670_v27, %v2667_v22  ;;  %v4697_v22 = vunpack.c.l.bf16 %v3508_v2  ;;  %6216 = vst [vmem:[#allocation14_spill] sm:$0xff] %v4712_v39  ;;  %vm926_vm11 = vcmp.gt.f32.partialorder %v4712_v39, 0.0 }
 0x213   :  { %3847 = vmatprep.subr.bf16.mxu1 %v2703_v29  ;;  %6215 = vst [vmem:[#allocation13_spill] sm:$0xff] %v4697_v22  ;;  %vm923_vm10 = vcmp.gt.f32.partialorder %v4697_v22, 0.0 }
 0x214   :  { %3848 = vmatpush3.bf16.msra.mxu1 %v2703_v29 }
 0x215   :  { %3849 = vmatprep.subr.bf16.mxu1 %v2704_v28 }
 0x218   :  { %3850 = vmatpush3.bf16.msra.mxu1 %v2704_v28 }
 0x21b   :  { %3852 = vmatmul.mubr.bf16.vlgmr.msra.gmra.mrb[36].mxu1 %v3950_v30 }
 0x21c   :  { %3855 = vmatprep.mubr.bf16.mxu1 %v3951_v31 }
 0x223   :  { %3856 = vmatmul.mubr.bf16.gmra.mrb[40].mxu1 %v3952_v33 }
 0x224   :  { %3859 = vmatprep.mubr.bf16.mxu1 %v3953_v36 }
 0x22b   :  { %3860 = vmatmul.mubr.bf16.gmra.mrb[44].mxu1 %v3954_v42 }
 0x22d   :  { %v945_v48 = vpop.permute.xlu0 %944 }
 0x22e   :  { %v1022_v50 = vadd.f32 %v4648_v44, %v945_v48  ;;  %v1706_v51 = vpop.permute.xlu1 %1705 }
 0x22f   :  { %v1772_v52 = vadd.f32 %v4654_v47, %v1706_v51 }
 0x230   :  { %v1038_v53 = vmul.f32 0.2, %v1022_v50 }
 0x231   :  { %v1788_v54 = vmul.f32 0.2, %v1772_v52 }
 0x232   :  { %v1710_v56 = vpop.permute.xlu0 %1709  ;;  %v1054_v57 = vmax.f32 %v1022_v50, %v1038_v53 }
 0x233   :  { %v1773_v45 = vadd.f32 %v4654_v47, %v1710_v56  ;;  %v955_v58 = vpop.permute.xlu1 %954  ;;  %v1804_v60 = vmax.f32 %v1772_v52, %v1788_v54 }
 0x234   :  { %v4666_v59 = vsel %vm922_vm7, %v1054_v57, -1e+30  ;;  %v1024_v62 = vadd.f32 %v4648_v44, %v955_v58  ;;  %v4721_v57 = vunpack.c.l.bf16 %v3509_v34 }
 0x235   :  { %v1789_v61 = vmul.f32 0.2, %v1773_v45  ;;  %1103 = vmax.xlane.f32.xlu1 %v4666_v59  ;;  %v4677_v6 = vsel %vm921_vm8, %v1804_v60, -1e+30 }
 0x236   :  { %6211 = vst [vmem:[#allocation9_spill] sm:$0xff] %v4677_v6  ;;  %v1040_v9 = vmul.f32 0.2, %v1024_v62  ;;  %6218 = vst [vmem:[#allocation16_spill] sm:$0xff] %v4721_v57  ;;  %vm925_vm12 = vcmp.gt.f32.partialorder %v4721_v57, 0.0 }
 0x237   :  { %v940_v63 = vpop.permute.xlu0 %939  ;;  %v1805_v1 = vmax.f32 %v1773_v45, %v1789_v61 }
 0x238   :  { %v1021_v3 = vadd.f32 %v4648_v44, %v940_v63  ;;  %v1718_v4 = vpop.permute.xlu1 %1717  ;;  %v1056_v20 = vmax.f32 %v1024_v62, %v1040_v9 }
 0x239   :  { %v1775_v7 = vadd.f32 %v4654_v47, %v1718_v4  ;;  %1853 = vmax.xlane.f32.xlu1 %v4677_v6  ;;  %v4683_v8 = vsel %vm922_vm7, %v1805_v1, -1e+30  ;;  %v3510_v1 = vld [vmem:[%s6112_s2 + $0x18] sm:$0xff]  }
 0x23a   :  { %6212 = vst [vmem:[#allocation10_spill] sm:$0xff] %v4683_v8  ;;  %v1037_v11 = vmul.f32 0.2, %v1021_v3  ;;  %1855 = vmax.xlane.f32.xlu0 %v4683_v8  ;;  %v4700_v27 = vsel %vm924_vm9, %v1056_v20, -1e+30  ;;  %v4733_v4 = vunpack.c.h.bf16 %v3510_v1 }
 0x23b   :  { %v1791_v14 = vmul.f32 0.2, %v1775_v7  ;;  %v960_v15 = vpop.permute.xlu0 %959 }
 0x23c   :  { %v1053_v16 = vmax.f32 %v1021_v3, %v1037_v11  ;;  %v1025_v52 = vadd.f32 %v4648_v44, %v960_v15  ;;  %6219 = vst [vmem:[#allocation17_spill] sm:$0xff] %v4733_v4  ;;  %vm928_vm13 = vcmp.gt.f32.partialorder %v4733_v4, 0.0 }
 0x23d   :  { %v950_v40 = vpop.permute.xlu1 %949  ;;  %v1807_v17 = vmax.f32 %v1775_v7, %v1791_v14 }
 0x23e   :  { %v1023_v18 = vadd.f32 %v4648_v44, %v950_v40  ;;  %v4691_v19 = vsel %vm921_vm8, %v1053_v16, -1e+30  ;;  %v1041_v60 = vmul.f32 0.2, %v1025_v52  ;;  %vm108_vm8 = vcmask 130048  }
 0x23f   :  { %1101 = vmax.xlane.f32.xlu0 %v4691_v19  ;;  %v4695_v21 = vsel %vm924_vm9, %v1807_v17, -1e+30 }
 0x240   :  { %6214 = vst [vmem:[#allocation12_spill] sm:$0xff] %v4695_v21  ;;  %v1039_v23 = vmul.f32 0.2, %v1023_v18  ;;  %v1722_v24 = vpop.permute.xlu0 %1721  ;;  %1859 = vmax.xlane.f32.xlu1 %v4695_v21  ;;  %v1057_v14 = vmax.f32 %v1025_v52, %v1041_v60 }
 0x241   :  { %v1776_v32 = vadd.f32 %v4654_v47, %v1722_v24 }
 0x242   :  { %v1714_v25 = vpop.permute.xlu1 %1713  ;;  %v1055_v28 = vmax.f32 %v1023_v18, %v1039_v23  ;;  %v4751_v24 = vsel %vm925_vm12, %v1057_v14, -1e+30 }
 0x243   :  { %v1774_v29 = vadd.f32 %v4654_v47, %v1714_v25  ;;  %1107 = vmax.xlane.f32.xlu0 %v4700_v27  ;;  %v1792_v48 = vmul.f32 0.2, %v1776_v32  ;;  %6222 = vst [vmem:[#allocation20_spill] sm:$0xff] %v4751_v24  ;;  %v4753_v25 = vunpack.c.l.bf16 %v3510_v1 }
 0x244   :  { %v4706_v33 = vsel %vm923_vm10, %v1055_v28, -1e+30 }
 0x245   :  { %v1790_v30 = vmul.f32 0.2, %v1774_v29  ;;  %v970_v31 = vpop.permute.xlu0 %969  ;;  %v1808_v58 = vmax.f32 %v1776_v32, %v1792_v48  ;;  %6223 = vst [vmem:[#allocation21_spill] sm:$0xff] %v4753_v25  ;;  %vm927_vm14 = vcmp.gt.f32.partialorder %v4753_v25, 0.0 }
 0x246   :  { %v1027_v17 = vadd.f32 %v4648_v44, %v970_v31 }
 0x247   :  { %v965_v36 = vpop.permute.xlu1 %964  ;;  %1105 = vmax.xlane.f32.xlu0 %v4706_v33  ;;  %v1806_v38 = vmax.f32 %v1774_v29, %v1790_v30  ;;  %v4738_v9 = vsel %vm925_vm12, %v1808_v58, -1e+30 }
 0x248   :  { %v1026_v42 = vadd.f32 %v4648_v44, %v965_v36  ;;  %6220 = vst [vmem:[#allocation18_spill] sm:$0xff] %v4738_v9  ;;  %v1043_v30 = vmul.f32 0.2, %v1027_v17  ;;  %v3511_v36 = vld [vmem:[%s6112_s2 + $0x20] sm:$0xff]  }
 0x249   :  { %v4715_v46 = vsel %vm923_vm10, %v1806_v38, -1e+30  ;;  %v4766_v48 = vunpack.c.h.bf16 %v3511_v36 }
 0x24a   :  { %6217 = vst [vmem:[#allocation15_spill] sm:$0xff] %v4715_v46  ;;  %v1042_v50 = vmul.f32 0.2, %v1026_v42  ;;  %v1730_v51 = vpop.permute.xlu0 %1729 }
 0x24b   :  { %1857 = vmax.xlane.f32.xlu0 %v4715_v46  ;;  %v1778_v63 = vadd.f32 %v4654_v47, %v1730_v51  ;;  %6225 = vst [vmem:[#allocation23_spill] sm:$0xff] %v4766_v48  ;;  %vm930_vm15 = vcmp.gt.f32.partialorder %v4766_v48, 0.0 }
 0x24c   :  { %v1726_v53 = vpop.permute.xlu1 %1725  ;;  %v1058_v54 = vmax.f32 %v1026_v42, %v1042_v50 }
 0x24d   :  { %v1777_v56 = vadd.f32 %v4654_v47, %v1726_v53  ;;  %v1794_v15 = vmul.f32 0.2, %v1778_v63  ;;  %v1059_v53 = vmax.f32 %v1027_v17, %v1043_v30  ;;  %v3512_v17 = vld [vmem:[%s6112_s2 + $0x28] sm:$0xff]  }
 0x24e   :  { %v4725_v45 = vsel %vm926_vm11, %v1058_v54, -1e+30 }
 0x24f   :  { %v1793_v61 = vmul.f32 0.2, %v1777_v56  ;;  %v980_v62 = vpop.permute.xlu0 %979  ;;  %1111 = vmax.xlane.f32.xlu0 %v4725_v45  ;;  %v1810_v29 = vmax.f32 %v1778_v63, %v1794_v15 }
 0x250   :  { %v1029_v60 = vadd.f32 %v4648_v44, %v980_v62 }
 0x251   :  { %v975_v2 = vpop.permute.xlu1 %974  ;;  %v1809_v3 = vmax.f32 %v1777_v56, %v1793_v61  ;;  %v4771_v51 = vsel %vm927_vm14, %v1810_v29, -1e+30 }
 0x252   :  { %v1028_v7 = vadd.f32 %v4648_v44, %v975_v2  ;;  %6226 = vst [vmem:[#allocation24_spill] sm:$0xff] %v4771_v51  ;;  %v4784_v2 = vsel %vm927_vm14, %v1059_v53, -1e+30  ;;  %v1045_v62 = vmul.f32 0.2, %v1029_v60 }
 0x253   :  { %1861 = vmax.xlane.f32.xlu0 %v4738_v9  ;;  %v4743_v11 = vsel %vm926_vm11, %v1809_v3, -1e+30  ;;  %6228 = vst [vmem:[#allocation26_spill] sm:$0xff] %v4784_v2  ;;  %v4786_v3 = vunpack.c.l.bf16 %v3511_v36 }
 0x254   :  { %6221 = vst [vmem:[#allocation19_spill] sm:$0xff] %v4743_v11  ;;  %v1044_v16 = vmul.f32 0.2, %v1028_v7  ;;  %v1738_v40 = vpop.permute.xlu0 %1737  ;;  %1863 = vmax.xlane.f32.xlu1 %v4743_v11 }
 0x255   :  { %v1780_v34 = vadd.f32 %v4654_v47, %v1738_v40  ;;  %6229 = vst [vmem:[#allocation27_spill] sm:$0xff] %v4786_v3  ;;  %vm929_vm0 = vcmp.gt.f32.partialorder %v4786_v3, 0.0 }
 0x256   :  { %v1734_v18 = vpop.permute.xlu1 %1733  ;;  %v1060_v20 = vmax.f32 %v1028_v7, %v1044_v16 }
 0x257   :  { %v1779_v23 = vadd.f32 %v4654_v47, %v1734_v18  ;;  %v1796_v54 = vmul.f32 0.2, %v1780_v34 }
 0x258   :  { %1109 = vmax.xlane.f32.xlu1 %v4751_v24  ;;  %v4758_v28 = vsel %vm928_vm13, %v1060_v20, -1e+30 }
 0x259   :  { %6224 = vst [vmem:[#allocation22_spill] sm:$0xff] %v4758_v28  ;;  %v1795_v31 = vmul.f32 0.2, %v1779_v23  ;;  %v990_v32 = vpop.permute.xlu0 %989  ;;  %1115 = vmax.xlane.f32.xlu0 %v4758_v28  ;;  %v1812_v14 = vmax.f32 %v1780_v34, %v1796_v54  ;;  %v1061_v34 = vmax.f32 %v1029_v60, %v1045_v62  ;;  %v3513_v62 = vld [vmem:[%s6112_s2 + $0x30] sm:$0xff]  }
 0x25b   :  { %v985_v38 = vpop.permute.xlu1 %984  ;;  %v1811_v42 = vmax.f32 %v1779_v23, %v1795_v31  ;;  %v4799_v23 = vunpack.c.h.bf16 %v3512_v17  ;;  %v4804_v30 = vsel %vm929_vm0, %v1812_v14, -1e+30 }
 0x25c   :  { %v1030_v50 = vadd.f32 %v4648_v44, %v985_v38  ;;  %6232 = vst [vmem:[#allocation30_spill] sm:$0xff] %v4804_v30 }
 0x25d   :  { %1865 = vmax.xlane.f32.xlu0 %v4771_v51  ;;  %v4776_v52 = vsel %vm928_vm13, %v1811_v42, -1e+30  ;;  %6231 = vst [vmem:[#allocation29_spill] sm:$0xff] %v4799_v23  ;;  %v1031_v42 = vadd.f32 %v4648_v44, %v990_v32  ;;  %vm932_vm1 = vcmp.gt.f32.partialorder %v4799_v23, 0.0  ;;  %v4987_v23 = vld [vmem:[#allocation2 + $0x20] sm:$0xff] }
 0x25e   :  { %6227 = vst [vmem:[#allocation25_spill] sm:$0xff] %v4776_v52  ;;  %v1046_v56 = vmul.f32 0.2, %v1030_v50  ;;  %v1746_v58 = vpop.permute.xlu0 %1745  ;;  %1867 = vmax.xlane.f32.xlu1 %v4776_v52  ;;  %v4949_v52 = vld [vmem:[#allocation2 + $0x90] sm:$0xff] }
 0x25f   :  { %v1782_v40 = vadd.f32 %v4654_v47, %v1746_v58  ;;  %v4817_v58 = vsel %vm929_vm0, %v1061_v34, -1e+30 }
 0x260   :  { %v1742_v61 = vpop.permute.xlu1 %1741  ;;  %v1062_v63 = vmax.f32 %v1030_v50, %v1046_v56  ;;  %6234 = vst [vmem:[#allocation32_spill] sm:$0xff] %v4817_v58 }
 0x261   :  { %v1781_v1 = vadd.f32 %v4654_v47, %v1742_v61  ;;  %v1798_v36 = vmul.f32 0.2, %v1782_v40  ;;  %v4819_v61 = vunpack.c.l.bf16 %v3512_v17 }
 0x262   :  { %1113 = vmax.xlane.f32.xlu1 %v4784_v2  ;;  %v4791_v7 = vsel %vm930_vm15, %v1062_v63, -1e+30  ;;  %v1047_v63 = vmul.f32 0.2, %v1031_v42 }
 0x263   :  { %6230 = vst [vmem:[#allocation28_spill] sm:$0xff] %v4791_v7  ;;  %v1797_v15 = vmul.f32 0.2, %v1781_v1  ;;  %v1000_v16 = vpop.permute.xlu0 %999  ;;  %1119 = vmax.xlane.f32.xlu0 %v4791_v7  ;;  %6235 = vst [vmem:[#allocation33_spill] sm:$0xff] %v4819_v61  ;;  %v1814_v32 = vmax.f32 %v1782_v40, %v1798_v36  ;;  %vm931_vm2 = vcmp.gt.f32.partialorder %v4819_v61, 0.0 }
 0x264   :  { %v1063_v36 = vmax.f32 %v1031_v42, %v1047_v63 }
 0x265   :  { %v995_v18 = vpop.permute.xlu1 %994  ;;  %v1813_v20 = vmax.f32 %v1781_v1, %v1797_v15  ;;  %v4837_v40 = vsel %vm931_vm2, %v1814_v32, -1e+30 }
 0x266   :  { %v1032_v29 = vadd.f32 %v4648_v44, %v995_v18  ;;  %6238 = vst [vmem:[#allocation36_spill] sm:$0xff] %v4837_v40 }
 0x267   :  { %1869 = vmax.xlane.f32.xlu0 %v4804_v30  ;;  %v4809_v31 = vsel %vm930_vm15, %v1813_v20, -1e+30  ;;  %v4832_v20 = vunpack.c.h.bf16 %v3513_v62 }
 0x268   :  { %6233 = vst [vmem:[#allocation31_spill] sm:$0xff] %v4809_v31  ;;  %v1048_v38 = vmul.f32 0.2, %v1032_v29  ;;  %1871 = vmax.xlane.f32.xlu1 %v4809_v31  ;;  %v1754_v50 = vpop.permute.xlu0 %1753 }
 0x269   :  { %v1784_v14 = vadd.f32 %v4654_v47, %v1754_v50  ;;  %6237 = vst [vmem:[#allocation35_spill] sm:$0xff] %v4832_v20  ;;  %vm934_vm3 = vcmp.gt.f32.partialorder %v4832_v20, 0.0 }
 0x26a   :  { %v1750_v53 = vpop.permute.xlu1 %1749  ;;  %v1064_v54 = vmax.f32 %v1032_v29, %v1048_v38 }
 0x26b   :  { %v1783_v56 = vadd.f32 %v4654_v47, %v1750_v53  ;;  %v1800_v38 = vmul.f32 0.2, %v1784_v14  ;;  %v1033_v53 = vadd.f32 %v4648_v44, %v1000_v16 }
 0x26c   :  { %1117 = vmax.xlane.f32.xlu1 %v4817_v58  ;;  %v4824_v60 = vsel %vm932_vm1, %v1064_v54, -1e+30 }
 0x26d   :  { %6236 = vst [vmem:[#allocation34_spill] sm:$0xff] %v4824_v60  ;;  %v1799_v1 = vmul.f32 0.2, %v1783_v56  ;;  %1123 = vmax.xlane.f32.xlu0 %v4824_v60  ;;  %v1010_v15 = vpop.permute.xlu0 %1009  ;;  %v1816_v16 = vmax.f32 %v1784_v14, %v1800_v38  ;;  %v1049_v63 = vmul.f32 0.2, %v1033_v53 }
 0x26f   :  { %v1005_v17 = vpop.permute.xlu1 %1004  ;;  %v1815_v18 = vmax.f32 %v1783_v56, %v1799_v1 }
 0x270   :  { %v1034_v29 = vadd.f32 %v4648_v44, %v1005_v17  ;;  %v4850_v17 = vsel %vm931_vm2, %v1063_v36, -1e+30  ;;  %v3514_v36 = vld [vmem:[%s6112_s2 + $0x38] sm:$0xff]  }
 0x271   :  { %1873 = vmax.xlane.f32.xlu0 %v4837_v40  ;;  %v4842_v34 = vsel %vm932_vm1, %v1815_v18, -1e+30  ;;  %6240 = vst [vmem:[#allocation38_spill] sm:$0xff] %v4850_v17  ;;  %v4852_v18 = vunpack.c.l.bf16 %v3513_v62  ;;  %v4885_v40 = vunpack.c.l.bf16 %v3514_v36 }
 0x272   :  { %6239 = vst [vmem:[#allocation37_spill] sm:$0xff] %v4842_v34  ;;  %v1050_v50 = vmul.f32 0.2, %v1034_v29  ;;  %1875 = vmax.xlane.f32.xlu1 %v4842_v34  ;;  %v1762_v1 = vpop.permute.xlu0 %1761 }
 0x273   :  { %6241 = vst [vmem:[#allocation39_spill] sm:$0xff] %v4852_v18  ;;  %vm933_vm4 = vcmp.gt.f32.partialorder %v4852_v18, 0.0  ;;  %6247 = vst [vmem:[#allocation45_spill] sm:$0xff] %v4885_v40  ;;  %vm935_vm7 = vcmp.gt.f32.partialorder %v4885_v40, 0.0  ;;  %v4942_v40 = vld [vmem:[#allocation2 + $0x10] sm:$0xff]  ;;  %v4967_v18 = vld [vmem:[#allocation2 + $0xa0] sm:$0xff] }
 0x274   :  { %v1758_v54 = vpop.permute.xlu1 %1757  ;;  %v1066_v56 = vmax.f32 %v1034_v29, %v1050_v50  ;;  %v1786_v29 = vadd.f32 %v4654_v47, %v1762_v1  ;;  %v4870_v14 = vsel %vm933_vm4, %v1816_v16, -1e+30  ;;  %v1065_v1 = vmax.f32 %v1033_v53, %v1049_v63 }
 0x275   :  { %v1785_v32 = vadd.f32 %v4654_v47, %v1758_v54  ;;  %v4865_v54 = vunpack.c.h.bf16 %v3514_v36  ;;  %6244 = vst [vmem:[#allocation42_spill] sm:$0xff] %v4870_v14 }
 0x276   :  { %1121 = vmax.xlane.f32.xlu1 %v4850_v17  ;;  %v4857_v42 = vsel %vm934_vm3, %v1066_v56, -1e+30  ;;  %v1802_v34 = vmul.f32 0.2, %v1786_v29 }
 0x277   :  { %6242 = vst [vmem:[#allocation40_spill] sm:$0xff] %v4857_v42  ;;  %v1801_v35 = vmul.f32 0.2, %v1785_v32  ;;  %1127 = vmax.xlane.f32.xlu0 %v4857_v42  ;;  %6243 = vst [vmem:[#allocation41_spill] sm:$0xff] %v4865_v54  ;;  %vm936_vm5 = vcmp.gt.f32.partialorder %v4865_v54, 0.0 }
 0x278   :  { %v1818_v63 = vmax.f32 %v1786_v29, %v1802_v34  ;;  %v4905_v34 = vld [vmem:[#allocation2 + $0x8] sm:$0xff] }
 0x279   :  { %v1015_v50 = vpop.permute.xlu1 %1014  ;;  %v1817_v62 = vmax.f32 %v1785_v32, %v1801_v35  ;;  %v1035_v35 = vadd.f32 %v4648_v44, %v1010_v15 }
 0x27a   :  { %v1036_v56 = vadd.f32 %v4648_v44, %v1015_v50 }
 0x27b   :  { %1877 = vmax.xlane.f32.xlu0 %v4870_v14  ;;  %v4875_v38 = vsel %vm934_vm3, %v1817_v62, -1e+30  ;;  %v4883_v14 = vsel %vm933_vm4, %v1065_v1, -1e+30  ;;  %v1051_v44 = vmul.f32 0.2, %v1035_v35 }
 0x27c   :  { %6245 = vst [vmem:[#allocation43_spill] sm:$0xff] %v4875_v38  ;;  %v1052_v31 = vmul.f32 0.2, %v1036_v56  ;;  %1879 = vmax.xlane.f32.xlu1 %v4875_v38  ;;  %6246 = vst [vmem:[#allocation44_spill] sm:$0xff] %v4883_v14 }
 0x27d   :  { %v1067_v62 = vmax.f32 %v1035_v35, %v1051_v44  ;;  %v4915_v35 = vld [vmem:[#allocation2 + $0x88] sm:$0xff] }
 0x27e   :  { %v1766_v32 = vpop.permute.xlu1 %1765  ;;  %v1068_v50 = vmax.f32 %v1036_v56, %v1052_v31  ;;  %v4894_v31 = vsel %vm935_vm7, %v1818_v63, -1e+30 }
 0x27f   :  { %v1787_v16 = vadd.f32 %v4654_v47, %v1766_v32  ;;  %6249 = vst [vmem:[#allocation47_spill] sm:$0xff] %v4894_v31  ;;  %v4902_v56 = vsel %vm935_vm7, %v1067_v62, -1e+30  ;;  %v4910_v32 = vld [vmem:[#allocation2 + $0x80] sm:$0xff] }
 0x280   :  { %1125 = vmax.xlane.f32.xlu1 %v4883_v14  ;;  %v4890_v53 = vsel %vm936_vm5, %v1068_v50, -1e+30  ;;  %6251 = vst [vmem:[#allocation49_spill] sm:$0xff] %v4902_v56  ;;  %v1085_v62 = vld [vmem:[#allocation2] sm:$0xff] }
 0x281   :  { %6248 = vst [vmem:[#allocation46_spill] sm:$0xff] %v4890_v53  ;;  %v1803_v15 = vmul.f32 0.2, %v1787_v16  ;;  %1131 = vmax.xlane.f32.xlu0 %v4890_v53 }
 0x283   :  { %v1819_v47 = vmax.f32 %v1787_v16, %v1803_v15  ;;  %v1088_v15 = vld [vmem:[#allocation2 + $0x18] sm:$0xff] }
 0x285   :  { %1881 = vmax.xlane.f32.xlu0 %v4894_v31  ;;  %v4899_v36 = vsel %vm936_vm5, %v1819_v47, -1e+30 }
 0x286   :  { %6250 = vst [vmem:[#allocation48_spill] sm:$0xff] %v4899_v36  ;;  %1883 = vmax.xlane.f32.xlu1 %v4899_v36 }
 0x28a   :  { %1129 = vmax.xlane.f32.xlu1 %v4902_v56 }
 0x2c2   :  { %v1104_v29 = vpop.xlane.xlu1 %1103 }
 0x2c3   :  { %v4908_v1 = vmax.f32 %v4905_v34, %v1104_v29  ;;  %v4932_v29 = vld [vmem:[#allocation2 + $0x98] sm:$0xff] }
 0x2c5   :  { %1689 = vst.msk [vmem:[#allocation2 + $0x8] sm:$0xff] %vm43_vm6, %v4908_v1  ;;  %1204 = vperm.xlu0 %3939, %v4908_v1  }
 0x2c6   :  { %v1854_v50 = vpop.xlane.xlu1 %1853 }
 0x2c7   :  { %v4918_v16 = vmax.f32 %v4910_v32, %v1854_v50  ;;  %v1856_v63 = vpop.xlane.xlu0 %1855 }
 0x2c8   :  { %v4921_v44 = vmax.f32 %v4915_v35, %v1856_v63 }
 0x2c9   :  { %2472 = vst.msk [vmem:[#allocation2 + $0x80] sm:$0xff] %vm43_vm6, %v4918_v16 }
 0x2ca   :  { %2473 = vst.msk [vmem:[#allocation2 + $0x88] sm:$0xff] %vm43_vm6, %v4921_v44  ;;  %1956 = vperm.xlu1 %3940, %v4921_v44  }
 0x2cc   :  { %v1102_v50 = vpop.xlane.xlu0 %1101 }
 0x2cd   :  { %v1133_v63 = vmax.f32 %v1085_v62, %v1102_v50  ;;  %v1860_v31 = vpop.xlane.xlu1 %1859 }
 0x2ce   :  { %v4935_v36 = vmax.f32 %v4932_v29, %v1860_v31 }
 0x2cf   :  { %1688 = vst.msk [vmem:[#allocation2] sm:$0xff] %vm43_vm6, %v1133_v63  ;;  %1199 = vperm.xlu1 %3940, %v1133_v63   ;;  %v1149_v61 = vsub.f32 %v1085_v62, %v1133_v63  ;;  %v5004_v62 = vld [vmem:[#allocation2 + $0xb0] sm:$0xff]  ;;  %v5009_v63 = vld [vmem:[#allocation2 + $0xb8] sm:$0xff] }
 0x2d0   :  { %2475 = vst.msk [vmem:[#allocation2 + $0x98] sm:$0xff] %vm43_vm6, %v4935_v36  ;;  %v1108_v38 = vpop.xlane.xlu0 %1107 }
 0x2d1   :  { %v1136_v54 = vmax.f32 %v1088_v15, %v1108_v38  ;;  %v4956_v38 = vld [vmem:[#allocation2 + $0x28] sm:$0xff]  ;;  %v1165_v21 = vmul.f32 1.442695, %v1149_v61 }
 0x2d3   :  { %1691 = vst.msk [vmem:[#allocation2 + $0x18] sm:$0xff] %vm43_vm6, %v1136_v54  ;;  %1951 = vperm.xlu1 %3940, %v4918_v16   ;;  %v1152_v48 = vsub.f32 %v1088_v15, %v1136_v54 }
 0x2d4   :  { %v1106_v31 = vpop.xlane.xlu0 %1105 }
 0x2d5   :  { %v4947_v50 = vmax.f32 %v4942_v40, %v1106_v31 }
 0x2d7   :  { %1690 = vst.msk [vmem:[#allocation2 + $0x10] sm:$0xff] %vm43_vm6, %v4947_v50  ;;  %1214 = vperm.xlu1 %3940, %v1136_v54   ;;  %v1171_v54 = vmul.f32 1.442695, %v1152_v48 }
 0x2d8   :  { %v1858_v47 = vpop.xlane.xlu0 %1857 }
 0x2d9   :  { %v4954_v30 = vmax.f32 %v4949_v52, %v1858_v47  ;;  %v4972_v47 = vld [vmem:[#allocation2 + $0xa8] sm:$0xff] }
 0x2db   :  { %2474 = vst.msk [vmem:[#allocation2 + $0x90] sm:$0xff] %vm43_vm6, %v4954_v30  ;;  %1966 = vperm.xlu1 %3940, %v4935_v36   ;;  %1961 = vperm.xlu0 %3939, %v4954_v30  }
 0x2dc   :  { %v1112_v31 = vpop.xlane.xlu0 %1111 }
 0x2dd   :  { %v4965_v20 = vmax.f32 %v4956_v38, %v1112_v31  ;;  %v1150_v31 = vsub.f32 %v4905_v34, %v4908_v1 }
 0x2df   :  { %1693 = vst.msk [vmem:[#allocation2 + $0x28] sm:$0xff] %vm43_vm6, %v4965_v20  ;;  %1209 = vperm.xlu1 %3940, %v4947_v50   ;;  %v1167_v14 = vmul.f32 1.442695, %v1150_v31  ;;  %v1154_v8 = vsub.f32 %v4956_v38, %v4965_v20 }
 0x2e0   :  { %v1862_v56 = vpop.xlane.xlu0 %1861 }
 0x2e1   :  { %v4975_v11 = vmax.f32 %v4967_v18, %v1862_v56  ;;  %v1864_v53 = vpop.xlane.xlu1 %1863  ;;  %3957 = vpow2.f32 %v1167_v14  ;;  %v5022_v56 = vld [vmem:[#allocation2 + $0x30] sm:$0xff]  ;;  %v1175_v38 = vmul.f32 1.442695, %v1154_v8 }
 0x2e2   :  { %v4978_v51 = vmax.f32 %v4972_v47, %v1864_v53  ;;  %v4993_v53 = vld [vmem:[#allocation2 + $0x38] sm:$0xff]  ;;  %3959 = vpow2.f32 %v1165_v21  ;;  %v5028_v21 = vld [vmem:[#allocation2 + $0x48] sm:$0xff] }
 0x2e3   :  { %2476 = vst.msk [vmem:[#allocation2 + $0xa0] sm:$0xff] %vm43_vm6, %v4975_v11  ;;  %1224 = vperm.xlu1 %3940, %v4965_v20   ;;  %3961 = vpow2.f32 %v1171_v54  ;;  %v5109_v54 = vld [vmem:[#allocation2 + $0xc0] sm:$0xff] }
 0x2e4   :  { %2477 = vst.msk [vmem:[#allocation2 + $0xa8] sm:$0xff] %vm43_vm6, %v4978_v51 }
 0x2e5   :  { %v1110_v34 = vpop.xlane.xlu1 %1109 }
 0x2e6   :  { %v4996_v1 = vmax.f32 %v4987_v23, %v1110_v34  ;;  %v1116_v46 = vpop.xlane.xlu0 %1115 }
 0x2e7   :  { %v4999_v9 = vmax.f32 %v4993_v53, %v1116_v46 }
 0x2e8   :  { %1692 = vst.msk [vmem:[#allocation2 + $0x20] sm:$0xff] %vm43_vm6, %v4996_v1  ;;  %1219 = vperm.xlu0 %3939, %v4996_v1  }
 0x2e9   :  { %1695 = vst.msk [vmem:[#allocation2 + $0x38] sm:$0xff] %vm43_vm6, %v4999_v9  ;;  %1234 = vperm.xlu1 %3940, %v4999_v9   ;;  %v1156_v57 = vsub.f32 %v4993_v53, %v4999_v9 }
 0x2ea   :  { %v1866_v31 = vpop.xlane.xlu0 %1865 }
 0x2eb   :  { %v5012_v46 = vmax.f32 %v5004_v62, %v1866_v31  ;;  %v1868_v61 = vpop.xlane.xlu1 %1867  ;;  %v6252_v31 = vmov 0.0   ;;  %v5124_v4 = vpop.eup %3957  ;;  %v1179_v53 = vmul.f32 1.442695, %v1156_v57 }
 0x2ec   :  { %v5015_v15 = vmax.f32 %v5009_v63, %v1868_v61  ;;  %1971 = vperm.xlu0 %3939, %v4975_v11   ;;  %110 = vst.msk [vmem:[#allocation4 + $0x8] sm:$0xff] %vm108_vm8, %v6252_v31  ;;  %109 = vst.msk [vmem:[#allocation4] sm:$0xff] %vm108_vm8, %v6252_v31  ;;  %v1151_v61 = vsub.f32 %v4942_v40, %v4947_v50  ;;  %v5118_v50 = vld [vmem:[#allocation2 + $0xc8] sm:$0xff]  ;;  %v5129_v60 = vpop.eup %3959 }
 0x2ed   :  { %2478 = vst.msk [vmem:[#allocation2 + $0xb0] sm:$0xff] %vm43_vm6, %v5012_v46  ;;  %6257 = vst [vmem:[#allocation54_spill] sm:$0xff] %v5124_v4  ;;  %v5154_v43 = vpop.eup %3961 }
 0x2ee   :  { %2479 = vst.msk [vmem:[#allocation2 + $0xb8] sm:$0xff] %vm43_vm6, %v5015_v15  ;;  %v5099_v3 = vpop.f32.mrb[36].mxu1  ;;  %6258 = vst [vmem:[#allocation55_spill] sm:$0xff] %v5129_v60 }
 0x2ef   :  { %v1114_v48 = vpop.xlane.xlu1 %1113  ;;  %111 = vst.msk [vmem:[#allocation4 + $0x10] sm:$0xff] %vm108_vm8, %v6252_v31  ;;  %112 = vst.msk [vmem:[#allocation4 + $0x18] sm:$0xff] %vm108_vm8, %v6252_v31  ;;  %v5104_v6 = vpop.f32.mrb[37].mxu1 }
 0x2f0   :  { %113 = vst.msk [vmem:[#allocation4 + $0x20] sm:$0xff] %vm108_vm8, %v6252_v31  ;;  %114 = vst.msk [vmem:[#allocation4 + $0x28] sm:$0xff] %vm108_vm8, %v6252_v31  ;;  %v5097_v14 = vmax.f32 %v5022_v56, %v1114_v48  ;;  %v1120_v34 = vpop.xlane.xlu0 %1119  ;;  %v1169_v48 = vmul.f32 1.442695, %v1151_v61  ;;  %v1153_v61 = vsub.f32 %v4987_v23, %v4996_v1 }
 0x2f1   :  { %115 = vst.msk [vmem:[#allocation4 + $0x30] sm:$0xff] %vm108_vm8, %v6252_v31  ;;  %116 = vst.msk [vmem:[#allocation4 + $0x38] sm:$0xff] %vm108_vm8, %v6252_v31  ;;  %v5102_v42 = vmax.f32 %v5028_v21, %v1120_v34 }
 0x2f2   :  { %117 = vst.msk [vmem:[#allocation4 + $0x40] sm:$0xff] %vm108_vm8, %v6252_v31  ;;  %118 = vst.msk [vmem:[#allocation4 + $0x48] sm:$0xff] %vm108_vm8, %v6252_v31  ;;  %1229 = vperm.xlu0 %3939, %v5097_v14   ;;  %3963 = vpow2.f32 %v1169_v48  ;;  %v1173_v41 = vmul.f32 1.442695, %v1153_v61 }
 0x2f3   :  { %119 = vst.msk [vmem:[#allocation4 + $0x50] sm:$0xff] %vm108_vm8, %v6252_v31  ;;  %120 = vst.msk [vmem:[#allocation4 + $0x58] sm:$0xff] %vm108_vm8, %v6252_v31  ;;  %1244 = vperm.xlu1 %3940, %v5102_v42   ;;  %3965 = vpow2.f32 %v1175_v38 }
 0x2f4   :  { %121 = vst.msk [vmem:[#allocation4 + $0x60] sm:$0xff] %vm108_vm8, %v6252_v31  ;;  %122 = vst.msk [vmem:[#allocation4 + $0x68] sm:$0xff] %vm108_vm8, %v6252_v31  ;;  %v1870_v17 = vpop.xlane.xlu0 %1869  ;;  %3967 = vpow2.f32 %v1173_v41 }
 0x2f5   :  { %123 = vst.msk [vmem:[#allocation4 + $0x70] sm:$0xff] %vm108_vm8, %v6252_v31  ;;  %124 = vst.msk [vmem:[#allocation4 + $0x78] sm:$0xff] %vm108_vm8, %v6252_v31  ;;  %v5127_v25 = vmax.f32 %v5109_v54, %v1870_v17  ;;  %v1872_v40 = vpop.xlane.xlu1 %1871  ;;  %v5142_v17 = vld [vmem:[#allocation2 + $0x40] sm:$0xff]  ;;  %3969 = vpow2.f32 %v1179_v53 }
 0x2f6   :  { %125 = vst.msk [vmem:[#allocation4 + $0x80] sm:$0xff] %vm108_vm8, %v6252_v31  ;;  %126 = vst.msk [vmem:[#allocation4 + $0x88] sm:$0xff] %vm108_vm8, %v6252_v31  ;;  %v5132_v58 = vmax.f32 %v5118_v50, %v1872_v40  ;;  %1461 = vperm.xlu0 %3939, %v5124_v4   ;;  %v5148_v4 = vld [vmem:[#allocation2 + $0x58] sm:$0xff] }
 0x2f7   :  { %127 = vst.msk [vmem:[#allocation4 + $0x90] sm:$0xff] %vm108_vm8, %v6252_v31  ;;  %128 = vst.msk [vmem:[#allocation4 + $0x98] sm:$0xff] %vm108_vm8, %v6252_v31  ;;  %1456 = vperm.xlu1 %3940, %v5129_v60  }
 0x2f8   :  { %129 = vst.msk [vmem:[#allocation4 + $0xa0] sm:$0xff] %vm108_vm8, %v6252_v31  ;;  %130 = vst.msk [vmem:[#allocation4 + $0xa8] sm:$0xff] %vm108_vm8, %v6252_v31 }
 0x2f9   :  { %131 = vst.msk [vmem:[#allocation4 + $0xb0] sm:$0xff] %vm108_vm8, %v6252_v31  ;;  %132 = vst.msk [vmem:[#allocation4 + $0xb8] sm:$0xff] %vm108_vm8, %v6252_v31  ;;  %v1118_v1 = vpop.xlane.xlu1 %1117 }
 0x2fa   :  { %133 = vst.msk [vmem:[#allocation4 + $0xc0] sm:$0xff] %vm108_vm8, %v6252_v31  ;;  %134 = vst.msk [vmem:[#allocation4 + $0xc8] sm:$0xff] %vm108_vm8, %v6252_v31  ;;  %v5157_v60 = vmax.f32 %v5142_v17, %v1118_v1  ;;  %v1124_v48 = vpop.xlane.xlu0 %1123  ;;  %v5172_v1 = vld [vmem:[#allocation2 + $0xd0] sm:$0xff] }
 0x2fb   :  { %135 = vst.msk [vmem:[#allocation4 + $0xd0] sm:$0xff] %vm108_vm8, %v6252_v31  ;;  %136 = vst.msk [vmem:[#allocation4 + $0xd8] sm:$0xff] %vm108_vm8, %v6252_v31  ;;  %v5162_v40 = vmax.f32 %v5148_v4, %v1124_v48  ;;  %1471 = vperm.xlu1 %3940, %v5154_v43   ;;  %v5178_v48 = vld [vmem:[#allocation2 + $0xd8] sm:$0xff] }
 0x2fc   :  { %137 = vst.msk [vmem:[#allocation4 + $0xe0] sm:$0xff] %vm108_vm8, %v6252_v31  ;;  %138 = vst.msk [vmem:[#allocation4 + $0xe8] sm:$0xff] %vm108_vm8, %v6252_v31  ;;  %1239 = vperm.xlu0 %3939, %v5157_v60  }
 0x2fd   :  { %139 = vst.msk [vmem:[#allocation4 + $0xf0] sm:$0xff] %vm108_vm8, %v6252_v31  ;;  %140 = vst.msk [vmem:[#allocation4 + $0xf8] sm:$0xff] %vm108_vm8, %v6252_v31  ;;  %v5111_v31 = vpop.f32.mrb[38].mxu1 }
 0x2fe   :  { %6253 = vst [vmem:[#allocation50_spill] sm:$0xff] %v5099_v3  ;;  %6254 = vst [vmem:[#allocation51_spill] sm:$0xff] %v5104_v6  ;;  %v5120_v34 = vpop.f32.mrb[39].mxu1 }
 0x2ff   :  { %1694 = vst.msk [vmem:[#allocation2 + $0x30] sm:$0xff] %vm43_vm6, %v5097_v14  ;;  %6255 = vst [vmem:[#allocation52_spill] sm:$0xff] %v5111_v31  ;;  %v5150_v23 = vpop.f32.mrb[40].mxu1  ;;  %v1876_v9 = vpop.xlane.xlu1 %1875  ;;  %1254 = vperm.xlu1 %3940, %v5162_v40  }
 0x300   :  { %1697 = vst.msk [vmem:[#allocation2 + $0x48] sm:$0xff] %vm43_vm6, %v5102_v42  ;;  %6256 = vst [vmem:[#allocation53_spill] sm:$0xff] %v5120_v34  ;;  %v5152_v20 = vpop.f32.mrb[41].mxu1 }
 0x301   :  { %2480 = vst.msk [vmem:[#allocation2 + $0xc0] sm:$0xff] %vm43_vm6, %v5127_v25  ;;  %2481 = vst.msk [vmem:[#allocation2 + $0xc8] sm:$0xff] %vm43_vm6, %v5132_v58  ;;  %v5159_v8 = vpop.f32.mrb[42].mxu1 }
 0x302   :  { %6259 = vst [vmem:[#allocation56_spill] sm:$0xff] %v5150_v23  ;;  %6260 = vst [vmem:[#allocation57_spill] sm:$0xff] %v5152_v20  ;;  %v5165_v39 = vpop.f32.mrb[43].mxu1 }
 0x303   :  { %6261 = vst [vmem:[#allocation58_spill] sm:$0xff] %v5154_v43  ;;  %6262 = vst [vmem:[#allocation59_spill] sm:$0xff] %v5159_v8  ;;  %v1874_v43 = vpop.xlane.xlu0 %1873  ;;  %v5187_v7 = vpop.f32.mrb[44].mxu1  ;;  %v5193_v8 = vld [vmem:[#allocation2 + $0x50] sm:$0xff] }
 0x304   :  { %6263 = vst [vmem:[#allocation60_spill] sm:$0xff] %v5165_v39  ;;  %1696 = vst.msk [vmem:[#allocation2 + $0x40] sm:$0xff] %vm43_vm6, %v5157_v60  ;;  %v5181_v38 = vmax.f32 %v5172_v1, %v1874_v43  ;;  %v5185_v39 = vmax.f32 %v5178_v48, %v1876_v9  ;;  %v5195_v41 = vpop.f32.mrb[45].mxu1  ;;  %v5197_v43 = vpop.eup %3963  ;;  %v5203_v9 = vld [vmem:[#allocation2 + $0x68] sm:$0xff] }
 0x305   :  { %1699 = vst.msk [vmem:[#allocation2 + $0x58] sm:$0xff] %vm43_vm6, %v5162_v40  ;;  %6264 = vst [vmem:[#allocation61_spill] sm:$0xff] %v5187_v7  ;;  %v5205_v7 = vpop.f32.mrb[46].mxu1  ;;  %v1122_v61 = vpop.xlane.xlu1 %1121  ;;  %1466 = vperm.xlu1 %3940, %v5197_v43  }
 0x306   :  { %2482 = vst.msk [vmem:[#allocation2 + $0xd0] sm:$0xff] %vm43_vm6, %v5181_v38  ;;  %6265 = vst [vmem:[#allocation62_spill] sm:$0xff] %v5195_v41  ;;  %v5208_v37 = vpop.f32.mrb[47].mxu1  ;;  %v5211_v41 = vmax.f32 %v5193_v8, %v1122_v61  ;;  %v5216_v57 = vpop.eup %3965  ;;  %v5228_v61 = vld [vmem:[#allocation2 + $0xe8] sm:$0xff] }
 0x307   :  { %6266 = vst [vmem:[#allocation63_spill] sm:$0xff] %v5197_v43  ;;  %2483 = vst.msk [vmem:[#allocation2 + $0xd8] sm:$0xff] %vm43_vm6, %v5185_v39  ;;  %v1128_v20 = vpop.xlane.xlu0 %1127  ;;  %v5230_v53 = vpop.eup %3967 }
 0x308   :  { %6267 = vst [vmem:[#allocation64_spill] sm:$0xff] %v5205_v7  ;;  %6268 = vst [vmem:[#allocation65_spill] sm:$0xff] %v5208_v37  ;;  %v5214_v26 = vmax.f32 %v5203_v9, %v1128_v20  ;;  %1249 = vperm.xlu0 %3939, %v5211_v41   ;;  %v5221_v7 = vld [vmem:[#allocation2 + $0xe0] sm:$0xff]  ;;  %v1155_v37 = vsub.f32 %v5022_v56, %v5097_v14  ;;  %v5252_v14 = vld [vmem:[#allocation2 + $0x78] sm:$0xff] }
 0x309   :  { %6269 = vst [vmem:[#allocation66_spill] sm:$0xff] %v5216_v57  ;;  %1698 = vst.msk [vmem:[#allocation2 + $0x50] sm:$0xff] %vm43_vm6, %v5211_v41  ;;  %1481 = vperm.xlu1 %3940, %v5216_v57   ;;  %v1880_v23 = vpop.xlane.xlu1 %1879  ;;  %v5246_v57 = vld [vmem:[#allocation2 + $0x60] sm:$0xff]  ;;  %v5266_v56 = vld [vmem:[#allocation2 + $0xf0] sm:$0xff] }
 0x30a   :  { %1701 = vst.msk [vmem:[#allocation2 + $0x68] sm:$0xff] %vm43_vm6, %v5214_v26  ;;  %6270 = vst [vmem:[#allocation67_spill] sm:$0xff] %v5230_v53  ;;  %v5238_v22 = vmax.f32 %v5228_v61, %v1880_v23  ;;  %v1177_v23 = vmul.f32 1.442695, %v1155_v37  ;;  %v5286_v37 = vld [vmem:[#allocation2 + $0x70] sm:$0xff] }
 0x30b   :  { %v1878_v20 = vpop.xlane.xlu0 %1877 }
 0x30c   :  { %v5235_v2 = vmax.f32 %v5221_v7, %v1878_v20  ;;  %1476 = vperm.xlu0 %3939, %v5230_v53   ;;  %2485 = vst.msk [vmem:[#allocation2 + $0xe8] sm:$0xff] %vm43_vm6, %v5238_v22  ;;  %v5254_v53 = vpop.eup %3969  ;;  %3971 = vpow2.f32 %v1177_v23  ;;  %v6274_v23 = vsub.f32 %v4910_v32, %v4918_v16  ;;  %v6277_v32 = vsub.f32 %v5004_v62, %v5012_v46 }
 0x30d   :  { %1264 = vperm.xlu1 %3940, %v5214_v26   ;;  %v1126_v20 = vpop.xlane.xlu1 %1125  ;;  %6271 = vst [vmem:[#allocation68_spill] sm:$0xff] %v5254_v53 }
 0x30e   :  { %2484 = vst.msk [vmem:[#allocation2 + $0xe0] sm:$0xff] %vm43_vm6, %v5235_v2  ;;  %v5257_v43 = vmax.f32 %v5246_v57, %v1126_v20  ;;  %v5272_v20 = vld [vmem:[#allocation2 + $0xf8] sm:$0xff]  ;;  %v1929_v16 = vmul.f32 1.442695, %v6277_v32 }
 0x30f   :  { %v1132_v12 = vpop.xlane.xlu0 %1131 }
 0x310   :  { %v5260_v34 = vmax.f32 %v5252_v14, %v1132_v12  ;;  %1700 = vst.msk [vmem:[#allocation2 + $0x60] sm:$0xff] %vm43_vm6, %v5257_v43  ;;  %1259 = vperm.xlu0 %3939, %v5257_v43  }
 0x311   :  { %1491 = vperm.xlu1 %3940, %v5254_v53  }
 0x312   :  { %1703 = vst.msk [vmem:[#allocation2 + $0x78] sm:$0xff] %vm43_vm6, %v5260_v34 }
 0x313   :  { %v1882_v12 = vpop.xlane.xlu0 %1881  ;;  %v1884_v53 = vpop.xlane.xlu1 %1883 }
 0x314   :  { %v5275_v28 = vmax.f32 %v5266_v56, %v1882_v12  ;;  %v5279_v24 = vmax.f32 %v5272_v20, %v1884_v53  ;;  %1981 = vperm.xlu0 %3939, %v5012_v46   ;;  %v1917_v12 = vmul.f32 1.442695, %v6274_v23  ;;  %v6282_v23 = vsub.f32 %v5109_v54, %v5127_v25 }
 0x315   :  { %1274 = vperm.xlu1 %3940, %v5260_v34  }
 0x316   :  { %2486 = vst.msk [vmem:[#allocation2 + $0xf0] sm:$0xff] %vm43_vm6, %v5275_v28  ;;  %2487 = vst.msk [vmem:[#allocation2 + $0xf8] sm:$0xff] %vm43_vm6, %v5279_v24  ;;  %v5302_v6 = vpop.eup %3971 }
 0x317   :  { %v1130_v31 = vpop.xlane.xlu1 %1129  ;;  %6272 = vst [vmem:[#allocation69_spill] sm:$0xff] %v5302_v6 }
 0x318   :  { %v5294_v53 = vmax.f32 %v5286_v37, %v1130_v31  ;;  %2327 = vrot.lane.b32.xlu0 %v4384_v0, %s4154_s0  ;;  %v6273_v0 = vsub.f32 %v4915_v35, %v4921_v44  ;;  %v6276_v35 = vsub.f32 %v4949_v52, %v4954_v30  ;;  %v1157_v52 = vsub.f32 %v5142_v17, %v5157_v60  ;;  %v3956_v60 = vld [vmem:[%s6111_s4 + $0x38] sm:$0xff]  }
 0x319   :  { %1976 = vperm.xlu1 %3940, %v4978_v51  }
 0x31a   :  { %1702 = vst.msk [vmem:[#allocation2 + $0x70] sm:$0xff] %vm43_vm6, %v5294_v53  ;;  %v1919_v31 = vmul.f32 1.442695, %v6273_v0  ;;  %v1921_v44 = vmul.f32 1.442695, %v6276_v35  ;;  %v1159_v0 = vsub.f32 %v5193_v8, %v5211_v41  ;;  %v6284_v8 = vsub.f32 %v5148_v4, %v5162_v40 }
 0x31b   :  { %v1181_v62 = vmul.f32 1.442695, %v1157_v52  ;;  %v1161_v40 = vsub.f32 %v5246_v57, %v5257_v43 }
 0x31c   :  { %1486 = vperm.xlu0 %3939, %v5302_v6   ;;  %3973 = vpow2.f32 %v1919_v31  ;;  %v1187_v41 = vmul.f32 1.442695, %v6284_v8 }
 0x31d   :  { %1986 = vperm.xlu1 %3940, %v5015_v15   ;;  %3975 = vpow2.f32 %v1917_v12  ;;  %v1933_v12 = vmul.f32 1.442695, %v6282_v23  ;;  %v1189_v43 = vmul.f32 1.442695, %v1161_v40  ;;  %v6295_v23 = vsub.f32 %v5252_v14, %v5260_v34  ;;  %v6298_v40 = vld [vmem:[#allocation51_spill] sm:$0xff] }
 0x320   :  { %1269 = vperm.xlu0 %3939, %v5294_v53  }
 0x321   :  { %2329 = vrot.lane.b32.xlu1 %v4392_v5, %s4154_s0  ;;  %v6275_v5 = vsub.f32 %v4967_v18, %v4975_v11  ;;  %v6278_v11 = vsub.f32 %v4932_v29, %v4935_v36  ;;  %v3955_v29 = vld [vmem:[%s6111_s4 + $0x30] sm:$0xff]  }
 0x322   :  { %3863 = vmatprep.mubr.bf16.mxu1 %v3955_v29 }
 0x323   :  { %v1925_v6 = vmul.f32 1.442695, %v6275_v5  ;;  %v1923_v18 = vmul.f32 1.442695, %v6278_v11  ;;  %3864 = vmatmul.mubr.bf16.gmra.mrb[48].mxu1 %v3956_v60  ;;  %v6283_v5 = vsub.f32 %v5118_v50, %v5132_v58 }
 0x324   :  { %1991 = vperm.xlu0 %3939, %v5127_v25   ;;  %v3474_v25 = vld [vmem:[%s6113_s8] ss:$0 sm:$0xff] }
 0x325   :  { %1996 = vperm.xlu1 %3940, %v5132_v58   ;;  %3977 = vpow2.f32 %v1925_v6  ;;  %v6285_v58 = vsub.f32 %v5172_v1, %v5181_v38  ;;  %v6287_v1 = vsub.f32 %v5203_v9, %v5214_v26 }
 0x326   :  { %3979 = vpow2.f32 %v1921_v44 }
 0x327   :  { %3981 = vpow2.f32 %v1929_v16  ;;  %v1937_v50 = vmul.f32 1.442695, %v6285_v58  ;;  %v6286_v16 = vsub.f32 %v5178_v48, %v5185_v39 }
 0x328   :  { %2001 = vperm.xlu0 %3939, %v5181_v38   ;;  %3983 = vpow2.f32 %v1923_v18  ;;  %v1191_v38 = vmul.f32 1.442695, %v6287_v1  ;;  %v6299_v1 = vld [vmem:[#allocation52_spill] sm:$0xff] }
 0x329   :  { %2006 = vperm.xlu1 %3940, %v5185_v39   ;;  %v1939_v4 = vmul.f32 1.442695, %v6286_v16  ;;  %v6288_v39 = vsub.f32 %v5228_v61, %v5238_v22 }
 0x32b   :  { %v1943_v48 = vmul.f32 1.442695, %v6288_v39  ;;  %v6302_v39 = vld [vmem:[#allocation20_spill] sm:$0xff] }
 0x32c   :  { %2331 = vrot.lane.b32.xlu0 %v4398_v10, %s4154_s0  ;;  %v6279_v10 = vsub.f32 %v4972_v47, %v4978_v51  ;;  %v6280_v51 = vsub.f32 %v5009_v63, %v5015_v15  ;;  %v6281_v63 = vsub.f32 %v5028_v21, %v5102_v42  ;;  %v1935_v42 = vmul.f32 1.442695, %v6283_v5 }
 0x32d   :  { %2333 = vrot.lane.b32.xlu1 %v4406_v13, %s4154_s0  ;;  %v5337_v13 = vpop.eup %3973  ;;  %v1185_v21 = vmul.f32 1.442695, %v1159_v0 }
 0x32e   :  { %v1927_v6 = vmul.f32 1.442695, %v6279_v10  ;;  %v5346_v30 = vpop.eup %3975  ;;  %v1931_v47 = vmul.f32 1.442695, %v6280_v51  ;;  %v1183_v15 = vmul.f32 1.442695, %v6281_v63 }
 0x32f   :  { %v5348_v36 = vpop.eup %3977 }
 0x330   :  { %2011 = vperm.xlu0 %3939, %v5235_v2   ;;  %3985 = vpow2.f32 %v1927_v6  ;;  %v5361_v46 = vpop.eup %3979 }
 0x331   :  { %2016 = vperm.xlu1 %3940, %v5238_v22   ;;  %v5363_v17 = vpop.eup %3981  ;;  %3987 = vpow2.f32 %v1931_v47  ;;  %v6289_v22 = vsub.f32 %v5221_v7, %v5235_v2  ;;  %v6293_v2 = vsub.f32 %v5272_v20, %v5279_v24 }
 0x332   :  { %3989 = vpow2.f32 %v1181_v62  ;;  %v5375_v31 = vpop.eup %3983 }
 0x333   :  { %3991 = vpow2.f32 %v1183_v15  ;;  %v1941_v61 = vmul.f32 1.442695, %v6289_v22  ;;  %v1947_v7 = vmul.f32 1.442695, %v6293_v2  ;;  %v6306_v2 = vld [vmem:[#allocation11_spill] sm:$0xff] }
 0x334   :  { %2214 = vperm.xlu0 %3939, %v5337_v13   ;;  %3993 = vpow2.f32 %v1933_v12  ;;  %v1195_v12 = vmul.f32 1.442695, %v6295_v23  ;;  %v6307_v23 = vld [vmem:[#allocation13_spill] sm:$0xff] }
 0x335   :  { %2026 = vperm.xlu1 %3940, %v5279_v24   ;;  %3995 = vpow2.f32 %v1935_v42  ;;  %v6296_v24 = vsub.f32 %v5286_v37, %v5294_v53  ;;  %v6297_v53 = vsub.f32 %v5266_v56, %v5275_v28 }
 0x336   :  { %3997 = vpow2.f32 %v1185_v21 }
 0x337   :  { %3999 = vpow2.f32 %v1187_v41  ;;  %v1193_v20 = vmul.f32 1.442695, %v6296_v24 }
 0x338   :  { %2229 = vperm.xlu0 %3939, %v5348_v36   ;;  %4001 = vpow2.f32 %v1937_v50  ;;  %v1945_v50 = vmul.f32 1.442695, %v6297_v53  ;;  %v6312_v53 = vld [vmem:[#allocation57_spill] sm:$0xff] }
 0x339   :  { %2209 = vperm.xlu1 %3940, %v5346_v30   ;;  %4003 = vpow2.f32 %v1939_v4 }
 0x33a   :  { %v5385_v54 = vpop.eup %3985  ;;  %4005 = vpow2.f32 %v1191_v38 }
 0x33b   :  { %v5395_v35 = vpop.eup %3987  ;;  %4007 = vpow2.f32 %v1943_v48 }
 0x33c   :  { %2239 = vperm.xlu0 %3939, %v5363_v17   ;;  %v5397_v32 = vpop.eup %3989  ;;  %4009 = vpow2.f32 %v1189_v43 }
 0x33d   :  { %2219 = vperm.xlu1 %3940, %v5361_v46   ;;  %v5412_v10 = vpop.eup %3991 }
 0x33e   :  { %v5414_v6 = vpop.eup %3993 }
 0x33f   :  { %v5421_v57 = vpop.eup %3995 }
 0x340   :  { %2021 = vperm.xlu0 %3939, %v5275_v28   ;;  %v5423_v9 = vpop.eup %3997 }
 0x341   :  { %2224 = vperm.xlu1 %3940, %v5375_v31   ;;  %v5431_v51 = vpop.eup %3999 }
 0x342   :  { %6290 = vst [vmem:[#allocation70_spill] sm:$0xff] %v5431_v51  ;;  %v5435_v60 = vpop.eup %4001 }
 0x344   :  { %3199 = vrot.lane.b32.xlu0 %v3474_v25, %s4154_s0  ;;  %v1205_v44 = vpop.permute.xlu0 %1204 }
 0x345   :  { %2234 = vperm.xlu1 %3940, %v5385_v54   ;;  %v1278_v11 = vsub.f32 %v4666_v59, %v1205_v44 }
 0x347   :  { %v1295_v26 = vmul.f32 1.442695, %v1278_v11 }
 0x348   :  { %1496 = vperm.xlu0 %3939, %v5397_v32  }
 0x349   :  { %2244 = vperm.xlu1 %3940, %v5395_v35   ;;  %v5410_v18 = vpop.permute.xlu1 %1956  ;;  %4011 = vpow2.f32 %v1295_v26 }
 0x34c   :  { %2249 = vperm.xlu0 %3939, %v5414_v6  }
 0x34d   :  { %1501 = vperm.xlu1 %3940, %v5412_v10  }
 0x34e   :  { %v1200_v59 = vpop.permute.xlu1 %1199 }
 0x34f   :  { %v1277_v52 = vsub.f32 %v4691_v19, %v1200_v59  ;;  %v5439_v19 = vpop.eup %4003 }
 0x350   :  { %1506 = vperm.xlu0 %3939, %v5423_v9   ;;  %6291 = vst [vmem:[#allocation71_spill] sm:$0xff] %v5439_v19  ;;  %v5441_v63 = vpop.eup %4005 }
 0x351   :  { %2254 = vperm.xlu1 %3940, %v5421_v57   ;;  %v1293_v29 = vmul.f32 1.442695, %v1277_v52  ;;  %6292 = vst [vmem:[#allocation72_spill] sm:$0xff] %v5441_v63  ;;  %v5448_v15 = vpop.eup %4007  ;;  %v6304_v52 = vld [vmem:[#allocation22_spill] sm:$0xff] }
 0x352   :  { %v5433_v47 = vpop.permute.xlu1 %1951  ;;  %6294 = vst [vmem:[#allocation73_spill] sm:$0xff] %v5448_v15  ;;  %v5454_v5 = vpop.eup %4009 }
 0x353   :  { %4013 = vpow2.f32 %v1293_v29  ;;  %v4012_v21 = vpop.eup %4011 }
 0x354   :  { %2259 = vperm.xlu0 %3939, %v5435_v60   ;;  %4015 = vpow2.f32 %v1941_v61  ;;  %v5467_v8 = vmul.f32 %v4012_v21, %v4656_v49  ;;  %v6305_v61 = vld [vmem:[#allocation53_spill] sm:$0xff]  ;;  %v6309_v21 = vld [vmem:[#allocation56_spill] sm:$0xff] }
 0x355   :  { %1511 = vperm.xlu1 %3940, %v5431_v51   ;;  %4017 = vpow2.f32 %v1947_v7 }
 0x356   :  { %v1215_v62 = vpop.permute.xlu1 %1214  ;;  %4019 = vpow2.f32 %v1195_v12 }
 0x357   :  { %v1280_v0 = vsub.f32 %v4700_v27, %v1215_v62  ;;  %4021 = vpow2.f32 %v1193_v20 }
 0x358   :  { %1521 = vperm.xlu0 %3939, %v5441_v63  }
 0x359   :  { %2264 = vperm.xlu1 %3940, %v5439_v19   ;;  %v1299_v34 = vmul.f32 1.442695, %v1280_v0 }
 0x35a   :  { %v5456_v42 = vpop.permute.xlu1 %1966  ;;  %v5480_v4 = vpop.permute.xlu0 %1961 }
 0x35b   :  { %4023 = vpow2.f32 %v1299_v34  ;;  %v6310_v34 = vld [vmem:[#allocation26_spill] sm:$0xff] }
 0x35c   :  { %1516 = vperm.xlu0 %3939, %v5454_v5  }
 0x35d   :  { %2274 = vperm.xlu1 %3940, %v5448_v15   ;;  %v4014_v25 = vpop.eup %4013  ;;  %v6334_v15 = vld [vmem:[#allocation23_spill] sm:$0xff] }
 0x35e   :  { %v1210_v14 = vpop.permute.xlu1 %1209  ;;  %v5464_v27 = vmul.f32 %v4014_v25, %v4661_v55  ;;  %v5469_v41 = vpop.eup %4015 }
 0x35f   :  { %v1279_v58 = vsub.f32 %v4706_v33, %v1210_v14  ;;  %v5487_v38 = vpop.eup %4017 }
 0x360   :  { %2269 = vperm.xlu0 %3939, %v5469_v41   ;;  %v1550_v37 = vpack.c.bf16 %v5467_v8, %v5464_v27  ;;  %6300 = vst [vmem:[#allocation74_spill] sm:$0xff] %v5487_v38  ;;  %v5489_v56 = vpop.eup %4019 }
 0x361   :  { %3238 = vrot.lane.b32.xlu1 %v5099_v3, %s4154_s0  ;;  %v1297_v44 = vmul.f32 1.442695, %v1279_v58  ;;  %6301 = vst [vmem:[#allocation75_spill] sm:$0xff] %v5489_v56  ;;  %v5494_v43 = vpop.eup %4021 }
 0x362   :  { %v1225_v16 = vpop.permute.xlu1 %1224  ;;  %3769 = vmatprep.mubr.bf16.mxu0 %v1550_v37  ;;  %6303 = vst [vmem:[#allocation20_spill] sm:$0xff] %v5494_v43  ;;  %v6311_v37 = vld [vmem:[#allocation5_spill] sm:$0xff] }
 0x363   :  { %4025 = vpow2.f32 %v1297_v44  ;;  %v1282_v33 = vsub.f32 %v4725_v45, %v1225_v16  ;;  %v6313_v16 = vld [vmem:[#allocation6_spill] sm:$0xff] }
 0x364   :  { %3240 = vrot.lane.b32.xlu0 %v6299_v1, %s4154_s0  ;;  %4027 = vpow2.f32 %v1945_v50 }
 0x365   :  { %3234 = vrot.lane.b32.xlu1 %v6298_v40, %s4154_s0  ;;  %v1303_v28 = vmul.f32 1.442695, %v1282_v33  ;;  %v4024_v59 = vpop.eup %4023  ;;  %v6314_v33 = vld [vmem:[#allocation59_spill] sm:$0xff] }
 0x366   :  { %v5503_v7 = vmul.f32 %v4024_v59, %v6306_v2  ;;  %v6317_v59 = vld [vmem:[#allocation16_spill] sm:$0xff] }
 0x367   :  { %v1220_v11 = vpop.permute.xlu0 %1219  ;;  %4029 = vpow2.f32 %v1303_v28 }
 0x368   :  { %v1281_v48 = vsub.f32 %v6302_v39, %v1220_v11  ;;  %1531 = vperm.xlu0 %3939, %v5489_v56   ;;  %v1235_v45 = vpop.permute.xlu1 %1234  ;;  %v6315_v11 = vld [vmem:[#allocation28_spill] sm:$0xff] }
 0x369   :  { %2284 = vperm.xlu1 %3940, %v5487_v38   ;;  %v1284_v22 = vsub.f32 %v6304_v52, %v1235_v45 }
 0x36a   :  { %v1301_v26 = vmul.f32 1.442695, %v1281_v48 }
 0x36b   :  { %v5500_v62 = vpop.permute.xlu0 %1971  ;;  %v1307_v24 = vmul.f32 1.442695, %v1284_v22  ;;  %v6318_v22 = vld [vmem:[#allocation14_spill] sm:$0xff] }
 0x36c   :  { %4031 = vpow2.f32 %v1301_v26  ;;  %3236 = vrot.lane.b32.xlu0 %v6305_v61, %s4154_s0  ;;  %v6316_v26 = vld [vmem:[#allocation62_spill] sm:$0xff] }
 0x36d   :  { %1526 = vperm.xlu1 %3940, %v5494_v43   ;;  %v4026_v29 = vpop.eup %4025  ;;  %4033 = vpow2.f32 %v1307_v24  ;;  %v6319_v24 = vld [vmem:[#allocation7_spill] sm:$0xff] }
 0x36e   :  { %v5506_v12 = vmul.f32 %v4026_v29, %v6307_v23  ;;  %v5508_v0 = vpop.eup %4027 }
 0x36f   :  { %6308 = vst [vmem:[#allocation22_spill] sm:$0xff] %v5508_v0 }
 0x370   :  { %2279 = vperm.xlu0 %3939, %v5508_v0   ;;  %v1551_v20 = vpack.c.bf16 %v5503_v7, %v5506_v12 }
 0x371   :  { %3246 = vrot.lane.b32.xlu1 %v6309_v21, %s4154_s0  ;;  %v1230_v25 = vpop.permute.xlu0 %1229  ;;  %v4030_v50 = vpop.eup %4029  ;;  %v6324_v21 = vld [vmem:[#allocation34_spill] sm:$0xff] }
 0x372   :  { %v1283_v14 = vsub.f32 %v6310_v34, %v1230_v25  ;;  %v1245_v58 = vpop.permute.xlu1 %1244  ;;  %3770 = vmatmul.mubr.bf16.vlgmr.msra.gmra.mrb[32].mxu0 %v1551_v20  ;;  %v5534_v29 = vmul.f32 %v4030_v50, %v6318_v22  ;;  %v6320_v20 = vld [vmem:[#allocation60_spill] sm:$0xff] }
 0x373   :  { %3786 = vmatpush3.bf16.msra.mxu0 %v6311_v37  ;;  %v1286_v39 = vsub.f32 %v6315_v11, %v1245_v58  ;;  %v6321_v37 = vld [vmem:[#allocation8_spill] sm:$0xff] }
 0x374   :  { %v1305_v44 = vmul.f32 1.442695, %v1283_v14  ;;  %3787 = vmatprep.subr.bf16.mxu0 %v6313_v16  ;;  %3248 = vrot.lane.b32.xlu0 %v6314_v33, %s4154_s0 }
 0x375   :  { %3242 = vrot.lane.b32.xlu1 %v6312_v53, %s4154_s0  ;;  %v5525_v45 = vpop.permute.xlu0 %1461  ;;  %v1311_v34 = vmul.f32 1.442695, %v1286_v39  ;;  %v6326_v53 = vld [vmem:[#allocation17_spill] sm:$0xff] }
 0x376   :  { %v4032_v28 = vpop.eup %4031  ;;  %4035 = vpow2.f32 %v1305_v44  ;;  %v5523_v48 = vpop.permute.xlu1 %1456  ;;  %v6322_v44 = vld [vmem:[#allocation32_spill] sm:$0xff] }
 0x377   :  { %3788 = vmatpush3.bf16.msra.mxu0 %v6313_v16  ;;  %v5531_v52 = vmul.f32 %v4032_v28, %v6317_v59  ;;  %v6323_v16 = vld [vmem:[#allocation65_spill] sm:$0xff]  ;;  %v4034_v28 = vpop.eup %4033  ;;  %4037 = vpow2.f32 %v1311_v34 }
 0x378   :  { %3789 = vmatprep.subr.bf16.mxu0 %v6319_v24  ;;  %3244 = vrot.lane.b32.xlu0 %v6320_v20, %s4154_s0  ;;  %v5554_v20 = vmul.f32 %v4034_v28, %v6326_v53 }
 0x379   :  { %3250 = vrot.lane.b32.xlu1 %v6316_v26, %s4154_s0  ;;  %v1552_v25 = vpack.c.bf16 %v5534_v29, %v5531_v52 }
 0x37a   :  { %v5541_v14 = vpop.permute.xlu1 %1471 }
 0x37b   :  { %3790 = vmatpush3.bf16.msra.mxu0 %v6319_v24  ;;  %3773 = vmatprep.mubr.bf16.mxu0 %v1552_v25  ;;  %v1240_v58 = vpop.permute.xlu0 %1239  ;;  %v6325_v24 = vld [vmem:[#allocation21_spill] sm:$0xff] }
 0x37c   :  { %3791 = vmatprep.subr.bf16.mxu0 %v6321_v37  ;;  %v1285_v50 = vsub.f32 %v6322_v44, %v1240_v58  ;;  %3252 = vrot.lane.b32.xlu0 %v6323_v16, %s4154_s0  ;;  %v6327_v16 = vld [vmem:[#allocation38_spill] sm:$0xff] }
 0x37e   :  { %v1309_v11 = vmul.f32 1.442695, %v1285_v50  ;;  %v1255_v26 = vpop.permute.xlu1 %1254 }
 0x37f   :  { %3792 = vmatpush3.bf16.msra.mxu0 %v6321_v37  ;;  %v1288_v33 = vsub.f32 %v6324_v21, %v1255_v26  ;;  %v6329_v21 = vld [vmem:[#allocation10_spill] sm:$0xff] }
 0x380   :  { %v4036_v39 = vpop.eup %4035  ;;  %4039 = vpow2.f32 %v1309_v11  ;;  %v2030_v26 = vsub.f32 %v6329_v21, %v5410_v18 }
 0x381   :  { %v5551_v25 = vmul.f32 %v4036_v39, %v6325_v24  ;;  %v1315_v34 = vmul.f32 1.442695, %v1288_v33  ;;  %v4038_v11 = vpop.eup %4037  ;;  %v6330_v39 = vld [vmem:[#allocation9_spill] sm:$0xff] }
 0x382   :  { %v2029_v28 = vsub.f32 %v6330_v39, %v5433_v47  ;;  %v2047_v38 = vmul.f32 1.442695, %v2030_v26  ;;  %v5574_v63 = vmul.f32 %v4038_v11, %v6334_v15  ;;  %v6338_v39 = vld [vmem:[#allocation44_spill] sm:$0xff] }
 0x383   :  { %v1553_v44 = vpack.c.bf16 %v5554_v20, %v5551_v25  ;;  %4041 = vpow2.f32 %v1315_v34 }
 0x384   :  { %v5556_v58 = vpop.permute.xlu1 %1466  ;;  %v2045_v18 = vmul.f32 1.442695, %v2029_v28 }
 0x385   :  { %3774 = vmatmul.mubr.bf16.gmra.mrb[36].mxu0 %v1553_v44  ;;  %v6332_v44 = vld [vmem:[#allocation40_spill] sm:$0xff] }
 0x387   :  { %v1250_v50 = vpop.permute.xlu0 %1249 }
 0x388   :  { %v1287_v37 = vsub.f32 %v6327_v16, %v1250_v50  ;;  %v5561_v3 = vpop.permute.xlu1 %1481  ;;  %v6333_v16 = vld [vmem:[#allocation27_spill] sm:$0xff] }
 0x389   :  { %6328 = vst [vmem:[#allocation11_spill] sm:$0xff] %v5561_v3 }
 0x38a   :  { %v1313_v1 = vmul.f32 1.442695, %v1287_v37  ;;  %v4040_v40 = vpop.eup %4039 }
 0x38b   :  { %v5567_v33 = vpop.permute.xlu0 %1476  ;;  %v5571_v50 = vmul.f32 %v4040_v40, %v6333_v16  ;;  %v6337_v40 = vld [vmem:[#allocation18_spill] sm:$0xff] }
 0x38c   :  { %4043 = vpow2.f32 %v1313_v1  ;;  %v1265_v61 = vpop.permute.xlu1 %1264  ;;  %6331 = vst [vmem:[#allocation13_spill] sm:$0xff] %v5567_v33  ;;  %v6336_v1 = vld [vmem:[#allocation12_spill] sm:$0xff] }
 0x38d   :  { %v1290_v56 = vsub.f32 %v6332_v44, %v1265_v61  ;;  %v1554_v47 = vpack.c.bf16 %v5574_v63, %v5571_v50  ;;  %4045 = vpow2.f32 %v2047_v38  ;;  %v2032_v21 = vsub.f32 %v6336_v1, %v5456_v42  ;;  %v4042_v44 = vpop.eup %4041  ;;  %v6339_v38 = vld [vmem:[#allocation33_spill] sm:$0xff] }
 0x38e   :  { %4047 = vpow2.f32 %v2045_v18  ;;  %v2033_v61 = vsub.f32 %v6337_v40, %v5500_v62  ;;  %v6340_v42 = vld [vmem:[#allocation29_spill] sm:$0xff]  ;;  %v6341_v62 = vld [vmem:[#allocation15_spill] sm:$0xff] }
 0x38f   :  { %v1319_v34 = vmul.f32 1.442695, %v1290_v56  ;;  %3777 = vmatprep.mubr.bf16.mxu0 %v1554_v47  ;;  %v1260_v26 = vpop.permute.xlu0 %1259  ;;  %v2051_v19 = vmul.f32 1.442695, %v2032_v21  ;;  %v5589_v47 = vmul.f32 %v4042_v44, %v6340_v42  ;;  %v2031_v1 = vsub.f32 %v6341_v62, %v5480_v4  ;;  %v6342_v21 = vld [vmem:[#allocation24_spill] sm:$0xff] }
 0x390   :  { %v5578_v37 = vpop.permute.xlu1 %1491  ;;  %v1289_v11 = vsub.f32 %v6338_v39, %v1260_v26  ;;  %v6343_v39 = vld [vmem:[#allocation46_spill] sm:$0xff] }
 0x391   :  { %6335 = vst [vmem:[#allocation26_spill] sm:$0xff] %v5578_v37  ;;  %4049 = vpow2.f32 %v1319_v34  ;;  %v2053_v37 = vmul.f32 1.442695, %v2033_v61 }
 0x392   :  { %v1317_v28 = vmul.f32 1.442695, %v1289_v11 }
 0x393   :  { %v1982_v56 = vpop.permute.xlu0 %1981 }
 0x394   :  { %v1275_v0 = vpop.permute.xlu1 %1274  ;;  %4051 = vpow2.f32 %v1317_v28  ;;  %v2035_v40 = vsub.f32 %v6342_v21, %v1982_v56  ;;  %v2049_v28 = vmul.f32 1.442695, %v2031_v1 }
 0x395   :  { %4053 = vpow2.f32 %v2051_v19  ;;  %v1292_v11 = vsub.f32 %v6343_v39, %v1275_v0 }
 0x396   :  { %v4044_v3 = vpop.eup %4043  ;;  %4055 = vpow2.f32 %v2053_v37  ;;  %v2057_v62 = vmul.f32 1.442695, %v2035_v40  ;;  %v6346_v40 = vld [vmem:[#allocation35_spill] sm:$0xff] }
 0x397   :  { %v5586_v51 = vmul.f32 %v4044_v3, %v6339_v38  ;;  %v2328_v26 = vpop.permute.xlu0 %2327  ;;  %v4046_v61 = vpop.eup %4045  ;;  %v1323_v21 = vmul.f32 1.442695, %v1292_v11  ;;  %4057 = vpow2.f32 %v2049_v28 }
 0x398   :  { %v1977_v18 = vpop.permute.xlu1 %1976  ;;  %3793 = vmatprep.subr.bf16.mxu0 %v2328_v26  ;;  %v4048_v3 = vpop.eup %4047  ;;  %v5605_v56 = vmul.f32 %v4046_v61, %v4656_v49  ;;  %4059 = vpow2.f32 %v2057_v62  ;;  %v6347_v49 = vld [vmem:[#allocation49_spill] sm:$0xff]  ;;  %v6348_v62 = vld [vmem:[#allocation30_spill] sm:$0xff] }
 0x399   :  { %v1555_v34 = vpack.c.bf16 %v5589_v47, %v5586_v51  ;;  %3794 = vmatpush3.bf16.msra.mxu0 %v2328_v26  ;;  %v5602_v37 = vmul.f32 %v4048_v3, %v4661_v55  ;;  %v6344_v26 = vld [vmem:[#allocation19_spill] sm:$0xff]  ;;  %4061 = vpow2.f32 %v1323_v21 }
 0x39a   :  { %v2034_v1 = vsub.f32 %v6344_v26, %v1977_v18 }
 0x39b   :  { %3778 = vmatmul.mubr.bf16.gmra.mrb[40].mxu0 %v1555_v34  ;;  %1373 = vadd.xlane.f32.xlu0 %v5464_v27  ;;  %v5599_v19 = vpop.permute.xlu0 %1486  ;;  %v4050_v4 = vpop.eup %4049 }
 0x39c   :  { %v1987_v44 = vpop.permute.xlu1 %1986  ;;  %v5614_v55 = vmul.f32 %v4050_v4, %v6346_v40  ;;  %v2055_v33 = vmul.f32 1.442695, %v2034_v1 }
 0x39d   :  { %1375 = vadd.xlane.f32.xlu1 %v5467_v8  ;;  %v6345_v8 = vld [vmem:[#allocation39_spill] sm:$0xff] }
 0x39e   :  { %v4052_v34 = vpop.eup %4051 }
 0x39f   :  { %2126 = vadd.xlane.f32.xlu0 %v5602_v37  ;;  %v1270_v27 = vpop.permute.xlu0 %1269  ;;  %v5611_v39 = vmul.f32 %v4052_v34, %v6345_v8  ;;  %v4054_v3 = vpop.eup %4053 }
 0x3a0   :  { %v2330_v0 = vpop.permute.xlu1 %2329  ;;  %v1291_v61 = vsub.f32 %v6347_v49, %v1270_v27  ;;  %v4056_v11 = vpop.eup %4055  ;;  %v5623_v27 = vmul.f32 %v4054_v3, %v6306_v2  ;;  %v6351_v2 = vld [vmem:[#allocation31_spill] sm:$0xff] }
 0x3a1   :  { %2128 = vadd.xlane.f32.xlu1 %v5605_v56  ;;  %3795 = vmatprep.subr.bf16.mxu0 %v2330_v0  ;;  %v1556_v18 = vpack.c.bf16 %v5614_v55, %v5611_v39 }
 0x3a2   :  { %3796 = vmatpush3.bf16.msra.mxu0 %v2330_v0  ;;  %v1321_v28 = vmul.f32 1.442695, %v1291_v61  ;;  %v5626_v0 = vmul.f32 %v4056_v11, %v6317_v59  ;;  %v6349_v61 = vld [vmem:[#allocation25_spill] sm:$0xff] }
 0x3a3   :  { %1379 = vadd.xlane.f32.xlu0 %v5503_v7  ;;  %v1992_v4 = vpop.permute.xlu0 %1991  ;;  %3781 = vmatprep.mubr.bf16.mxu0 %v1556_v18  ;;  %v2036_v1 = vsub.f32 %v6349_v61, %v1987_v44 }
 0x3a4   :  { %v1997_v26 = vpop.permute.xlu1 %1996  ;;  %4063 = vpow2.f32 %v1321_v28  ;;  %v2037_v34 = vsub.f32 %v6348_v62, %v1992_v4  ;;  %v4058_v28 = vpop.eup %4057 }
 0x3a5   :  { %1381 = vadd.xlane.f32.xlu1 %v5531_v52  ;;  %4065 = vpow2.f32 %v2055_v33  ;;  %v6350_v52 = vld [vmem:[#allocation36_spill] sm:$0xff]  ;;  %v4060_v4 = vpop.eup %4059  ;;  %v2038_v3 = vsub.f32 %v6351_v2, %v1997_v26  ;;  %v2059_v59 = vmul.f32 1.442695, %v2036_v1 }
 0x3a6   :  { %v2061_v49 = vmul.f32 1.442695, %v2037_v34  ;;  %v4062_v44 = vpop.eup %4061  ;;  %v2079_v34 = vmul.f32 %v4058_v28, %v6307_v23  ;;  %v6354_v23 = vld [vmem:[#allocation42_spill] sm:$0xff] }
 0x3a7   :  { %2132 = vadd.xlane.f32.xlu0 %v5623_v27  ;;  %v2002_v7 = vpop.permute.xlu0 %2001 }
 0x3a8   :  { %v2007_v21 = vpop.permute.xlu1 %2006  ;;  %4067 = vpow2.f32 %v2061_v49  ;;  %v2039_v18 = vsub.f32 %v6350_v52, %v2002_v7  ;;  %v5637_v49 = vmul.f32 %v4060_v4, %v6325_v24  ;;  %v2063_v7 = vmul.f32 1.442695, %v2038_v3  ;;  %v6353_v52 = vld [vmem:[#allocation41_spill] sm:$0xff] }
 0x3a9   :  { %2134 = vadd.xlane.f32.xlu1 %v5626_v0  ;;  %4069 = vpow2.f32 %v2059_v59  ;;  %v6355_v4 = vld [vmem:[#allocation37_spill] sm:$0xff] }
 0x3aa   :  { %v2065_v11 = vmul.f32 1.442695, %v2039_v18  ;;  %v5644_v18 = vmul.f32 %v4062_v44, %v6353_v52  ;;  %v2040_v2 = vsub.f32 %v6355_v4, %v2007_v21 }
 0x3ab   :  { %1377 = vadd.xlane.f32.xlu0 %v5506_v12  ;;  %v2332_v33 = vpop.permute.xlu0 %2331 }
 0x3ac   :  { %v2334_v62 = vpop.permute.xlu1 %2333  ;;  %3797 = vmatprep.subr.bf16.mxu0 %v2332_v33  ;;  %4071 = vpow2.f32 %v2065_v11  ;;  %v2303_v11 = vpack.c.bf16 %v5605_v56, %v5602_v37  ;;  %v2067_v21 = vmul.f32 1.442695, %v2040_v2  ;;  %v2304_v37 = vpack.c.bf16 %v5623_v27, %v2079_v34  ;;  %v6357_v56 = vld [vmem:[#allocation48_spill] sm:$0xff] }
 0x3ad   :  { %1385 = vadd.xlane.f32.xlu1 %v5551_v25  ;;  %3798 = vmatpush3.bf16.msra.mxu0 %v2332_v33  ;;  %v6352_v25 = vld [vmem:[#allocation45_spill] sm:$0xff]  ;;  %4073 = vpow2.f32 %v2063_v7  ;;  %v6356_v33 = vld [vmem:[#allocation43_spill] sm:$0xff] }
 0x3ae   :  { %v4064_v61 = vpop.eup %4063  ;;  %3799 = vmatprep.subr.bf16.mxu0 %v2334_v62 }
 0x3af   :  { %2130 = vadd.xlane.f32.xlu0 %v2079_v34  ;;  %v2012_v12 = vpop.permute.xlu0 %2011  ;;  %v5641_v1 = vmul.f32 %v4064_v61, %v6352_v25  ;;  %v4066_v24 = vpop.eup %4065 }
 0x3b0   :  { %v2017_v26 = vpop.permute.xlu1 %2016  ;;  %v2041_v28 = vsub.f32 %v6354_v23, %v2012_v12 }
 0x3b1   :  { %2138 = vadd.xlane.f32.xlu1 %v5637_v49  ;;  %3800 = vmatpush3.bf16.msra.mxu0 %v2334_v62  ;;  %v1557_v3 = vpack.c.bf16 %v5644_v18, %v5641_v1  ;;  %v2042_v43 = vsub.f32 %v6356_v33, %v2017_v26  ;;  %v2082_v62 = vmul.f32 %v4066_v24, %v6318_v22 }
 0x3b2   :  { %v4068_v59 = vpop.eup %4067  ;;  %v2069_v61 = vmul.f32 1.442695, %v2041_v28 }
 0x3b3   :  { %1383 = vadd.xlane.f32.xlu0 %v5534_v29  ;;  %v5653_v44 = vpop.permute.xlu0 %2214  ;;  %3782 = vmatmul.mubr.bf16.gmra.mrb[44].mxu0 %v1557_v3  ;;  %v2085_v12 = vmul.f32 %v4068_v59, %v6333_v16  ;;  %v2071_v7 = vmul.f32 1.442695, %v2042_v43  ;;  %v2305_v43 = vpack.c.bf16 %v2082_v62, %v5626_v0 }
 0x3b4   :  { %3801 = vmatprep.mubr.bf16.mxu0 %v2303_v11  ;;  %v2027_v23 = vpop.permute.xlu1 %2026  ;;  %4075 = vpow2.f32 %v2069_v61 }
 0x3b5   :  { %1389 = vadd.xlane.f32.xlu1 %v5571_v50  ;;  %v4070_v50 = vpop.eup %4069  ;;  %4077 = vpow2.f32 %v2067_v21  ;;  %v2044_v28 = vsub.f32 %v6357_v56, %v2027_v23 }
 0x3b6   :  { %v4072_v26 = vpop.eup %4071  ;;  %4079 = vpow2.f32 %v2071_v7  ;;  %v2084_v24 = vmul.f32 %v4070_v50, %v6326_v53 }
 0x3b7   :  { %2136 = vadd.xlane.f32.xlu0 %v2082_v62  ;;  %v5659_v29 = vpop.permute.xlu0 %2229  ;;  %v4074_v16 = vpop.eup %4073  ;;  %v2087_v4 = vmul.f32 %v4072_v26, %v6339_v38  ;;  %v2075_v2 = vmul.f32 1.442695, %v2044_v28 }
 0x3b8   :  { %v2086_v34 = vmul.f32 %v4074_v16, %v6334_v15  ;;  %v2306_v0 = vpack.c.bf16 %v2084_v24, %v5637_v49  ;;  %v5675_v11 = vpop.permute.xlu1 %2209 }
 0x3b9   :  { %2142 = vadd.xlane.f32.xlu1 %v2085_v12  ;;  %4081 = vpow2.f32 %v2075_v2 }
 0x3ba   :  { %v2307_v53 = vpack.c.bf16 %v2086_v34, %v2085_v12 }
 0x3bb   :  { %1387 = vadd.xlane.f32.xlu0 %v5554_v20  ;;  %v5665_v22 = vpop.permute.xlu0 %2239  ;;  %3802 = vmatmul.mubr.bf16.vlgmr.msra.gmra.mrb[48].mxu0 %v2304_v37  ;;  %v6358_v20 = vld [vmem:[#allocation47_spill] sm:$0xff] }
 0x3bc   :  { %3805 = vmatprep.mubr.bf16.mxu0 %v2305_v43  ;;  %v5680_v21 = vpop.permute.xlu1 %2219 }
 0x3bd   :  { %1393 = vadd.xlane.f32.xlu1 %v5586_v51 }
 0x3be   :  { %v4076_v51 = vpop.eup %4075 }
 0x3bf   :  { %2140 = vadd.xlane.f32.xlu0 %v2084_v24  ;;  %v2022_v27 = vpop.permute.xlu0 %2021  ;;  %v4078_v33 = vpop.eup %4077  ;;  %v2089_v15 = vmul.f32 %v4076_v51, %v6345_v8 }
 0x3c0   :  { %v2043_v3 = vsub.f32 %v6358_v20, %v2022_v27  ;;  %v4080_v38 = vpop.eup %4079  ;;  %v2088_v61 = vmul.f32 %v4078_v33, %v6340_v42  ;;  %v5686_v7 = vpop.permute.xlu1 %2224 }
 0x3c1   :  { %2146 = vadd.xlane.f32.xlu1 %v2087_v4  ;;  %v2090_v49 = vmul.f32 %v4080_v38, %v6346_v40 }
 0x3c2   :  { %v2073_v59 = vmul.f32 1.442695, %v2043_v3 }
 0x3c3   :  { %1391 = vadd.xlane.f32.xlu0 %v5574_v63  ;;  %3806 = vmatmul.mubr.bf16.gmra.mrb[52].mxu0 %v2306_v0  ;;  %v2308_v63 = vpack.c.bf16 %v2088_v61, %v2087_v4  ;;  %v4082_v62 = vpop.eup %4081  ;;  %v5688_v40 = vpop.permute.xlu0 %3199 }
 0x3c4   :  { %4083 = vpow2.f32 %v2073_v59  ;;  %3809 = vmatprep.mubr.bf16.mxu0 %v2307_v53  ;;  %v2092_v42 = vmul.f32 %v4082_v62, %v6353_v52  ;;  %6359 = vst [vmem:[#allocation5_spill] sm:$0xff] %v5688_v40  ;;  %v2095_v40 = vld [vmem:[#allocation3 + $0x88] sm:$0xff] }
 0x3c5   :  { %1397 = vadd.xlane.f32.xlu1 %v5611_v39  ;;  %v2309_v39 = vpack.c.bf16 %v2090_v49, %v2089_v15 }
 0x3c7   :  { %2144 = vadd.xlane.f32.xlu0 %v2086_v34 }
 0x3c9   :  { %2150 = vadd.xlane.f32.xlu1 %v2089_v15 }
 0x3cb   :  { %1395 = vadd.xlane.f32.xlu0 %v5589_v47  ;;  %3810 = vmatmul.mubr.bf16.gmra.mrb[56].mxu0 %v2308_v63  ;;  %v5691_v47 = vpop.permute.xlu1 %2234 }
 0x3cc   :  { %3813 = vmatprep.mubr.bf16.mxu0 %v2309_v39 }
 0x3cd   :  { %1401 = vadd.xlane.f32.xlu1 %v5641_v1  ;;  %v5693_v1 = vpop.permute.xlu0 %1496 }
 0x3ce   :  { %v4084_v12 = vpop.eup %4083 }
 0x3cf   :  { %2148 = vadd.xlane.f32.xlu0 %v2088_v61  ;;  %v2091_v8 = vmul.f32 %v4084_v12, %v6352_v25  ;;  %v5696_v50 = vpop.permute.xlu1 %2244  ;;  %v1342_v12 = vld [vmem:[#allocation3 + $0x8] sm:$0xff] }
 0x3d1   :  { %2154 = vadd.xlane.f32.xlu1 %v2091_v8  ;;  %v2310_v23 = vpack.c.bf16 %v2092_v42, %v2091_v8  ;;  %v5698_v25 = vpop.permute.xlu0 %2249  ;;  %v1341_v8 = vld [vmem:[#allocation3] sm:$0xff] }
 0x3d3   :  { %1399 = vadd.xlane.f32.xlu0 %v5614_v55  ;;  %3814 = vmatmul.mubr.bf16.gmra.mrb[60].mxu0 %v2310_v23  ;;  %v5700_v52 = vpop.permute.xlu1 %1501 }
 0x3d5   :  { %v5702_v26 = vpop.permute.xlu0 %1506 }
 0x3d7   :  { %2152 = vadd.xlane.f32.xlu0 %v2090_v49  ;;  %v5704_v37 = vpop.permute.xlu1 %2254 }
 0x3d9   :  { %v5706_v55 = vpop.permute.xlu0 %2259 }
 0x3db   :  { %1403 = vadd.xlane.f32.xlu0 %v5644_v18  ;;  %v5708_v56 = vpop.permute.xlu1 %1511 }
 0x3dd   :  { %v5710_v28 = vpop.permute.xlu0 %1521 }
 0x3df   :  { %2156 = vadd.xlane.f32.xlu0 %v2092_v42  ;;  %v5712_v43 = vpop.permute.xlu1 %2264  ;;  %v6373_v42 = vld [vmem:[#allocation54_spill] sm:$0xff] }
 0x3e0   :  { %v1358_v23 = vmul.f32 %v6373_v42, %v1342_v12  ;;  %v1344_v12 = vld [vmem:[#allocation3 + $0x18] sm:$0xff] }
 0x3e1   :  { %v5714_v18 = vpop.permute.xlu0 %1516 }
 0x3e3   :  { %v5716_v16 = vpop.permute.xlu1 %2274 }
 0x3e4   :  { %6360 = vst [vmem:[#allocation6_spill] sm:$0xff] %v5716_v16 }
 0x3e5   :  { %v5718_v24 = vpop.permute.xlu0 %2269 }
 0x3e6   :  { %6361 = vst [vmem:[#allocation28_spill] sm:$0xff] %v5718_v24 }
 0x3e7   :  { %v5720_v4 = vpop.permute.xlu1 %3238 }
 0x3e8   :  { %6362 = vst [vmem:[#allocation16_spill] sm:$0xff] %v5720_v4  ;;  %v6374_v4 = vld [vmem:[#allocation55_spill] sm:$0xff] }
 0x3e9   :  { %v5722_v2 = vpop.permute.xlu0 %3240 }
 0x3ea   :  { %6363 = vst [vmem:[#allocation14_spill] sm:$0xff] %v5722_v2  ;;  %v1357_v2 = vmul.f32 %v6374_v4, %v1341_v8 }
 0x3eb   :  { %v5724_v27 = vpop.permute.xlu1 %3234 }
 0x3ec   :  { %6364 = vst [vmem:[#allocation7_spill] sm:$0xff] %v5724_v27 }
 0x3ed   :  { %v5726_v34 = vpop.permute.xlu0 %1531 }
 0x3ef   :  { %v5728_v20 = vpop.permute.xlu1 %2284 }
 0x3f0   :  { %6365 = vst [vmem:[#allocation8_spill] sm:$0xff] %v5728_v20  ;;  %v1345_v20 = vld [vmem:[#allocation3 + $0x20] sm:$0xff] }
 0x3f1   :  { %v5730_v3 = vpop.permute.xlu0 %3236 }
 0x3f2   :  { %6366 = vst [vmem:[#allocation32_spill] sm:$0xff] %v5730_v3 }
 0x3f3   :  { %v5740_v53 = vpop.permute.xlu1 %1526 }
 0x3f5   :  { %v5742_v38 = vpop.permute.xlu0 %2279 }
 0x3f6   :  { %v5732_v51 = vpop.f32.mrb[48].mxu1 }
 0x3f7   :  { %v5734_v59 = vpop.f32.mrb[49].mxu1  ;;  %v5744_v15 = vpop.permute.xlu1 %3246 }
 0x3f8   :  { %v5736_v0 = vpop.f32.mrb[50].mxu1  ;;  %6367 = vst [vmem:[#allocation34_spill] sm:$0xff] %v5744_v15  ;;  %v2094_v15 = vld [vmem:[#allocation3 + $0x80] sm:$0xff] }
 0x3f9   :  { %v5738_v33 = vpop.f32.mrb[51].mxu1  ;;  %v5746_v61 = vpop.permute.xlu0 %3248 }
 0x3fa   :  { %6368 = vst [vmem:[#allocation21_spill] sm:$0xff] %v5746_v61 }
 0x3fb   :  { %v5748_v49 = vpop.permute.xlu1 %3242 }
 0x3fc   :  { %6369 = vst [vmem:[#allocation17_spill] sm:$0xff] %v5748_v49 }
 0x3fd   :  { %v5750_v63 = vpop.permute.xlu0 %3244 }
 0x3fe   :  { %6370 = vst [vmem:[#allocation38_spill] sm:$0xff] %v5750_v63 }
 0x3ff   :  { %v5752_v39 = vpop.permute.xlu1 %3250 }
 0x400   :  { %6371 = vst [vmem:[#allocation10_spill] sm:$0xff] %v5752_v39  ;;  %v2111_v39 = vmul.f32 %v5337_v13, %v2095_v40  ;;  %v2097_v13 = vld [vmem:[#allocation3 + $0x98] sm:$0xff] }
 0x401   :  { %v5754_v62 = vpop.permute.xlu0 %3252 }
 0x402   :  { %6372 = vst [vmem:[#allocation9_spill] sm:$0xff] %v5754_v62  ;;  %v2110_v62 = vmul.f32 %v5346_v30, %v2094_v15 }
 0x428   :  { %v1374_v3 = vpop.xlane.xlu0 %1373 }
 0x429   :  { %v1405_v61 = vadd.f32 %v1374_v3, %v1357_v2  ;;  %v6376_v3 = vld [vmem:[#allocation58_spill] sm:$0xff] }
 0x42a   :  { %v1376_v27 = vpop.xlane.xlu1 %1375 }
 0x42b   :  { %v1406_v16 = vadd.f32 %v1376_v27, %v1358_v23  ;;  %1422 = vst.msk [vmem:[#allocation3] sm:$0xff] %vm43_vm6, %v1405_v61  ;;  %v6375_v27 = vld [vmem:[#allocation67_spill] sm:$0xff]  ;;  %v2098_v23 = vld [vmem:[#allocation3 + $0xa0] sm:$0xff] }
 0x42c   :  { %v2127_v63 = vpop.xlane.xlu0 %2126  ;;  %v1361_v2 = vmul.f32 %v6375_v27, %v1345_v20 }
 0x42d   :  { %1423 = vst.msk [vmem:[#allocation3 + $0x8] sm:$0xff] %vm43_vm6, %v1406_v16  ;;  %v2158_v4 = vadd.f32 %v2127_v63, %v2110_v62  ;;  %v1360_v16 = vmul.f32 %v6376_v3, %v1344_v12  ;;  %v2113_v63 = vmul.f32 %v5375_v31, %v2097_v13  ;;  %v1347_v62 = vld [vmem:[#allocation3 + $0x30] sm:$0xff]  ;;  %v6377_v3 = vld [vmem:[#allocation69_spill] sm:$0xff] }
 0x42e   :  { %v2129_v49 = vpop.xlane.xlu1 %2128  ;;  %v1343_v12 = vld [vmem:[#allocation3 + $0x10] sm:$0xff] }
 0x42f   :  { %v2159_v42 = vadd.f32 %v2129_v49, %v2111_v39  ;;  %2174 = vst.msk [vmem:[#allocation3 + $0x80] sm:$0xff] %vm43_vm6, %v2158_v4  ;;  %v2114_v49 = vmul.f32 %v5348_v36, %v2098_v23  ;;  %v2096_v23 = vld [vmem:[#allocation3 + $0x90] sm:$0xff] }
 0x430   :  { %v1380_v61 = vpop.xlane.xlu0 %1379 }
 0x431   :  { %2175 = vst.msk [vmem:[#allocation3 + $0x88] sm:$0xff] %vm43_vm6, %v2159_v42  ;;  %v1408_v30 = vadd.f32 %v1380_v61, %v1360_v16  ;;  %v1363_v16 = vmul.f32 %v6377_v3, %v1347_v62  ;;  %v2100_v61 = vld [vmem:[#allocation3 + $0xb0] sm:$0xff]  ;;  %v1346_v62 = vld [vmem:[#allocation3 + $0x28] sm:$0xff] }
 0x432   :  { %v1382_v8 = vpop.xlane.xlu1 %1381  ;;  %v2850_v24 = vld [vmem:[#allocation3] sm:$0xff]  ;;  %v6379_v3 = vld [vmem:[#allocation66_spill] sm:$0xff] }
 0x433   :  { %v1409_v40 = vadd.f32 %v1382_v8, %v1361_v2  ;;  %1425 = vst.msk [vmem:[#allocation3 + $0x18] sm:$0xff] %vm43_vm6, %v1408_v30  ;;  %v6378_v8 = vld [vmem:[#allocation63_spill] sm:$0xff] }
 0x434   :  { %v2851_v15 = vld [vmem:[#allocation3 + $0x8] sm:$0xff]  ;;  %v2133_v39 = vpop.xlane.xlu0 %2132  ;;  %v1359_v36 = vmul.f32 %v6378_v8, %v1343_v12 }
 0x435   :  { %4085 = vrcp.f32 %v2851_v15  ;;  %1426 = vst.msk [vmem:[#allocation3 + $0x20] sm:$0xff] %vm43_vm6, %v1409_v40  ;;  %v2161_v4 = vadd.f32 %v2133_v39, %v2113_v63  ;;  %v2116_v15 = vmul.f32 %v5363_v17, %v2100_v61  ;;  %v1349_v39 = vld [vmem:[#allocation3 + $0x40] sm:$0xff]  ;;  %v1440_v61 = vld [vmem:[#allocation4 + $0x10] sm:$0xff] }
 0x436   :  { %4087 = vrcp.f32 %v2850_v24  ;;  %v2135_v20 = vpop.xlane.xlu1 %2134  ;;  %v3049_v2 = vld [vmem:[#allocation3 + $0x80] sm:$0xff]  ;;  %v1365_v17 = vmul.f32 %v5397_v32, %v1349_v39  ;;  %v1536_v39 = vmul.f32 %v5556_v58, %v1440_v61 }
 0x437   :  { %v2162_v42 = vadd.f32 %v2135_v20, %v2114_v49  ;;  %2177 = vst.msk [vmem:[#allocation3 + $0x98] sm:$0xff] %vm43_vm6, %v2161_v4  ;;  %v2112_v49 = vmul.f32 %v5361_v46, %v2096_v23  ;;  %v1362_v46 = vmul.f32 %v6379_v3, %v1346_v62  ;;  %v1348_v3 = vld [vmem:[#allocation3 + $0x38] sm:$0xff] }
 0x438   :  { %v3050_v27 = vld [vmem:[#allocation3 + $0x88] sm:$0xff]  ;;  %v1378_v24 = vpop.xlane.xlu0 %1377 }
 0x439   :  { %4089 = vrcp.f32 %v3050_v27  ;;  %2178 = vst.msk [vmem:[#allocation3 + $0xa0] sm:$0xff] %vm43_vm6, %v2162_v42  ;;  %v1407_v40 = vadd.f32 %v1378_v24, %v1359_v36  ;;  %v2102_v36 = vld [vmem:[#allocation3 + $0xc0] sm:$0xff] }
 0x43a   :  { %4091 = vrcp.f32 %v3049_v2  ;;  %v1386_v31 = vpop.xlane.xlu1 %1385  ;;  %v2853_v30 = vld [vmem:[#allocation3 + $0x18] sm:$0xff]  ;;  %v2118_v32 = vmul.f32 %v5414_v6, %v2102_v36 }
 0x43b   :  { %v1411_v13 = vadd.f32 %v1386_v31, %v1363_v16  ;;  %1424 = vst.msk [vmem:[#allocation3 + $0x10] sm:$0xff] %vm43_vm6, %v1407_v40  ;;  %4093 = vrcp.f32 %v2853_v30  ;;  %v2099_v31 = vld [vmem:[#allocation3 + $0xa8] sm:$0xff]  ;;  %v1438_v30 = vld [vmem:[#allocation4] sm:$0xff] }
 0x43c   :  { %v2131_v20 = vpop.xlane.xlu0 %2130 }
 0x43d   :  { %1428 = vst.msk [vmem:[#allocation3 + $0x30] sm:$0xff] %vm43_vm6, %v1411_v13  ;;  %v2160_v4 = vadd.f32 %v2131_v20, %v2112_v49  ;;  %v1441_v49 = vld [vmem:[#allocation4 + $0x18] sm:$0xff]  ;;  %v1439_v20 = vld [vmem:[#allocation4 + $0x8] sm:$0xff] }
 0x43e   :  { %v2139_v63 = vpop.xlane.xlu1 %2138  ;;  %v3052_v2 = vld [vmem:[#allocation3 + $0x98] sm:$0xff] }
 0x43f   :  { %v4086_v12 = vpop.eup %4085  ;;  %v2164_v42 = vadd.f32 %v2139_v63, %v2116_v15  ;;  %2176 = vst.msk [vmem:[#allocation3 + $0x90] sm:$0xff] %vm43_vm6, %v2160_v4  ;;  %4095 = vrcp.f32 %v3052_v2  ;;  %v2115_v63 = vmul.f32 %v5385_v54, %v2099_v31  ;;  %v1534_v4 = vmul.f32 %v5523_v48, %v1438_v30  ;;  %v2104_v30 = vld [vmem:[#allocation3 + $0xd0] sm:$0xff] }
 0x440   :  { %v4088_v27 = vpop.eup %4087  ;;  %2905 = vperm.xlu1 %3940, %v4086_v12   ;;  %v1384_v8 = vpop.xlane.xlu0 %1383  ;;  %v1535_v54 = vmul.f32 %v5525_v45, %v1439_v20 }
 0x441   :  { %2180 = vst.msk [vmem:[#allocation3 + $0xb0] sm:$0xff] %vm43_vm6, %v2164_v42  ;;  %2900 = vperm.xlu0 %3939, %v4088_v27   ;;  %v1410_v13 = vadd.f32 %v1384_v8, %v1362_v46  ;;  %v1351_v42 = vld [vmem:[#allocation3 + $0x50] sm:$0xff] }
 0x442   :  { %v1390_v16 = vpop.xlane.xlu1 %1389  ;;  %v2852_v15 = vld [vmem:[#allocation3 + $0x10] sm:$0xff]  ;;  %v1367_v48 = vmul.f32 %v5423_v9, %v1351_v42 }
 0x443   :  { %v4090_v24 = vpop.eup %4089  ;;  %v1413_v23 = vadd.f32 %v1390_v16, %v1365_v17  ;;  %1427 = vst.msk [vmem:[#allocation3 + $0x28] sm:$0xff] %vm43_vm6, %v1410_v13  ;;  %4097 = vrcp.f32 %v2852_v15  ;;  %v1537_v16 = vmul.f32 %v5541_v14, %v1441_v49  ;;  %v6380_v13 = vld [vmem:[#allocation68_spill] sm:$0xff] }
 0x444   :  { %v4092_v40 = vpop.eup %4091  ;;  %3104 = vperm.xlu1 %3940, %v4090_v24   ;;  %v2137_v12 = vpop.xlane.xlu0 %2136  ;;  %v2854_v24 = vld [vmem:[#allocation3 + $0x20] sm:$0xff] }
 0x445   :  { %1430 = vst.msk [vmem:[#allocation3 + $0x40] sm:$0xff] %vm43_vm6, %v1413_v23  ;;  %3099 = vperm.xlu0 %3939, %v4092_v40   ;;  %v2163_v2 = vadd.f32 %v2137_v12, %v2115_v63  ;;  %v3771_v17 = vpop.f32.mrb[32].mxu0  ;;  %v4094_v46 = vpop.eup %4093  ;;  %v1364_v40 = vmul.f32 %v6380_v13, %v1348_v3 }
 0x446   :  { %v2143_v62 = vpop.xlane.xlu1 %2142  ;;  %v3051_v8 = vld [vmem:[#allocation3 + $0x90] sm:$0xff]  ;;  %v1657_v6 = vadd.f32 %v3771_v17, %v1536_v39  ;;  %v1592_v36 = vpop.f32.mrb[33].mxu0  ;;  %v2120_v39 = vmul.f32 %v5435_v60, %v2104_v30  ;;  %v1350_v17 = vld [vmem:[#allocation3 + $0x48] sm:$0xff] }
 0x447   :  { %v2166_v27 = vadd.f32 %v2143_v62, %v2118_v32  ;;  %2179 = vst.msk [vmem:[#allocation3 + $0xa8] sm:$0xff] %vm43_vm6, %v2163_v2  ;;  %v1655_v58 = vadd.f32 %v1592_v36, %v1534_v4  ;;  %v3772_v31 = vpop.f32.mrb[34].mxu0  ;;  %4099 = vrcp.f32 %v3051_v8  ;;  %v2101_v32 = vld [vmem:[#allocation3 + $0xb8] sm:$0xff]  ;;  %v3053_v62 = vld [vmem:[#allocation3 + $0xa0] sm:$0xff]  ;;  %v2856_v8 = vld [vmem:[#allocation3 + $0x30] sm:$0xff] }
 0x448   :  { %2915 = vperm.xlu1 %3940, %v4094_v46   ;;  %1674 = vst.msk [vmem:[#allocation4 + $0x10] sm:$0xff] %vm108_vm8, %v1657_v6  ;;  %v1658_v61 = vadd.f32 %v3772_v31, %v1537_v16  ;;  %v1595_v14 = vpop.f32.mrb[35].mxu0  ;;  %v1388_v49 = vpop.xlane.xlu0 %1387  ;;  %4101 = vrcp.f32 %v2854_v24  ;;  %v2117_v42 = vmul.f32 %v5395_v35, %v2101_v32  ;;  %v1353_v4 = vld [vmem:[#allocation3 + $0x60] sm:$0xff]  ;;  %v1366_v35 = vmul.f32 %v5412_v10, %v1350_v17  ;;  %v2103_v31 = vld [vmem:[#allocation3 + $0xc8] sm:$0xff]  ;;  %v1352_v32 = vld [vmem:[#allocation3 + $0x58] sm:$0xff] }
 0x449   :  { %2182 = vst.msk [vmem:[#allocation3 + $0xc0] sm:$0xff] %vm43_vm6, %v2166_v27  ;;  %v1656_v45 = vadd.f32 %v1595_v14, %v1535_v54  ;;  %v4096_v63 = vpop.eup %4095  ;;  %v1412_v9 = vadd.f32 %v1388_v49, %v1364_v40  ;;  %v1369_v60 = vmul.f32 %v5454_v5, %v1353_v4  ;;  %v2106_v36 = vld [vmem:[#allocation3 + $0xe0] sm:$0xff]  ;;  %v1444_v14 = vld [vmem:[#allocation4 + $0x30] sm:$0xff]  ;;  %v2119_v10 = vmul.f32 %v5421_v57, %v2103_v31 }
 0x44a   :  { %v1394_v23 = vpop.xlane.xlu1 %1393  ;;  %1672 = vst.msk [vmem:[#allocation4] sm:$0xff] %vm108_vm8, %v1655_v58  ;;  %v2855_v20 = vld [vmem:[#allocation3 + $0x28] sm:$0xff]  ;;  %1675 = vst.msk [vmem:[#allocation4 + $0x18] sm:$0xff] %vm108_vm8, %v1658_v61  ;;  %v2122_v5 = vmul.f32 %v5469_v41, %v2106_v36  ;;  %v1355_v40 = vld [vmem:[#allocation3 + $0x70] sm:$0xff]  ;;  %v1540_v41 = vmul.f32 %v5599_v19, %v1444_v14 }
 0x44b   :  { %v1415_v15 = vadd.f32 %v1394_v23, %v1367_v48  ;;  %1673 = vst.msk [vmem:[#allocation4 + $0x8] sm:$0xff] %vm108_vm8, %v1656_v45  ;;  %4103 = vrcp.f32 %v2855_v20  ;;  %v3055_v23 = vld [vmem:[#allocation3 + $0xb0] sm:$0xff]  ;;  %v1442_v45 = vld [vmem:[#allocation4 + $0x20] sm:$0xff]  ;;  %v1445_v20 = vld [vmem:[#allocation4 + $0x38] sm:$0xff] }
 0x44c   :  { %3114 = vperm.xlu1 %3940, %v4096_v63   ;;  %1429 = vst.msk [vmem:[#allocation3 + $0x38] sm:$0xff] %vm43_vm6, %v1412_v9  ;;  %v2141_v2 = vpop.xlane.xlu0 %2140  ;;  %4105 = vrcp.f32 %v3053_v62  ;;  %v6384_v19 = vld [vmem:[#allocation26_spill] sm:$0xff]  ;;  %v6385_v31 = vld [vmem:[#allocation11_spill] sm:$0xff] }
 0x44d   :  { %1432 = vst.msk [vmem:[#allocation3 + $0x50] sm:$0xff] %vm43_vm6, %v1415_v15  ;;  %v4098_v3 = vpop.eup %4097  ;;  %v2165_v16 = vadd.f32 %v2141_v2, %v2117_v42  ;;  %v6382_v42 = vld [vmem:[#allocation13_spill] sm:$0xff]  ;;  %v2108_v14 = vld [vmem:[#allocation3 + $0xf0] sm:$0xff] }
 0x44e   :  { %v2147_v12 = vpop.xlane.xlu1 %2146  ;;  %v3054_v46 = vld [vmem:[#allocation3 + $0xa8] sm:$0xff]  ;;  %2910 = vperm.xlu0 %3939, %v4098_v3   ;;  %v1538_v4 = vmul.f32 %v6382_v42, %v1442_v45  ;;  %v6386_v45 = vld [vmem:[#allocation71_spill] sm:$0xff] }
 0x44f   :  { %v2168_v27 = vadd.f32 %v2147_v12, %v2120_v39  ;;  %4107 = vrcp.f32 %v3054_v46  ;;  %2181 = vst.msk [vmem:[#allocation3 + $0xb8] sm:$0xff] %vm43_vm6, %v2165_v16  ;;  %v1443_v39 = vld [vmem:[#allocation4 + $0x28] sm:$0xff]  ;;  %v6381_v12 = vld [vmem:[#allocation20_spill] sm:$0xff] }
 0x450   :  { %v1392_v58 = vpop.xlane.xlu0 %1391  ;;  %4109 = vrcp.f32 %v2856_v8  ;;  %v1371_v57 = vmul.f32 %v6381_v12, %v1355_v40  ;;  %v6383_v3 = vld [vmem:[#allocation70_spill] sm:$0xff]  ;;  %v3057_v40 = vld [vmem:[#allocation3 + $0xc0] sm:$0xff] }
 0x451   :  { %2184 = vst.msk [vmem:[#allocation3 + $0xd0] sm:$0xff] %vm43_vm6, %v2168_v27  ;;  %v4100_v48 = vpop.eup %4099  ;;  %v1414_v24 = vadd.f32 %v1392_v58, %v1366_v35  ;;  %v2858_v27 = vld [vmem:[#allocation3 + $0x40] sm:$0xff]  ;;  %v1368_v46 = vmul.f32 %v6383_v3, %v1352_v32  ;;  %v2107_v3 = vld [vmem:[#allocation3 + $0xe8] sm:$0xff] }
 0x452   :  { %v1398_v6 = vpop.xlane.xlu1 %1397  ;;  %3109 = vperm.xlu0 %3939, %v4100_v48   ;;  %v4102_v30 = vpop.eup %4101  ;;  %v1539_v48 = vmul.f32 %v6385_v31, %v1443_v39 }
 0x453   :  { %v1417_v54 = vadd.f32 %v1398_v6, %v1369_v60  ;;  %v2857_v61 = vld [vmem:[#allocation3 + $0x38] sm:$0xff]  ;;  %1431 = vst.msk [vmem:[#allocation3 + $0x48] sm:$0xff] %vm43_vm6, %v1414_v24  ;;  %v1541_v60 = vmul.f32 %v6384_v19, %v1445_v20 }
 0x454   :  { %4111 = vrcp.f32 %v2857_v61  ;;  %v2145_v49 = vpop.xlane.xlu0 %2144  ;;  %v2860_v42 = vld [vmem:[#allocation3 + $0x50] sm:$0xff] }
 0x455   :  { %1434 = vst.msk [vmem:[#allocation3 + $0x60] sm:$0xff] %vm43_vm6, %v1417_v54  ;;  %v4104_v63 = vpop.eup %4103  ;;  %v2167_v9 = vadd.f32 %v2145_v49, %v2119_v10  ;;  %4113 = vrcp.f32 %v3055_v23  ;;  %v2105_v54 = vld [vmem:[#allocation3 + $0xd8] sm:$0xff] }
 0x456   :  { %v2151_v13 = vpop.xlane.xlu1 %2150  ;;  %v3056_v62 = vld [vmem:[#allocation3 + $0xb8] sm:$0xff]  ;;  %2920 = vperm.xlu0 %3939, %v4102_v30   ;;  %2925 = vperm.xlu1 %3940, %v4104_v63   ;;  %v4106_v16 = vpop.eup %4105  ;;  %v6387_v63 = vld [vmem:[#allocation22_spill] sm:$0xff] }
 0x457   :  { %v2170_v15 = vadd.f32 %v2151_v13, %v2122_v5  ;;  %4115 = vrcp.f32 %v3056_v62  ;;  %2183 = vst.msk [vmem:[#allocation3 + $0xc8] sm:$0xff] %vm43_vm6, %v2167_v9  ;;  %v2124_v20 = vmul.f32 %v6387_v63, %v2108_v14  ;;  %v1354_v9 = vld [vmem:[#allocation3 + $0x68] sm:$0xff] }
 0x458   :  { %v3775_v2 = vpop.f32.mrb[36].mxu0  ;;  %v1396_v35 = vpop.xlane.xlu0 %1395  ;;  %4117 = vrcp.f32 %v2858_v27 }
 0x459   :  { %2186 = vst.msk [vmem:[#allocation3 + $0xe0] sm:$0xff] %vm43_vm6, %v2170_v15  ;;  %v1661_v8 = vadd.f32 %v3775_v2, %v1540_v41  ;;  %v1608_v36 = vpop.f32.mrb[37].mxu0  ;;  %v4108_v58 = vpop.eup %4107  ;;  %v1416_v24 = vadd.f32 %v1396_v35, %v1368_v46  ;;  %v2121_v15 = vmul.f32 %v6386_v45, %v2105_v54  ;;  %v1356_v54 = vld [vmem:[#allocation3 + $0x78] sm:$0xff] }
 0x45a   :  { %v1402_v17 = vpop.xlane.xlu1 %1401  ;;  %v1659_v61 = vadd.f32 %v1608_v36, %v1538_v4  ;;  %v3776_v5 = vpop.f32.mrb[38].mxu0  ;;  %v2859_v23 = vld [vmem:[#allocation3 + $0x48] sm:$0xff]  ;;  %3119 = vperm.xlu0 %3939, %v4106_v16   ;;  %3124 = vperm.xlu1 %3940, %v4108_v58   ;;  %v6388_v4 = vld [vmem:[#allocation72_spill] sm:$0xff] }
 0x45b   :  { %v1419_v6 = vadd.f32 %v1402_v17, %v1371_v57  ;;  %1678 = vst.msk [vmem:[#allocation4 + $0x30] sm:$0xff] %vm108_vm8, %v1661_v8  ;;  %v1662_v13 = vadd.f32 %v3776_v5, %v1541_v60  ;;  %v1611_v10 = vpop.f32.mrb[39].mxu0  ;;  %4119 = vrcp.f32 %v2859_v23  ;;  %v4110_v49 = vpop.eup %4109  ;;  %v1370_v27 = vmul.f32 %v6388_v4, %v1354_v9  ;;  %v3059_v60 = vld [vmem:[#allocation3 + $0xd0] sm:$0xff]  ;;  %v6389_v8 = vld [vmem:[#allocation73_spill] sm:$0xff]  ;;  %v1449_v45 = vld [vmem:[#allocation4 + $0x58] sm:$0xff] }
 0x45c   :  { %1433 = vst.msk [vmem:[#allocation3 + $0x58] sm:$0xff] %vm43_vm6, %v1416_v24  ;;  %v1660_v30 = vadd.f32 %v1611_v10, %v1539_v48  ;;  %v2149_v32 = vpop.xlane.xlu0 %2148  ;;  %4121 = vrcp.f32 %v3057_v40  ;;  %v1448_v24 = vld [vmem:[#allocation4 + $0x50] sm:$0xff]  ;;  %v2109_v40 = vld [vmem:[#allocation3 + $0xf8] sm:$0xff] }
 0x45d   :  { %1436 = vst.msk [vmem:[#allocation3 + $0x70] sm:$0xff] %vm43_vm6, %v1419_v6  ;;  %v2169_v41 = vadd.f32 %v2149_v32, %v2121_v15  ;;  %v2123_v6 = vmul.f32 %v6389_v8, %v2107_v3  ;;  %v6390_v5 = vld [vmem:[#allocation75_spill] sm:$0xff]  ;;  %v1544_v32 = vmul.f32 %v5702_v26, %v1448_v24 }
 0x45e   :  { %1676 = vst.msk [vmem:[#allocation4 + $0x20] sm:$0xff] %vm108_vm8, %v1659_v61  ;;  %1679 = vst.msk [vmem:[#allocation4 + $0x38] sm:$0xff] %vm108_vm8, %v1662_v13  ;;  %v4112_v39 = vpop.eup %4111  ;;  %v2155_v62 = vpop.xlane.xlu1 %2154  ;;  %v3058_v12 = vld [vmem:[#allocation3 + $0xc8] sm:$0xff]  ;;  %2930 = vperm.xlu0 %3939, %v4110_v49   ;;  %v2862_v61 = vld [vmem:[#allocation3 + $0x60] sm:$0xff]  ;;  %v1372_v14 = vmul.f32 %v6390_v5, %v1356_v54 }
 0x45f   :  { %1677 = vst.msk [vmem:[#allocation4 + $0x28] sm:$0xff] %vm108_vm8, %v1660_v30  ;;  %v2172_v57 = vadd.f32 %v2155_v62, %v2124_v20  ;;  %2935 = vperm.xlu1 %3940, %v4112_v39   ;;  %4123 = vrcp.f32 %v3058_v12  ;;  %v4114_v2 = vpop.eup %4113  ;;  %v1446_v13 = vld [vmem:[#allocation4 + $0x40] sm:$0xff]  ;;  %v1447_v49 = vld [vmem:[#allocation4 + $0x48] sm:$0xff] }
 0x460   :  { %2185 = vst.msk [vmem:[#allocation3 + $0xd8] sm:$0xff] %vm43_vm6, %v2169_v41  ;;  %v1400_v17 = vpop.xlane.xlu0 %1399  ;;  %4125 = vrcp.f32 %v2860_v42  ;;  %v1542_v20 = vmul.f32 %v5693_v1, %v1446_v13  ;;  %v3061_v9 = vld [vmem:[#allocation3 + $0xe0] sm:$0xff]  ;;  %v6391_v41 = vld [vmem:[#allocation74_spill] sm:$0xff] }
 0x461   :  { %2188 = vst.msk [vmem:[#allocation3 + $0xf0] sm:$0xff] %vm43_vm6, %v2172_v57  ;;  %v4116_v46 = vpop.eup %4115  ;;  %v1418_v16 = vadd.f32 %v1400_v17, %v1370_v27  ;;  %v2125_v62 = vmul.f32 %v6391_v41, %v2109_v40  ;;  %v1545_v57 = vmul.f32 %v5708_v56, %v1449_v45  ;;  %v1450_v13 = vld [vmem:[#allocation4 + $0x60] sm:$0xff] }
 0x462   :  { %3129 = vperm.xlu0 %3939, %v4114_v2   ;;  %v4118_v35 = vpop.eup %4117  ;;  %v1543_v2 = vmul.f32 %v5700_v52, %v1447_v49 }
 0x463   :  { %v2861_v19 = vld [vmem:[#allocation3 + $0x58] sm:$0xff]  ;;  %3134 = vperm.xlu1 %3940, %v4116_v46   ;;  %1435 = vst.msk [vmem:[#allocation3 + $0x68] sm:$0xff] %vm43_vm6, %v1418_v16 }
 0x464   :  { %4127 = vrcp.f32 %v2861_v19  ;;  %v2153_v36 = vpop.xlane.xlu0 %2152 }
 0x465   :  { %v4120_v58 = vpop.eup %4119  ;;  %v2171_v31 = vadd.f32 %v2153_v36, %v2123_v6  ;;  %4129 = vrcp.f32 %v3059_v60  ;;  %v2864_v6 = vld [vmem:[#allocation3 + $0x70] sm:$0xff] }
 0x466   :  { %2940 = vperm.xlu0 %3939, %v4118_v35   ;;  %v4122_v23 = vpop.eup %4121 }
 0x467   :  { %v3060_v48 = vld [vmem:[#allocation3 + $0xd8] sm:$0xff]  ;;  %2945 = vperm.xlu1 %3940, %v4120_v58   ;;  %2187 = vst.msk [vmem:[#allocation3 + $0xe8] sm:$0xff] %vm43_vm6, %v2171_v31 }
 0x468   :  { %4131 = vrcp.f32 %v3060_v48  ;;  %v1404_v10 = vpop.xlane.xlu0 %1403  ;;  %v3063_v31 = vld [vmem:[#allocation3 + $0xf0] sm:$0xff] }
 0x469   :  { %v4124_v30 = vpop.eup %4123  ;;  %v1420_v15 = vadd.f32 %v1404_v10, %v1372_v14  ;;  %4133 = vrcp.f32 %v2862_v61  ;;  %v6392_v61 = vld [vmem:[#allocation64_spill] sm:$0xff] }
 0x46a   :  { %v2863_v63 = vld [vmem:[#allocation3 + $0x68] sm:$0xff]  ;;  %3139 = vperm.xlu0 %3939, %v4122_v23   ;;  %v4126_v12 = vpop.eup %4125  ;;  %v1452_v23 = vld [vmem:[#allocation4 + $0x70] sm:$0xff]  ;;  %v1453_v10 = vld [vmem:[#allocation4 + $0x78] sm:$0xff] }
 0x46b   :  { %3144 = vperm.xlu1 %3940, %v4124_v30   ;;  %4135 = vrcp.f32 %v2863_v63  ;;  %1437 = vst.msk [vmem:[#allocation3 + $0x78] sm:$0xff] %vm43_vm6, %v1420_v15  ;;  %v1451_v30 = vld [vmem:[#allocation4 + $0x68] sm:$0xff]  ;;  %v1548_v45 = vmul.f32 %v5740_v53, %v1452_v23  ;;  %v1546_v15 = vmul.f32 %v5714_v18, %v1450_v13  ;;  %v1549_v63 = vmul.f32 %v5726_v34, %v1453_v10  ;;  %v2193_v53 = vld [vmem:[#allocation4 + $0x90] sm:$0xff]  ;;  %v2191_v34 = vld [vmem:[#allocation4 + $0x80] sm:$0xff] }
 0x46c   :  { %v2157_v4 = vpop.xlane.xlu0 %2156  ;;  %4137 = vrcp.f32 %v3061_v9  ;;  %v2199_v23 = vld [vmem:[#allocation4 + $0xc0] sm:$0xff] }
 0x46d   :  { %v2173_v17 = vadd.f32 %v2157_v4, %v2125_v62  ;;  %v2289_v4 = vmul.f32 %v5680_v21, %v2193_v53  ;;  %v6395_v53 = vld [vmem:[#allocation8_spill] sm:$0xff] }
 0x46e   :  { %v3779_v39 = vpop.f32.mrb[40].mxu0  ;;  %v4128_v26 = vpop.eup %4127  ;;  %v3062_v1 = vld [vmem:[#allocation3 + $0xe8] sm:$0xff]  ;;  %2950 = vperm.xlu0 %3939, %v4126_v12  }
 0x46f   :  { %v1665_v42 = vadd.f32 %v3779_v39, %v1544_v32  ;;  %v1624_v27 = vpop.f32.mrb[41].mxu0  ;;  %2955 = vperm.xlu1 %3940, %v4128_v26   ;;  %4139 = vrcp.f32 %v3062_v1  ;;  %2189 = vst.msk [vmem:[#allocation3 + $0xf8] sm:$0xff] %vm43_vm6, %v2173_v17  ;;  %v4130_v60 = vpop.eup %4129  ;;  %v6393_v32 = vld [vmem:[#allocation61_spill] sm:$0xff]  ;;  %v1547_v39 = vmul.f32 %v5710_v28, %v1451_v30  ;;  %v2194_v28 = vld [vmem:[#allocation4 + $0x98] sm:$0xff]  ;;  %vm3362_vm6 = vcmask 261248  }
 0x470   :  { %v1663_v3 = vadd.f32 %v1624_v27, %v1542_v20  ;;  %v3780_v46 = vpop.f32.mrb[42].mxu0  ;;  %v2287_v27 = vmul.f32 %v5675_v11, %v2191_v34  ;;  %v2197_v11 = vld [vmem:[#allocation4 + $0xb0] sm:$0xff] }
 0x471   :  { %1682 = vst.msk [vmem:[#allocation4 + $0x50] sm:$0xff] %vm108_vm8, %v1665_v42  ;;  %v1666_v16 = vadd.f32 %v3780_v46, %v1545_v57  ;;  %v1627_v19 = vpop.f32.mrb[43].mxu0  ;;  %v2192_v42 = vld [vmem:[#allocation4 + $0x88] sm:$0xff] }
 0x472   :  { %1680 = vst.msk [vmem:[#allocation4 + $0x40] sm:$0xff] %vm108_vm8, %v1663_v3  ;;  %v1664_v56 = vadd.f32 %v1627_v19, %v1543_v2  ;;  %v4132_v52 = vpop.eup %4131  ;;  %v2865_v8 = vld [vmem:[#allocation3 + $0x78] sm:$0xff]  ;;  %3149 = vperm.xlu0 %3939, %v4130_v60   ;;  %v2290_v2 = vmul.f32 %v5686_v7, %v2194_v28  ;;  %v2288_v46 = vmul.f32 %v5653_v44, %v2192_v42  ;;  %v2195_v60 = vld [vmem:[#allocation4 + $0xa0] sm:$0xff]  ;;  %v6396_v42 = vld [vmem:[#allocation6_spill] sm:$0xff] }
 0x473   :  { %1683 = vst.msk [vmem:[#allocation4 + $0x58] sm:$0xff] %vm108_vm8, %v1666_v16  ;;  %3154 = vperm.xlu1 %3940, %v4132_v52   ;;  %4141 = vrcp.f32 %v2865_v8  ;;  %v4134_v35 = vpop.eup %4133  ;;  %v2198_v52 = vld [vmem:[#allocation4 + $0xb8] sm:$0xff]  ;;  %v2293_v7 = vmul.f32 %v5665_v22, %v2197_v11  ;;  %v2196_v8 = vld [vmem:[#allocation4 + $0xa8] sm:$0xff]  ;;  %v2291_v44 = vmul.f32 %v5659_v29, %v2195_v60  ;;  %v5899_v11 = vld [vmem:[%s6113_s8] ss:$0 sm:$0xff] }
 0x474   :  { %1681 = vst.msk [vmem:[#allocation4 + $0x48] sm:$0xff] %vm108_vm8, %v1664_v56  ;;  %4143 = vrcp.f32 %v2864_v6  ;;  %v2202_v29 = vld [vmem:[#allocation4 + $0xd8] sm:$0xff] }
 0x475   :  { %v4136_v36 = vpop.eup %4135 }
 0x476   :  { %v3064_v54 = vld [vmem:[#allocation3 + $0xf8] sm:$0xff]  ;;  %2960 = vperm.xlu0 %3939, %v4134_v35   ;;  %v4138_v58 = vpop.eup %4137  ;;  %v2294_v35 = vmul.f32 %v5696_v50, %v2198_v52  ;;  %v2200_v50 = vld [vmem:[#allocation4 + $0xc8] sm:$0xff] }
 0x477   :  { %2965 = vperm.xlu1 %3940, %v4136_v36   ;;  %4145 = vrcp.f32 %v3064_v54 }
 0x478   :  { %4147 = vrcp.f32 %v3063_v31 }
 0x479   :  { %v4140_v48 = vpop.eup %4139 }
 0x47a   :  { %3159 = vperm.xlu0 %3939, %v4138_v58   ;;  %v2292_v58 = vmul.f32 %v5691_v47, %v2196_v8  ;;  %v2295_v47 = vmul.f32 %v5698_v25, %v2199_v23  ;;  %v2206_v25 = vld [vmem:[#allocation4 + $0xf8] sm:$0xff]  ;;  %v6397_v8 = vld [vmem:[#allocation53_spill] sm:$0xff] }
 0x47b   :  { %3164 = vperm.xlu1 %3940, %v4140_v48   ;;  %v2885_v23 = vld [vmem:[#allocation4 + $0x18] sm:$0xff] }
 0x47d   :  { %v4142_v24 = vpop.eup %4141 }
 0x47e   :  { %3256 = vrot.lane.b32.xlu0 %v6392_v61, %s4154_s0  ;;  %v4144_v5 = vpop.eup %4143 }
 0x47f   :  { %2975 = vperm.xlu1 %3940, %v4142_v24  }
 0x481   :  { %v4146_v14 = vpop.eup %4145 }
 0x482   :  { %2970 = vperm.xlu0 %3939, %v4144_v5   ;;  %v4148_v40 = vpop.eup %4147 }
 0x483   :  { %3174 = vperm.xlu1 %3940, %v4146_v14   ;;  %v2201_v14 = vld [vmem:[#allocation4 + $0xd0] sm:$0xff] }
 0x484   :  { %v2297_v13 = vmul.f32 %v5706_v55, %v2201_v14  ;;  %v2203_v55 = vld [vmem:[#allocation4 + $0xe0] sm:$0xff]  ;;  %v6400_v14 = vld [vmem:[#allocation32_spill] sm:$0xff] }
 0x486   :  { %v3783_v49 = vpop.f32.mrb[44].mxu0  ;;  %3169 = vperm.xlu0 %3939, %v4148_v40   ;;  %v2298_v40 = vmul.f32 %v5712_v43, %v2202_v29  ;;  %v2204_v43 = vld [vmem:[#allocation4 + $0xe8] sm:$0xff] }
 0x487   :  { %3254 = vrot.lane.b32.xlu1 %v6393_v32, %s4154_s0  ;;  %v1669_v20 = vadd.f32 %v3783_v49, %v1548_v45  ;;  %v1640_v9 = vpop.f32.mrb[45].mxu0 }
 0x488   :  { %v1667_v41 = vadd.f32 %v1640_v9, %v1546_v15  ;;  %v3784_v62 = vpop.f32.mrb[46].mxu0  ;;  %v2296_v15 = vmul.f32 %v5704_v37, %v2200_v50  ;;  %v6394_v37 = vld [vmem:[#allocation28_spill] sm:$0xff]  ;;  %v6401_v50 = vld [vmem:[#allocation7_spill] sm:$0xff] }
 0x489   :  { %1686 = vst.msk [vmem:[#allocation4 + $0x70] sm:$0xff] %vm108_vm8, %v1669_v20  ;;  %v1670_v12 = vadd.f32 %v3784_v62, %v1549_v63  ;;  %v1643_v57 = vpop.f32.mrb[47].mxu0 }
 0x48a   :  { %1684 = vst.msk [vmem:[#allocation4 + $0x60] sm:$0xff] %vm108_vm8, %v1667_v41  ;;  %v1668_v18 = vadd.f32 %v1643_v57, %v1547_v39  ;;  %3260 = vrot.lane.b32.xlu0 %v5738_v33, %s4154_s0  ;;  %v2205_v39 = vld [vmem:[#allocation4 + $0xf0] sm:$0xff] }
 0x48b   :  { %3258 = vrot.lane.b32.xlu1 %v5734_v59, %s4154_s0  ;;  %1687 = vst.msk [vmem:[#allocation4 + $0x78] sm:$0xff] %vm108_vm8, %v1670_v12  ;;  %v2301_v62 = vmul.f32 %v5742_v38, %v2205_v39  ;;  %v2299_v12 = vmul.f32 %v6394_v37, %v2203_v55  ;;  %v2883_v38 = vld [vmem:[#allocation4 + $0x8] sm:$0xff] }
 0x48c   :  { %1685 = vst.msk [vmem:[#allocation4 + $0x68] sm:$0xff] %vm108_vm8, %v1668_v18  ;;  %v2302_v18 = vmul.f32 %v6395_v53, %v2206_v25  ;;  %v6403_v39 = vld [vmem:[#allocation14_spill] sm:$0xff] }
 0x48d   :  { %v6404_v37 = vld [vmem:[#allocation50_spill] sm:$0xff] }
 0x48e   :  { %v3803_v26 = vpop.f32.mrb[48].mxu0  ;;  %3264 = vrot.lane.b32.xlu0 %v5736_v0, %s4154_s0 }
 0x48f   :  { %3262 = vrot.lane.b32.xlu1 %v5732_v51, %s4154_s0  ;;  %v2442_v17 = vadd.f32 %v3803_v26, %v2289_v4  ;;  %v2377_v3 = vpop.f32.mrb[49].mxu0  ;;  %v2300_v4 = vmul.f32 %v6396_v42, %v2204_v43 }
 0x490   :  { %v2440_v1 = vadd.f32 %v2377_v3, %v2287_v27  ;;  %v3804_v16 = vpop.f32.mrb[50].mxu0 }
 0x491   :  { %2458 = vst.msk [vmem:[#allocation4 + $0x90] sm:$0xff] %vm108_vm8, %v2442_v17  ;;  %v2443_v21 = vadd.f32 %v3804_v16, %v2290_v2  ;;  %v2380_v19 = vpop.f32.mrb[51].mxu0  ;;  %v2882_v16 = vld [vmem:[#allocation4] sm:$0xff] }
 0x492   :  { %2456 = vst.msk [vmem:[#allocation4 + $0x80] sm:$0xff] %vm108_vm8, %v2440_v1  ;;  %v2441_v56 = vadd.f32 %v2380_v19, %v2288_v46 }
 0x493   :  { %2459 = vst.msk [vmem:[#allocation4 + $0x98] sm:$0xff] %vm108_vm8, %v2443_v21 }
 0x494   :  { %2457 = vst.msk [vmem:[#allocation4 + $0x88] sm:$0xff] %vm108_vm8, %v2441_v56 }
 0x496   :  { %v3807_v6 = vpop.f32.mrb[52].mxu0 }
 0x497   :  { %v2446_v36 = vadd.f32 %v3807_v6, %v2293_v7  ;;  %v2393_v54 = vpop.f32.mrb[53].mxu0 }
 0x498   :  { %v2444_v31 = vadd.f32 %v2393_v54, %v2291_v44  ;;  %v3808_v48 = vpop.f32.mrb[54].mxu0  ;;  %v6398_v54 = vld [vmem:[#allocation51_spill] sm:$0xff] }
 0x499   :  { %2462 = vst.msk [vmem:[#allocation4 + $0xb0] sm:$0xff] %vm108_vm8, %v2446_v36  ;;  %v2447_v24 = vadd.f32 %v3808_v48, %v2294_v35  ;;  %v2396_v5 = vpop.f32.mrb[55].mxu0  ;;  %v3081_v35 = vld [vmem:[#allocation4 + $0x80] sm:$0xff]  ;;  %v3083_v43 = vld [vmem:[#allocation4 + $0x90] sm:$0xff] }
 0x49a   :  { %2460 = vst.msk [vmem:[#allocation4 + $0xa0] sm:$0xff] %vm108_vm8, %v2444_v31  ;;  %v2445_v22 = vadd.f32 %v2396_v5, %v2292_v58  ;;  %v6399_v48 = vld [vmem:[#allocation5_spill] sm:$0xff] }
 0x49b   :  { %2463 = vst.msk [vmem:[#allocation4 + $0xb8] sm:$0xff] %vm108_vm8, %v2447_v24  ;;  %v3082_v52 = vld [vmem:[#allocation4 + $0x88] sm:$0xff] }
 0x49c   :  { %2461 = vst.msk [vmem:[#allocation4 + $0xa8] sm:$0xff] %vm108_vm8, %v2445_v22 }
 0x49e   :  { %v3811_v10 = vpop.f32.mrb[56].mxu0 }
 0x49f   :  { %v2450_v30 = vadd.f32 %v3811_v10, %v2297_v13  ;;  %v2409_v45 = vpop.f32.mrb[57].mxu0 }
 0x4a0   :  { %v2448_v49 = vadd.f32 %v2409_v45, %v2295_v47  ;;  %v3812_v63 = vpop.f32.mrb[58].mxu0  ;;  %v6402_v45 = vld [vmem:[#allocation52_spill] sm:$0xff] }
 0x4a1   :  { %2466 = vst.msk [vmem:[#allocation4 + $0xd0] sm:$0xff] %vm108_vm8, %v2450_v30  ;;  %v2451_v20 = vadd.f32 %v3812_v63, %v2298_v40  ;;  %v2412_v9 = vpop.f32.mrb[59].mxu0  ;;  %v3084_v40 = vld [vmem:[#allocation4 + $0x98] sm:$0xff] }
 0x4a2   :  { %2464 = vst.msk [vmem:[#allocation4 + $0xc0] sm:$0xff] %vm108_vm8, %v2448_v49  ;;  %v2449_v41 = vadd.f32 %v2412_v9, %v2296_v15 }
 0x4a3   :  { %2467 = vst.msk [vmem:[#allocation4 + $0xd8] sm:$0xff] %vm108_vm8, %v2451_v20  ;;  %v2884_v20 = vld [vmem:[#allocation4 + $0x10] sm:$0xff] }
 0x4a4   :  { %2465 = vst.msk [vmem:[#allocation4 + $0xc8] sm:$0xff] %vm108_vm8, %v2449_v41 }
 0x4a6   :  { %v3815_v57 = vpop.f32.mrb[60].mxu0 }
 0x4a7   :  { %v2454_v34 = vadd.f32 %v3815_v57, %v2301_v62  ;;  %v2425_v28 = vpop.f32.mrb[61].mxu0 }
 0x4a8   :  { %v2452_v27 = vadd.f32 %v2425_v28, %v2299_v12  ;;  %v3816_v26 = vpop.f32.mrb[62].mxu0  ;;  %v2886_v28 = vld [vmem:[#allocation4 + $0x20] sm:$0xff] }
 0x4a9   :  { %2470 = vst.msk [vmem:[#allocation4 + $0xf0] sm:$0xff] %vm108_vm8, %v2454_v34  ;;  %v2455_v2 = vadd.f32 %v3816_v26, %v2302_v18  ;;  %v2428_v17 = vpop.f32.mrb[63].mxu0  ;;  %v2887_v18 = vld [vmem:[#allocation4 + $0x28] sm:$0xff] }
 0x4aa   :  { %2468 = vst.msk [vmem:[#allocation4 + $0xe0] sm:$0xff] %vm108_vm8, %v2452_v27  ;;  %v2453_v3 = vadd.f32 %v2428_v17, %v2300_v4  ;;  %v6405_v4 = vld [vmem:[#allocation16_spill] sm:$0xff] }
 0x4ab   :  { %2471 = vst.msk [vmem:[#allocation4 + $0xf8] sm:$0xff] %vm108_vm8, %v2455_v2 }
 0x4ac   :  { %2469 = vst.msk [vmem:[#allocation4 + $0xe8] sm:$0xff] %vm108_vm8, %v2453_v3 }
 0x4bf   :  { %v2906_v46 = vpop.permute.xlu1 %2905 }
 0x4c0   :  { %v2979_v1 = vmul.f32 %v2906_v46, %v2883_v38  ;;  %v2901_v21 = vpop.permute.xlu0 %2900  ;;  %v3086_v38 = vld [vmem:[#allocation4 + $0xa8] sm:$0xff] }
 0x4c1   :  { %v2978_v19 = vmul.f32 %v2901_v21, %v2882_v16  ;;  %v6406_v21 = vld [vmem:[#allocation60_spill] sm:$0xff] }
 0x4c2   :  { %v3002_v56 = vadd.f32 %v5899_v11, %v2979_v1  ;;  %v3085_v1 = vld [vmem:[#allocation4 + $0xa0] sm:$0xff] }
 0x4c3   :  { %v3001_v60 = vadd.f32 %v5899_v11, %v2978_v19  ;;  %v3105_v7 = vpop.permute.xlu1 %3104 }
 0x4c4   :  { %v3018_v44 = vadd.f32 %v3002_v56, %v6397_v8  ;;  %v3178_v6 = vmul.f32 %v3105_v7, %v3082_v52  ;;  %v3100_v36 = vpop.permute.xlu0 %3099  ;;  %v6407_v56 = vld [vmem:[#allocation57_spill] sm:$0xff] }
 0x4c5   :  { %v3017_v58 = vadd.f32 %v3001_v60, %v6398_v54  ;;  %v3177_v31 = vmul.f32 %v3100_v36, %v3081_v35  ;;  %v2888_v36 = vld [vmem:[#allocation4 + $0x30] sm:$0xff] }
 0x4c6   :  { %v3203_v24 = vadd.f32 %v6399_v48, %v3178_v6  ;;  %3034 = vst.msk [vmem:[%s6114_s11 + $0x8] sm:$0xff] %vm108_vm8, %v3018_v44  ;;  %v2889_v6 = vld [vmem:[#allocation4 + $0x38] sm:$0xff] }
 0x4c7   :  { %v3202_v5 = vadd.f32 %v6399_v48, %v3177_v31  ;;  %3033 = vst.msk [vmem:[%s6114_s11] sm:$0xff] %vm108_vm8, %v3017_v58  ;;  %v2916_v29 = vpop.permute.xlu1 %2915  ;;  %v6408_v58 = vld [vmem:[#allocation38_spill] sm:$0xff] }
 0x4c8   :  { %v3283_v22 = vadd.f32 %v6400_v14, %v3203_v24  ;;  %v2981_v47 = vmul.f32 %v2916_v29, %v2885_v23  ;;  %v6409_v24 = vld [vmem:[#allocation17_spill] sm:$0xff] }
 0x4c9   :  { %v3282_v13 = vadd.f32 %v6401_v50, %v3202_v5  ;;  %v3088_v50 = vld [vmem:[#allocation4 + $0xb8] sm:$0xff] }
 0x4ca   :  { %3316 = vrot.lane.b32.xlu0 %v3283_v22, %s4157_s27  ;;  %v3004_v10 = vadd.f32 %v5899_v11, %v2981_v47  ;;  %v3087_v47 = vld [vmem:[#allocation4 + $0xb0] sm:$0xff] }
 0x4cb   :  { %3314 = vrot.lane.b32.xlu1 %v3282_v13, %s4157_s27  ;;  %v3115_v30 = vpop.permute.xlu1 %3114 }
 0x4cc   :  { %v3020_v15 = vadd.f32 %v6402_v45, %v3004_v10  ;;  %v3180_v49 = vmul.f32 %v3115_v30, %v3084_v40  ;;  %v6410_v40 = vld [vmem:[#allocation59_spill] sm:$0xff]  ;;  %v6411_v45 = vld [vmem:[#allocation56_spill] sm:$0xff] }
 0x4cd   :  { %v2911_v9 = vpop.permute.xlu0 %2910 }
 0x4ce   :  { %v3205_v63 = vadd.f32 %v6399_v48, %v3180_v49  ;;  %3036 = vst.msk [vmem:[%s6114_s11 + $0x18] sm:$0xff] %vm108_vm8, %v3020_v15  ;;  %v2980_v55 = vmul.f32 %v2911_v9, %v2884_v20 }
 0x4d0   :  { %v3285_v41 = vadd.f32 %v6403_v39, %v3205_v63  ;;  %v3003_v25 = vadd.f32 %v5899_v11, %v2980_v55  ;;  %v2891_v39 = vld [vmem:[#allocation4 + $0x48] sm:$0xff]  ;;  %v2890_v55 = vld [vmem:[#allocation4 + $0x40] sm:$0xff] }
 0x4d1   :  { %v3110_v62 = vpop.permute.xlu0 %3109 }
 0x4d2   :  { %3320 = vrot.lane.b32.xlu0 %v3285_v41, %s4157_s27  ;;  %v3019_v12 = vadd.f32 %v6404_v37, %v3003_v25  ;;  %v3179_v57 = vmul.f32 %v3110_v62, %v3083_v43  ;;  %v6412_v43 = vld [vmem:[#allocation21_spill] sm:$0xff]  ;;  %v6413_v37 = vld [vmem:[#allocation34_spill] sm:$0xff] }
 0x4d4   :  { %v3204_v53 = vadd.f32 %v6399_v48, %v3179_v57  ;;  %3035 = vst.msk [vmem:[%s6114_s11 + $0x10] sm:$0xff] %vm108_vm8, %v3019_v12 }
 0x4d5   :  { %v2926_v34 = vpop.permute.xlu1 %2925  ;;  %v2921_v42 = vpop.permute.xlu0 %2920 }
 0x4d6   :  { %v3284_v27 = vadd.f32 %v6405_v4, %v3204_v53  ;;  %v2983_v26 = vmul.f32 %v2926_v34, %v2887_v18  ;;  %v2982_v2 = vmul.f32 %v2921_v42, %v2886_v28  ;;  %v3090_v28 = vld [vmem:[#allocation4 + $0xc8] sm:$0xff]  ;;  %v3089_v4 = vld [vmem:[#allocation4 + $0xc0] sm:$0xff] }
 0x4d8   :  { %v3006_v17 = vadd.f32 %v5899_v11, %v2983_v26  ;;  %v3005_v3 = vadd.f32 %v5899_v11, %v2982_v2  ;;  %3318 = vrot.lane.b32.xlu1 %v3284_v27, %s4157_s27  ;;  %v6414_v26 = vld [vmem:[#allocation65_spill] sm:$0xff] }
 0x4d9   :  { %v3125_v46 = vpop.permute.xlu1 %3124  ;;  %v3120_v16 = vpop.permute.xlu0 %3119 }
 0x4da   :  { %v3022_v19 = vadd.f32 %v3006_v17, %v6406_v21  ;;  %v3021_v60 = vadd.f32 %v3005_v3, %v6407_v56  ;;  %v3182_v52 = vmul.f32 %v3125_v46, %v3086_v38  ;;  %v3181_v7 = vmul.f32 %v3120_v16, %v3085_v1  ;;  %v6415_v17 = vld [vmem:[#allocation62_spill] sm:$0xff]  ;;  %v2893_v21 = vld [vmem:[#allocation4 + $0x58] sm:$0xff]  ;;  %v2892_v56 = vld [vmem:[#allocation4 + $0x50] sm:$0xff] }
 0x4dc   :  { %v3207_v8 = vadd.f32 %v6399_v48, %v3182_v52  ;;  %v3206_v44 = vadd.f32 %v6399_v48, %v3181_v7  ;;  %3037 = vst.msk [vmem:[%s6114_s11 + $0x20] sm:$0xff] %vm108_vm8, %v3021_v60  ;;  %3038 = vst.msk [vmem:[%s6114_s11 + $0x28] sm:$0xff] %vm108_vm8, %v3022_v19  ;;  %v6416_v52 = vld [vmem:[#allocation9_spill] sm:$0xff] }
 0x4dd   :  { %v2931_v54 = vpop.permute.xlu0 %2930 }
 0x4de   :  { %v2936_v35 = vpop.permute.xlu1 %2935  ;;  %v3287_v31 = vadd.f32 %v6408_v58, %v3207_v8  ;;  %v3286_v5 = vadd.f32 %v6409_v24, %v3206_v44  ;;  %v2984_v22 = vmul.f32 %v2931_v54, %v2888_v36  ;;  %v6417_v8 = vld [vmem:[#allocation10_spill] sm:$0xff] }
 0x4df   :  { %v2985_v14 = vmul.f32 %v2936_v35, %v2889_v6 }
 0x4e0   :  { %v3007_v29 = vadd.f32 %v5899_v11, %v2984_v22  ;;  %3324 = vrot.lane.b32.xlu0 %v3287_v31, %s4157_s27  ;;  %3322 = vrot.lane.b32.xlu1 %v3286_v5, %s4157_s27 }
 0x4e1   :  { %v3008_v23 = vadd.f32 %v5899_v11, %v2985_v14  ;;  %v3130_v10 = vpop.permute.xlu0 %3129  ;;  %v2895_v14 = vld [vmem:[#allocation4 + $0x68] sm:$0xff] }
 0x4e2   :  { %v3135_v13 = vpop.permute.xlu1 %3134  ;;  %v3023_v15 = vadd.f32 %v6411_v45, %v3007_v29  ;;  %v3183_v63 = vmul.f32 %v3130_v10, %v3087_v47  ;;  %v3092_v47 = vld [vmem:[#allocation4 + $0xd8] sm:$0xff] }
 0x4e3   :  { %v3024_v30 = vadd.f32 %v6410_v40, %v3008_v23  ;;  %v3184_v49 = vmul.f32 %v3135_v13, %v3088_v50  ;;  %v2894_v23 = vld [vmem:[#allocation4 + $0x60] sm:$0xff] }
 0x4e4   :  { %v3208_v9 = vadd.f32 %v6399_v48, %v3183_v63  ;;  %3039 = vst.msk [vmem:[%s6114_s11 + $0x30] sm:$0xff] %vm108_vm8, %v3023_v15  ;;  %v2897_v63 = vld [vmem:[#allocation4 + $0x78] sm:$0xff] }
 0x4e5   :  { %v3209_v20 = vadd.f32 %v6399_v48, %v3184_v49  ;;  %3040 = vst.msk [vmem:[%s6114_s11 + $0x38] sm:$0xff] %vm108_vm8, %v3024_v30  ;;  %v2941_v25 = vpop.permute.xlu0 %2940 }
 0x4e6   :  { %v2946_v41 = vpop.permute.xlu1 %2945  ;;  %v3288_v12 = vadd.f32 %v6413_v37, %v3208_v9  ;;  %v2986_v53 = vmul.f32 %v2941_v25, %v2890_v55 }
 0x4e7   :  { %v3289_v62 = vadd.f32 %v6412_v43, %v3209_v20  ;;  %v2987_v57 = vmul.f32 %v2946_v41, %v2891_v39  ;;  %v2896_v43 = vld [vmem:[#allocation4 + $0x70] sm:$0xff] }
 0x4e8   :  { %v3009_v34 = vadd.f32 %v5899_v11, %v2986_v53  ;;  %3326 = vrot.lane.b32.xlu1 %v3288_v12, %s4157_s27  ;;  %v3093_v53 = vld [vmem:[#allocation4 + $0xe0] sm:$0xff] }
 0x4e9   :  { %v3010_v18 = vadd.f32 %v5899_v11, %v2987_v57  ;;  %3328 = vrot.lane.b32.xlu0 %v3289_v62, %s4157_s27  ;;  %v3140_v27 = vpop.permute.xlu0 %3139  ;;  %v3094_v57 = vld [vmem:[#allocation4 + $0xe8] sm:$0xff] }
 0x4ea   :  { %v3145_v42 = vpop.permute.xlu1 %3144  ;;  %v3025_v3 = vadd.f32 %v3009_v34, %v6415_v17  ;;  %v3185_v46 = vmul.f32 %v3140_v27, %v3089_v4  ;;  %v3095_v17 = vld [vmem:[#allocation4 + $0xf0] sm:$0xff] }
 0x4eb   :  { %v3026_v2 = vadd.f32 %v3010_v18, %v6414_v26  ;;  %v3186_v38 = vmul.f32 %v3145_v42, %v3090_v28 }
 0x4ec   :  { %v3210_v16 = vadd.f32 %v6399_v48, %v3185_v46  ;;  %3041 = vst.msk [vmem:[%s6114_s11 + $0x40] sm:$0xff] %vm108_vm8, %v3025_v3 }
 0x4ed   :  { %v3211_v1 = vadd.f32 %v6399_v48, %v3186_v38  ;;  %3042 = vst.msk [vmem:[%s6114_s11 + $0x48] sm:$0xff] %vm108_vm8, %v3026_v2  ;;  %v2951_v60 = vpop.permute.xlu0 %2950 }
 0x4ee   :  { %v2956_v19 = vpop.permute.xlu1 %2955  ;;  %v3290_v44 = vadd.f32 %v6417_v8, %v3210_v16  ;;  %v2988_v35 = vmul.f32 %v2951_v60, %v2892_v56 }
 0x4ef   :  { %v3291_v7 = vadd.f32 %v6416_v52, %v3211_v1  ;;  %v2989_v6 = vmul.f32 %v2956_v19, %v2893_v21 }
 0x4f0   :  { %v3011_v54 = vadd.f32 %v5899_v11, %v2988_v35  ;;  %3330 = vrot.lane.b32.xlu1 %v3290_v44, %s4157_s27 }
 0x4f1   :  { %v3012_v36 = vadd.f32 %v5899_v11, %v2989_v6  ;;  %3332 = vrot.lane.b32.xlu0 %v3291_v7, %s4157_s27  ;;  %v3150_v31 = vpop.permute.xlu0 %3149 }
 0x4f2   :  { %v3155_v58 = vpop.permute.xlu1 %3154  ;;  %v3027_v5 = vadd.f32 %v6393_v32, %v3011_v54 }
 0x4f3   :  { %v3028_v24 = vadd.f32 %v6392_v61, %v3012_v36  ;;  %v3188_v61 = vmul.f32 %v3155_v58, %v3092_v47 }
 0x4f4   :  { %3043 = vst.msk [vmem:[%s6114_s11 + $0x50] sm:$0xff] %vm108_vm8, %v3027_v5 }
 0x4f5   :  { %3044 = vst.msk [vmem:[%s6114_s11 + $0x58] sm:$0xff] %vm108_vm8, %v3028_v24  ;;  %v2961_v29 = vpop.permute.xlu0 %2960  ;;  %v3213_v49 = vadd.f32 %v6399_v48, %v3188_v61 }
 0x4f6   :  { %v2966_v22 = vpop.permute.xlu1 %2965  ;;  %v2990_v13 = vmul.f32 %v2961_v29, %v2894_v23 }
 0x4f7   :  { %v2991_v50 = vmul.f32 %v2966_v22, %v2895_v14 }
 0x4f8   :  { %v3013_v10 = vadd.f32 %v5899_v11, %v2990_v13 }
 0x4f9   :  { %v3014_v32 = vadd.f32 %v5899_v11, %v2991_v50  ;;  %v3160_v30 = vpop.permute.xlu0 %3159 }
 0x4fa   :  { %v3165_v40 = vpop.permute.xlu1 %3164  ;;  %v3029_v15 = vadd.f32 %v3013_v10, %v5734_v59  ;;  %v3189_v34 = vmul.f32 %v3160_v30, %v3093_v53 }
 0x4fb   :  { %v3030_v45 = vadd.f32 %v3014_v32, %v5738_v33  ;;  %v3091_v33 = vld [vmem:[#allocation4 + $0xd0] sm:$0xff]  ;;  %v3190_v18 = vmul.f32 %v3165_v40, %v3094_v57 }
 0x4fc   :  { %3045 = vst.msk [vmem:[%s6114_s11 + $0x60] sm:$0xff] %vm108_vm8, %v3029_v15  ;;  %v3187_v55 = vmul.f32 %v3150_v31, %v3091_v33 }
 0x4fd   :  { %3046 = vst.msk [vmem:[%s6114_s11 + $0x68] sm:$0xff] %vm108_vm8, %v3030_v45  ;;  %v3257_v9 = vpop.permute.xlu0 %3256  ;;  %v3215_v46 = vadd.f32 %v6399_v48, %v3190_v18 }
 0x4fe   :  { %v2976_v20 = vpop.permute.xlu1 %2975  ;;  %v3293_v41 = vadd.f32 %v3257_v9, %v3213_v49  ;;  %v3212_v42 = vadd.f32 %v6399_v48, %v3187_v55 }
 0x4ff   :  { %v2993_v39 = vmul.f32 %v2976_v20, %v2897_v63 }
 0x500   :  { %3336 = vrot.lane.b32.xlu0 %v3293_v41, %s4157_s27 }
 0x501   :  { %v3016_v59 = vadd.f32 %v5899_v11, %v2993_v39  ;;  %v2971_v62 = vpop.permute.xlu0 %2970 }
 0x502   :  { %v3175_v25 = vpop.permute.xlu1 %3174  ;;  %v2992_v12 = vmul.f32 %v2971_v62, %v2896_v43 }
 0x503   :  { %v3032_v37 = vadd.f32 %v5736_v0, %v3016_v59  ;;  %v3096_v0 = vld [vmem:[#allocation4 + $0xf8] sm:$0xff] }
 0x504   :  { %v3015_v28 = vadd.f32 %v5899_v11, %v2992_v12  ;;  %v3192_v3 = vmul.f32 %v3175_v25, %v3096_v0  ;;  %v3214_v11 = vadd.f32 %v6399_v48, %v3189_v34 }
 0x505   :  { %3048 = vst.msk [vmem:[%s6114_s11 + $0x78] sm:$0xff] %vm108_vm8, %v3032_v37  ;;  %v3170_v27 = vpop.permute.xlu0 %3169 }
 0x506   :  { %v3255_v4 = vpop.permute.xlu1 %3254  ;;  %v3031_v26 = vadd.f32 %v5732_v51, %v3015_v28  ;;  %v3191_v38 = vmul.f32 %v3170_v27, %v3095_v17  ;;  %v3217_v56 = vadd.f32 %v6399_v48, %v3192_v3 }
 0x507   :  { %v3292_v2 = vadd.f32 %v3255_v4, %v3212_v42 }
 0x508   :  { %3047 = vst.msk [vmem:[%s6114_s11 + $0x70] sm:$0xff] %vm108_vm8, %v3031_v26  ;;  %v3216_v19 = vadd.f32 %v6399_v48, %v3191_v38 }
 0x509   :  { %3334 = vrot.lane.b32.xlu1 %v3292_v2, %s4157_s27  ;;  %v3261_v16 = vpop.permute.xlu0 %3260 }
 0x50a   :  { %v3259_v1 = vpop.permute.xlu1 %3258  ;;  %v3295_v51 = vadd.f32 %v3261_v16, %v3215_v46 }
 0x50b   :  { %v3294_v21 = vadd.f32 %v3259_v1, %v3214_v11 }
 0x50c   :  { %3340 = vrot.lane.b32.xlu0 %v3295_v51, %s4157_s27 }
 0x50d   :  { %3338 = vrot.lane.b32.xlu1 %v3294_v21, %s4157_s27  ;;  %v3265_v52 = vpop.permute.xlu0 %3264 }
 0x50e   :  { %v3263_v60 = vpop.permute.xlu1 %3262  ;;  %v3297_v8 = vadd.f32 %v3265_v52, %v3217_v56 }
 0x50f   :  { %v3296_v7 = vadd.f32 %v3263_v60, %v3216_v19 }
 0x510   :  { %3344 = vrot.lane.b32.xlu0 %v3297_v8, %s4157_s27 }
 0x511   :  { %3342 = vrot.lane.b32.xlu1 %v3296_v7, %s4157_s27 }
 0x53c   :  { %v3317_v44 = vpop.permute.xlu0 %3316 }
 0x53d   :  { %v3315_v6 = vpop.permute.xlu1 %3314  ;;  %3364 = vst.msk [vmem:[%s6114_s11 + $0x8] sm:$0xff] %vm3362_vm6, %v3317_v44 }
 0x53e   :  { %3363 = vst.msk [vmem:[%s6114_s11] sm:$0xff] %vm3362_vm6, %v3315_v6 }
 0x544   :  { %v3321_v48 = vpop.permute.xlu0 %3320 }
 0x545   :  { %3366 = vst.msk [vmem:[%s6114_s11 + $0x18] sm:$0xff] %vm3362_vm6, %v3321_v48 }
 0x54a   :  { %v3319_v35 = vpop.permute.xlu1 %3318 }
 0x54b   :  { %3365 = vst.msk [vmem:[%s6114_s11 + $0x10] sm:$0xff] %vm3362_vm6, %v3319_v35 }
 0x552   :  { %v3323_v36 = vpop.permute.xlu1 %3322  ;;  %v3325_v54 = vpop.permute.xlu0 %3324 }
 0x553   :  { %3367 = vst.msk [vmem:[%s6114_s11 + $0x20] sm:$0xff] %vm3362_vm6, %v3323_v36  ;;  %3368 = vst.msk [vmem:[%s6114_s11 + $0x28] sm:$0xff] %vm3362_vm6, %v3325_v54 }
 0x55a   :  { %v3327_v58 = vpop.permute.xlu1 %3326 }
 0x55b   :  { %v3329_v31 = vpop.permute.xlu0 %3328  ;;  %3369 = vst.msk [vmem:[%s6114_s11 + $0x30] sm:$0xff] %vm3362_vm6, %v3327_v58 }
 0x55c   :  { %3370 = vst.msk [vmem:[%s6114_s11 + $0x38] sm:$0xff] %vm3362_vm6, %v3329_v31 }
 0x562   :  { %v3331_v24 = vpop.permute.xlu1 %3330 }
 0x563   :  { %v3333_v5 = vpop.permute.xlu0 %3332  ;;  %3371 = vst.msk [vmem:[%s6114_s11 + $0x40] sm:$0xff] %vm3362_vm6, %v3331_v24 }
 0x564   :  { %3372 = vst.msk [vmem:[%s6114_s11 + $0x48] sm:$0xff] %vm3362_vm6, %v3333_v5 }
 0x572   :  { %v3337_v14 = vpop.permute.xlu0 %3336 }
 0x573   :  { %3374 = vst.msk [vmem:[%s6114_s11 + $0x58] sm:$0xff] %vm3362_vm6, %v3337_v14 }
 0x57b   :  { %v3335_v22 = vpop.permute.xlu1 %3334 }
 0x57c   :  { %3373 = vst.msk [vmem:[%s6114_s11 + $0x50] sm:$0xff] %vm3362_vm6, %v3335_v22 }
 0x57e   :  { %v3341_v29 = vpop.permute.xlu0 %3340 }
 0x57f   :  { %v3339_v23 = vpop.permute.xlu1 %3338  ;;  %3376 = vst.msk [vmem:[%s6114_s11 + $0x68] sm:$0xff] %vm3362_vm6, %v3341_v29 }
 0x580   :  { %3375 = vst.msk [vmem:[%s6114_s11 + $0x60] sm:$0xff] %vm3362_vm6, %v3339_v23 }
 0x582   :  { %v3345_v13 = vpop.permute.xlu0 %3344 }
 0x583   :  { %v3343_v50 = vpop.permute.xlu1 %3342  ;;  %3378 = vst.msk [vmem:[%s6114_s11 + $0x78] sm:$0xff] %vm3362_vm6, %v3345_v13 }
 0x584   :  { %3377 = vst.msk [vmem:[%s6114_s11 + $0x70] sm:$0xff] %vm3362_vm6, %v3343_v50 }

</bundles_post_ra>
